<compile_context>
chip_gen: v6e
topology: v6e:2x2x1
jax: 0.10.0
libtpu: 0.0.40
codegen_flags: <defaults>
</compile_context>

<pallas_src>
import functools

import jax
import jax.numpy as jnp
from jax.experimental import pallas as pl
from jax.experimental.pallas import tpu as pltpu

NEG_SLOPE = 0.1  # nn.LeakyReLU(negative_slope=0.1) in Conv1dNormRelu


def _lrelu(y):
    return jnp.where(y > 0, y, NEG_SLOPE * y)


def fuser_kernel(C2, H,
                 xy_ref, f2d_ref, f3d_ref,
                 b1_ref, w2_ref, b2_ref, w3_ref, b3_ref,
                 wfh_ref, wfp_ref, bf_ref,
                 out_ref):
    W = f2d_ref.shape[-1]
    tn = out_ref.shape[-1]                       # points in this tile (lane axis)

    # ---- grid_sample_wrapper setup (align_corners=True -> raw pixel coords) ----
    xy = xy_ref[...]                             # (2, TN) f32 pixel coords
    x = xy[0:1, :]
    y = xy[1:2, :]
    x0f = jnp.floor(x)
    y0f = jnp.floor(y)
    x0 = x0f.astype(jnp.int32)
    y0 = y0f.astype(jnp.int32)
    wx1 = x - x0f
    wx0 = 1.0 - wx1
    wy1 = y - y0f
    wy0 = 1.0 - wy1

    # Separable 2-hot interpolation operators.  Out-of-range corners simply find
    # no matching column/row (per-dimension equality, never a wrapped flat index),
    # which reproduces grid_sample's zeros padding exactly.
    cols = jax.lax.broadcasted_iota(jnp.int32, (W, tn), 0)
    dx = cols - x0                                                   # (W, TN)
    xhot = jnp.where(dx == 0, wx0, jnp.where(dx == 1, wx1, 0.0))     # (W, TN)

    rows = jax.lax.broadcasted_iota(jnp.int32, (H, tn), 0)
    dy = rows - y0                                                   # (H, TN)
    yw = jnp.where(dy == 0, wy0, jnp.where(dy == 1, wy1, 0.0))       # (H, TN)

    # x-gather + x-interp in one MXU matmul; f2d_ref already has w1 folded in.
    g = jnp.dot(f2d_ref[...], xhot.astype(f2d_ref.dtype),
                preferred_element_type=jnp.float32)                  # (C2*H, TN)
    # y-interp: 2-hot weighted sublane reduce over H.
    # TODO(synk): for very large C2*H*TN chunk this over H and accumulate s.
    s = jnp.sum(g.reshape(C2, H, tn) * yw[None, :, :], axis=1)       # (C2, TN)

    # ---- self.mlps (first conv folded into f2d) --------------------------------
    h = _lrelu(s + b1_ref[...])
    h = _lrelu(jnp.dot(w2_ref[...], h, preferred_element_type=jnp.float32)
               + b2_ref[...])
    h = _lrelu(jnp.dot(w3_ref[...], h, preferred_element_type=jnp.float32)
               + b3_ref[...])

    # ---- self.fuse: cat([h, feat_3d]) conv, concat eliminated by weight split --
    yf = (jnp.dot(wfh_ref[...], h, preferred_element_type=jnp.float32)
          + jnp.dot(wfp_ref[...], f3d_ref[...], preferred_element_type=jnp.float32)
          + bf_ref[...])
    out_ref[...] = _lrelu(yf)


def pyramid_feature_fuser_3d(xy, feat_2d, feat_3d, params, *,
                             tile_points=1024, gather_dtype=jnp.float32):
    """xy: [B,2,N] f32 pixel coords, feat_2d: [B,C2,H,W] f32, feat_3d: [B,C3,N] f32.
    Returns [B, C3, N] f32 (same layout as the PyTorch module).
    gather_dtype=jnp.bfloat16 uses the bf16 MXU for the gather matmul (v6e/v7x)."""
    w1, b1, w2, b2, w3, b3, wf, bf = params
    B, C2, H, W = feat_2d.shape
    _, C3, N = feat_3d.shape

    TN = min(tile_points, N)
    assert N % TN == 0 and (TN % 128 == 0 or TN == N), \
        "point tile must divide N and be lane-aligned (multiple of 128) or == N"

    # host-side glue (layout only + one tiny matmul, all handled once by XLA):
    #   fold w1 into feat_2d (bilinear sampling commutes with a 1x1 conv),
    #   reshape to (C2*H, W) for the separable x-gather matmul.
    xy_f = xy.astype(jnp.float32)
    f2d_fold = jnp.einsum("oi,bix->box", w1, feat_2d.reshape(B, C2, H * W))
    f2d_fold = f2d_fold.reshape(B, C2 * H, W).astype(gather_dtype)
    wf_h = wf[:, :C2]                                        # [C3, C2]
    wf_p = wf[:, C2:]                                        # [C3, C3]

    grid = (B, N // TN)

    # real separable per-point work: x-gather matmul + y reduce + 2 MLP convs + fuse
    flops = int(2 * B * N * (C2 * H * W + C2 * H + 2 * C2 * C2 + (C2 + C3) * C3))
    bytes_accessed = int(
        4 * (xy_f.size + feat_3d.size + B * C3 * N)
        + f2d_fold.dtype.itemsize * f2d_fold.size
        + 4 * (2 * C2 * C2 + (C2 + C3) * C3 + 3 * C2 + C3))
    cost = pl.CostEstimate(flops=flops, transcendentals=0,
                           bytes_accessed=bytes_accessed)

    # explicit VMEM budget: kernel temporaries + double-buffered tiles (+ slack),
    # clamped below v7x's 64 MiB physical VMEM.
    work_bytes = 4 * (3 * C2 * H * TN + 4 * (H + W) * TN + 3 * C2 * TN + 2 * C3 * TN)
    io_bytes = 2 * (4 * (2 * TN + 2 * C3 * TN
                         + 2 * C2 * C2 + (C2 + C3) * C3 + 3 * C2 + C3)
                    + f2d_fold.dtype.itemsize * C2 * H * W)
    vmem_limit = int(min(max(work_bytes + io_bytes + (2 << 20), 8 << 20), 48 << 20))

    kernel = functools.partial(fuser_kernel, C2, H)

    out = pl.pallas_call(
        kernel,
        out_shape=jax.ShapeDtypeStruct((B, C3, N), jnp.float32),
        grid=grid,
        in_specs=[
            pl.BlockSpec((None, 2, TN), lambda b, t: (b, 0, t)),      # xy
            pl.BlockSpec((None, C2 * H, W), lambda b, t: (b, 0, 0)),  # w1 @ feat_2d
            pl.BlockSpec((None, C3, TN), lambda b, t: (b, 0, t)),     # feat_3d
            pl.BlockSpec((C2, 1), lambda b, t: (0, 0)),               # mlps[0].b
            pl.BlockSpec((C2, C2), lambda b, t: (0, 0)),              # mlps[1].w
            pl.BlockSpec((C2, 1), lambda b, t: (0, 0)),               # mlps[1].b
            pl.BlockSpec((C2, C2), lambda b, t: (0, 0)),              # mlps[2].w
            pl.BlockSpec((C2, 1), lambda b, t: (0, 0)),               # mlps[2].b
            pl.BlockSpec((C3, C2), lambda b, t: (0, 0)),              # fuse.w[:, :C2]
            pl.BlockSpec((C3, C3), lambda b, t: (0, 0)),              # fuse.w[:, C2:]
            pl.BlockSpec((C3, 1), lambda b, t: (0, 0)),               # fuse.b
        ],
        out_specs=pl.BlockSpec((None, C3, TN), lambda b, t: (b, 0, t)),
        compiler_params=pltpu.CompilerParams(
            dimension_semantics=("parallel", "arbitrary"),
            vmem_limit_bytes=vmem_limit),
        cost_estimate=cost,
    )(xy_f, f2d_fold, feat_3d, b1, w2, b2, w3, b3, wf_h, wf_p, bf)

    return out


def reference(xy, feat_2d, feat_3d, params):
    """Pure-JAX reference mirroring the PyTorch forward pass (no w1 folding)."""
    w1, b1, w2, b2, w3, b3, wf, bf = params
    B, C2, H, W = feat_2d.shape
    _, C3, N = feat_3d.shape

    x = xy[:, 0, :]
    y = xy[:, 1, :]
    x0f = jnp.floor(x)
    y0f = jnp.floor(y)
    x0 = x0f.astype(jnp.int32)
    y0 = y0f.astype(jnp.int32)
    x1 = x0 + 1
    y1 = y0 + 1
    wx1 = x - x0f
    wx0 = 1.0 - wx1
    wy1 = y - y0f
    wy0 = 1.0 - wy1

    def corner(xi, yi, wgt):
        valid = ((xi >= 0) & (xi < W) & (yi >= 0) & (yi < H)).astype(jnp.float32)
        xc = jnp.clip(xi, 0, W - 1)
        yc = jnp.clip(yi, 0, H - 1)
        g = jax.vmap(lambda f, yy, xx: f[:, yy, xx])(feat_2d, yc, xc)  # [B, C2, N]
        return g * (wgt * valid)[:, None, :]

    s = (corner(x0, y0, wx0 * wy0) + corner(x1, y0, wx1 * wy0)
         + corner(x0, y1, wx0 * wy1) + corner(x1, y1, wx1 * wy1))      # [B, C2, N]

    def conv(h, w, b):
        yv = jnp.einsum("oi,bin->bon", w, h) + b[None]
        return jnp.where(yv > 0, yv, NEG_SLOPE * yv)

    h = conv(s, w1, b1)
    h = conv(h, w2, b2)
    h = conv(h, w3, b3)
    out = conv(jnp.concatenate([h, feat_3d], axis=1), wf, bf)
    return out


def init_params(key, c2, c3):
    """Deterministic synthetic weights: 1x1 conv1d as [Cout, Cin] matmul weights."""
    ks = jax.random.split(key, 4)

    def w(k, cout, cin):
        return jax.random.normal(k, (cout, cin), jnp.float32) * (cin ** -0.5)

    w1 = w(ks[0], c2, c2); b1 = jnp.full((c2, 1), 0.01, jnp.float32)
    w2 = w(ks[1], c2, c2); b2 = jnp.full((c2, 1), 0.02, jnp.float32)
    w3 = w(ks[2], c2, c2); b3 = jnp.full((c2, 1), 0.03, jnp.float32)
    wf = w(ks[3], c3, c2 + c3); bf = jnp.full((c3, 1), 0.04, jnp.float32)
    return (w1, b1, w2, b2, w3, b3, wf, bf)


if __name__ == "__main__":
    B, C2, C3 = 2, 16, 32
    H = W = 16
    N = 512

    key = jax.random.PRNGKey(0)
    k_x, k_y, k_f2, k_f3, k_p = jax.random.split(key, 5)

    # include a few out-of-image coordinates to exercise the zeros-padding path
    xy = jnp.stack([
        jax.random.uniform(k_x, (B, N), minval=-1.0, maxval=float(W)),
        jax.random.uniform(k_y, (B, N), minval=-1.0, maxval=float(H)),
    ], axis=1).astype(jnp.float32)                                   # [B, 2, N]
    feat_2d = jax.random.normal(k_f2, (B, C2, H, W), jnp.float32)    # [B, C2, H, W]
    feat_3d = jax.random.normal(k_f3, (B, C3, N), jnp.float32)       # [B, C3, N]
    params = init_params(k_p, C2, C3)

    # default tile_points=1024 clamps to N=512 -> grid = (2, 1), batch-parallel.
    out = jax.block_until_ready(
        pyramid_feature_fuser_3d(xy, feat_2d, feat_3d, params))
    ref = jax.block_until_ready(reference(xy, feat_2d, feat_3d, params))

    assert out.shape == (B, C3, N)
    max_err = float(jnp.max(jnp.abs(out - ref)))
    if max_err > 5e-2:
        raise AssertionError(f"kernel/reference mismatch, max abs err = {max_err}")
    print("KERNEL_OK")
</pallas_src>

<mosaic_0001>
module attributes {stable_mosaic.version = 11 : i64} {
  func.func @fuser_kernel(%arg0: i32, %arg1: i32, %arg2: memref<1x2x512xf32, #tpu.memory_space<vmem>>, %arg3: memref<1x256x16xf32, #tpu.memory_space<vmem>>, %arg4: memref<1x32x512xf32, #tpu.memory_space<vmem>>, %arg5: memref<16x1xf32, #tpu.memory_space<vmem>>, %arg6: memref<16x16xf32, #tpu.memory_space<vmem>>, %arg7: memref<16x1xf32, #tpu.memory_space<vmem>>, %arg8: memref<16x16xf32, #tpu.memory_space<vmem>>, %arg9: memref<16x1xf32, #tpu.memory_space<vmem>>, %arg10: memref<32x16xf32, #tpu.memory_space<vmem>>, %arg11: memref<32x32xf32, #tpu.memory_space<vmem>>, %arg12: memref<32x1xf32, #tpu.memory_space<vmem>>, %arg13: memref<1x32x512xf32, #tpu.memory_space<vmem>>) attributes {dimension_semantics = [#tpu.dimension_semantics<parallel>, #tpu.dimension_semantics<arbitrary>], iteration_bounds = array<i64: 2, 1>, scalar_prefetch = 0 : i64, scratch_operands = 0 : i64, tpu.core_type = #tpu.core_type<tc>, window_params = [{transform_indices = @transform_0, window_bounds = array<i64: 1, 2, 512>}, {transform_indices = @transform_1, window_bounds = array<i64: 1, 256, 16>}, {transform_indices = @transform_2, window_bounds = array<i64: 1, 32, 512>}, {pipeline_mode = #tpu.pipeline_mode<synchronous>, transform_indices = @transform_3, window_bounds = array<i64: 16, 1>}, {pipeline_mode = #tpu.pipeline_mode<synchronous>, transform_indices = @transform_4, window_bounds = array<i64: 16, 16>}, {pipeline_mode = #tpu.pipeline_mode<synchronous>, transform_indices = @transform_5, window_bounds = array<i64: 16, 1>}, {pipeline_mode = #tpu.pipeline_mode<synchronous>, transform_indices = @transform_6, window_bounds = array<i64: 16, 16>}, {pipeline_mode = #tpu.pipeline_mode<synchronous>, transform_indices = @transform_7, window_bounds = array<i64: 16, 1>}, {pipeline_mode = #tpu.pipeline_mode<synchronous>, transform_indices = @transform_8, window_bounds = array<i64: 32, 16>}, {pipeline_mode = #tpu.pipeline_mode<synchronous>, transform_indices = @transform_9, window_bounds = array<i64: 32, 32>}, {pipeline_mode = #tpu.pipeline_mode<synchronous>, transform_indices = @transform_10, window_bounds = array<i64: 32, 1>}, {transform_indices = @transform_11, window_bounds = array<i64: 1, 32, 512>}]} {
    %c0 = arith.constant 0 : index
    %c0_0 = arith.constant 0 : index
    %c0_1 = arith.constant 0 : index
    %0 = vector.load %arg2[%c0, %c0_0, %c0_1] : memref<1x2x512xf32, #tpu.memory_space<vmem>>, vector<1x2x512xf32>
    %1 = vector.shape_cast %0 : vector<1x2x512xf32> to vector<2x512xf32>
    %2 = vector.extract_strided_slice %1 {offsets = [0, 0], sizes = [1, 512], strides = [1, 1]} : vector<2x512xf32> to vector<1x512xf32>
    %3 = vector.extract_strided_slice %1 {offsets = [1, 0], sizes = [1, 512], strides = [1, 1]} : vector<2x512xf32> to vector<1x512xf32>
    %4 = math.floor %2 : vector<1x512xf32>
    %5 = math.floor %3 : vector<1x512xf32>
    %6 = arith.fptosi %4 : vector<1x512xf32> to vector<1x512xi32>
    %7 = arith.fptosi %5 : vector<1x512xf32> to vector<1x512xi32>
    %8 = arith.subf %2, %4 : vector<1x512xf32>
    %cst = arith.constant 1.000000e+00 : f32
    %9 = vector.broadcast %cst : f32 to vector<1x512xf32>
    %10 = arith.subf %9, %8 : vector<1x512xf32>
    %11 = arith.subf %3, %5 : vector<1x512xf32>
    %cst_2 = arith.constant 1.000000e+00 : f32
    %12 = vector.broadcast %cst_2 : f32 to vector<1x512xf32>
    %13 = arith.subf %12, %11 : vector<1x512xf32>
    %14 = tpu.iota {dimensions = array<i32: 0>} : vector<16x512xi32>
    %15 = vector.broadcast %6 : vector<1x512xi32> to vector<16x512xi32>
    %16 = arith.subi %14, %15 : vector<16x512xi32>
    %c0_i32 = arith.constant 0 : i32
    %17 = vector.broadcast %c0_i32 : i32 to vector<16x512xi32>
    %18 = arith.cmpi eq, %16, %17 : vector<16x512xi32>
    %c1_i32 = arith.constant 1 : i32
    %19 = vector.broadcast %c1_i32 : i32 to vector<16x512xi32>
    %20 = arith.cmpi eq, %16, %19 : vector<16x512xi32>
    %cst_3 = arith.constant 0.000000e+00 : f32
    %21 = vector.shape_cast %8 : vector<1x512xf32> to vector<1x512xf32>
    %22 = vector.broadcast %21 : vector<1x512xf32> to vector<16x512xf32>
    %23 = vector.broadcast %cst_3 : f32 to vector<16x512xf32>
    %24 = arith.select %20, %22, %23 : vector<16x512xi1>, vector<16x512xf32>
    %25 = vector.shape_cast %10 : vector<1x512xf32> to vector<1x512xf32>
    %26 = vector.broadcast %25 : vector<1x512xf32> to vector<16x512xf32>
    %27 = arith.select %18, %26, %24 : vector<16x512xi1>, vector<16x512xf32>
    %28 = tpu.iota {dimensions = array<i32: 0>} : vector<16x512xi32>
    %29 = vector.broadcast %7 : vector<1x512xi32> to vector<16x512xi32>
    %30 = arith.subi %28, %29 : vector<16x512xi32>
    %c0_i32_4 = arith.constant 0 : i32
    %31 = vector.broadcast %c0_i32_4 : i32 to vector<16x512xi32>
    %32 = arith.cmpi eq, %30, %31 : vector<16x512xi32>
    %c1_i32_5 = arith.constant 1 : i32
    %33 = vector.broadcast %c1_i32_5 : i32 to vector<16x512xi32>
    %34 = arith.cmpi eq, %30, %33 : vector<16x512xi32>
    %cst_6 = arith.constant 0.000000e+00 : f32
    %35 = vector.shape_cast %11 : vector<1x512xf32> to vector<1x512xf32>
    %36 = vector.broadcast %35 : vector<1x512xf32> to vector<16x512xf32>
    %37 = vector.broadcast %cst_6 : f32 to vector<16x512xf32>
    %38 = arith.select %34, %36, %37 : vector<16x512xi1>, vector<16x512xf32>
    %39 = vector.shape_cast %13 : vector<1x512xf32> to vector<1x512xf32>
    %40 = vector.broadcast %39 : vector<1x512xf32> to vector<16x512xf32>
    %41 = arith.select %32, %40, %38 : vector<16x512xi1>, vector<16x512xf32>
    %c0_7 = arith.constant 0 : index
    %c0_8 = arith.constant 0 : index
    %c0_9 = arith.constant 0 : index
    %42 = vector.load %arg3[%c0_7, %c0_8, %c0_9] : memref<1x256x16xf32, #tpu.memory_space<vmem>>, vector<1x256x16xf32>
    %43 = vector.shape_cast %42 : vector<1x256x16xf32> to vector<256x16xf32>
    %cst_10 = arith.constant dense<0.000000e+00> : vector<256x512xf32>
    %44 = tpu.matmul %43, %27, %cst_10 {dimension_numbers = #tpu.dot_dimension_numbers<[1], [0], [0], [1], [0, 0, 1, 1], [], []>} : vector<256x16xf32>, vector<16x512xf32>, vector<256x512xf32> -> vector<256x512xf32>
    %45 = vector.shape_cast %44 : vector<256x512xf32> to vector<16x16x512xf32>
    %46 = vector.shape_cast %41 : vector<16x512xf32> to vector<1x16x512xf32>
    %47 = vector.broadcast %46 : vector<1x16x512xf32> to vector<16x16x512xf32>
    %48 = arith.mulf %45, %47 : vector<16x16x512xf32>
    %cst_11 = arith.constant dense<0.000000e+00> : vector<16x512xf32>
    %49 = vector.multi_reduction <add>, %48, %cst_11 [1] : vector<16x16x512xf32> to vector<16x512xf32>
    %c0_12 = arith.constant 0 : index
    %c0_13 = arith.constant 0 : index
    %50 = vector.load %arg5[%c0_12, %c0_13] : memref<16x1xf32, #tpu.memory_space<vmem>>, vector<16x1xf32>
    %51 = vector.broadcast %50 : vector<16x1xf32> to vector<16x512xf32>
    %52 = arith.addf %49, %51 : vector<16x512xf32>
    %cst_14 = arith.constant 0.000000e+00 : f32
    %53 = vector.broadcast %cst_14 : f32 to vector<16x512xf32>
    %54 = arith.cmpf ogt, %52, %53 : vector<16x512xf32>
    %cst_15 = arith.constant 1.000000e-01 : f32
    %55 = vector.broadcast %cst_15 : f32 to vector<16x512xf32>
    %56 = arith.mulf %55, %52 : vector<16x512xf32>
    %57 = arith.select %54, %52, %56 : vector<16x512xi1>, vector<16x512xf32>
    %c0_16 = arith.constant 0 : index
    %c0_17 = arith.constant 0 : index
    %58 = vector.load %arg6[%c0_16, %c0_17] : memref<16x16xf32, #tpu.memory_space<vmem>>, vector<16x16xf32>
    %cst_18 = arith.constant dense<0.000000e+00> : vector<16x512xf32>
    %59 = tpu.matmul %58, %57, %cst_18 {dimension_numbers = #tpu.dot_dimension_numbers<[1], [0], [0], [1], [0, 0, 1, 1], [], []>} : vector<16x16xf32>, vector<16x512xf32>, vector<16x512xf32> -> vector<16x512xf32>
    %c0_19 = arith.constant 0 : index
    %c0_20 = arith.constant 0 : index
    %60 = vector.load %arg7[%c0_19, %c0_20] : memref<16x1xf32, #tpu.memory_space<vmem>>, vector<16x1xf32>
    %61 = vector.broadcast %60 : vector<16x1xf32> to vector<16x512xf32>
    %62 = arith.addf %59, %61 : vector<16x512xf32>
    %cst_21 = arith.constant 0.000000e+00 : f32
    %63 = vector.broadcast %cst_21 : f32 to vector<16x512xf32>
    %64 = arith.cmpf ogt, %62, %63 : vector<16x512xf32>
    %cst_22 = arith.constant 1.000000e-01 : f32
    %65 = vector.broadcast %cst_22 : f32 to vector<16x512xf32>
    %66 = arith.mulf %65, %62 : vector<16x512xf32>
    %67 = arith.select %64, %62, %66 : vector<16x512xi1>, vector<16x512xf32>
    %c0_23 = arith.constant 0 : index
    %c0_24 = arith.constant 0 : index
    %68 = vector.load %arg8[%c0_23, %c0_24] : memref<16x16xf32, #tpu.memory_space<vmem>>, vector<16x16xf32>
    %cst_25 = arith.constant dense<0.000000e+00> : vector<16x512xf32>
    %69 = tpu.matmul %68, %67, %cst_25 {dimension_numbers = #tpu.dot_dimension_numbers<[1], [0], [0], [1], [0, 0, 1, 1], [], []>} : vector<16x16xf32>, vector<16x512xf32>, vector<16x512xf32> -> vector<16x512xf32>
    %c0_26 = arith.constant 0 : index
    %c0_27 = arith.constant 0 : index
    %70 = vector.load %arg9[%c0_26, %c0_27] : memref<16x1xf32, #tpu.memory_space<vmem>>, vector<16x1xf32>
    %71 = vector.broadcast %70 : vector<16x1xf32> to vector<16x512xf32>
    %72 = arith.addf %69, %71 : vector<16x512xf32>
    %cst_28 = arith.constant 0.000000e+00 : f32
    %73 = vector.broadcast %cst_28 : f32 to vector<16x512xf32>
    %74 = arith.cmpf ogt, %72, %73 : vector<16x512xf32>
    %cst_29 = arith.constant 1.000000e-01 : f32
    %75 = vector.broadcast %cst_29 : f32 to vector<16x512xf32>
    %76 = arith.mulf %75, %72 : vector<16x512xf32>
    %77 = arith.select %74, %72, %76 : vector<16x512xi1>, vector<16x512xf32>
    %c0_30 = arith.constant 0 : index
    %c0_31 = arith.constant 0 : index
    %78 = vector.load %arg10[%c0_30, %c0_31] : memref<32x16xf32, #tpu.memory_space<vmem>>, vector<32x16xf32>
    %cst_32 = arith.constant dense<0.000000e+00> : vector<32x512xf32>
    %79 = tpu.matmul %78, %77, %cst_32 {dimension_numbers = #tpu.dot_dimension_numbers<[1], [0], [0], [1], [0, 0, 1, 1], [], []>} : vector<32x16xf32>, vector<16x512xf32>, vector<32x512xf32> -> vector<32x512xf32>
    %c0_33 = arith.constant 0 : index
    %c0_34 = arith.constant 0 : index
    %80 = vector.load %arg11[%c0_33, %c0_34] : memref<32x32xf32, #tpu.memory_space<vmem>>, vector<32x32xf32>
    %c0_35 = arith.constant 0 : index
    %c0_36 = arith.constant 0 : index
    %c0_37 = arith.constant 0 : index
    %81 = vector.load %arg4[%c0_35, %c0_36, %c0_37] : memref<1x32x512xf32, #tpu.memory_space<vmem>>, vector<1x32x512xf32>
    %82 = vector.shape_cast %81 : vector<1x32x512xf32> to vector<32x512xf32>
    %cst_38 = arith.constant dense<0.000000e+00> : vector<32x512xf32>
    %83 = tpu.matmul %80, %82, %cst_38 {dimension_numbers = #tpu.dot_dimension_numbers<[1], [0], [0], [1], [0, 0, 1, 1], [], []>} : vector<32x32xf32>, vector<32x512xf32>, vector<32x512xf32> -> vector<32x512xf32>
    %84 = arith.addf %79, %83 : vector<32x512xf32>
    %c0_39 = arith.constant 0 : index
    %c0_40 = arith.constant 0 : index
    %85 = vector.load %arg12[%c0_39, %c0_40] : memref<32x1xf32, #tpu.memory_space<vmem>>, vector<32x1xf32>
    %86 = vector.broadcast %85 : vector<32x1xf32> to vector<32x512xf32>
    %87 = arith.addf %84, %86 : vector<32x512xf32>
    %cst_41 = arith.constant 0.000000e+00 : f32
    %88 = vector.broadcast %cst_41 : f32 to vector<32x512xf32>
    %89 = arith.cmpf ogt, %87, %88 : vector<32x512xf32>
    %cst_42 = arith.constant 1.000000e-01 : f32
    %90 = vector.broadcast %cst_42 : f32 to vector<32x512xf32>
    %91 = arith.mulf %90, %87 : vector<32x512xf32>
    %92 = arith.select %89, %87, %91 : vector<32x512xi1>, vector<32x512xf32>
    %c0_43 = arith.constant 0 : index
    %c0_44 = arith.constant 0 : index
    %c0_45 = arith.constant 0 : index
    %93 = vector.load %arg13[%c0_43, %c0_44, %c0_45] : memref<1x32x512xf32, #tpu.memory_space<vmem>>, vector<1x32x512xf32>
    %94 = vector.shape_cast %93 : vector<1x32x512xf32> to vector<32x512xf32>
    %95 = vector.shape_cast %92 : vector<32x512xf32> to vector<1x32x512xf32>
    tpu.vector_store %arg13[%c0_43, %c0_44, %c0_45], %95 {strides = array<i32>} : memref<1x32x512xf32, #tpu.memory_space<vmem>>, vector<1x32x512xf32>,
    return
  }
  func.func @transform_0(%arg0: i32, %arg1: i32) -> (i32, i32, i32) {
    %c0_i32 = arith.constant 0 : i32
    %c0_i32_0 = arith.constant 0 : i32
    return %arg0, %c0_i32, %arg1 : i32, i32, i32
  }
  func.func @transform_1(%arg0: i32, %arg1: i32) -> (i32, i32, i32) {
    %c0_i32 = arith.constant 0 : i32
    %c0_i32_0 = arith.constant 0 : i32
    %c0_i32_1 = arith.constant 0 : i32
    return %arg0, %c0_i32, %c0_i32_0 : i32, i32, i32
  }
  func.func @transform_2(%arg0: i32, %arg1: i32) -> (i32, i32, i32) {
    %c0_i32 = arith.constant 0 : i32
    %c0_i32_0 = arith.constant 0 : i32
    return %arg0, %c0_i32, %arg1 : i32, i32, i32
  }
  func.func @transform_3(%arg0: i32, %arg1: i32) -> (i32, i32) {
    %c0_i32 = arith.constant 0 : i32
    %c0_i32_0 = arith.constant 0 : i32
    %c0_i32_1 = arith.constant 0 : i32
    return %c0_i32, %c0_i32_0 : i32, i32
  }
  func.func @transform_4(%arg0: i32, %arg1: i32) -> (i32, i32) {
    %c0_i32 = arith.constant 0 : i32
    %c0_i32_0 = arith.constant 0 : i32
    %c0_i32_1 = arith.constant 0 : i32
    return %c0_i32, %c0_i32_0 : i32, i32
  }
  func.func @transform_5(%arg0: i32, %arg1: i32) -> (i32, i32) {
    %c0_i32 = arith.constant 0 : i32
    %c0_i32_0 = arith.constant 0 : i32
    %c0_i32_1 = arith.constant 0 : i32
    return %c0_i32, %c0_i32_0 : i32, i32
  }
  func.func @transform_6(%arg0: i32, %arg1: i32) -> (i32, i32) {
    %c0_i32 = arith.constant 0 : i32
    %c0_i32_0 = arith.constant 0 : i32
    %c0_i32_1 = arith.constant 0 : i32
    return %c0_i32, %c0_i32_0 : i32, i32
  }
  func.func @transform_7(%arg0: i32, %arg1: i32) -> (i32, i32) {
    %c0_i32 = arith.constant 0 : i32
    %c0_i32_0 = arith.constant 0 : i32
    %c0_i32_1 = arith.constant 0 : i32
    return %c0_i32, %c0_i32_0 : i32, i32
  }
  func.func @transform_8(%arg0: i32, %arg1: i32) -> (i32, i32) {
    %c0_i32 = arith.constant 0 : i32
    %c0_i32_0 = arith.constant 0 : i32
    %c0_i32_1 = arith.constant 0 : i32
    return %c0_i32, %c0_i32_0 : i32, i32
  }
  func.func @transform_9(%arg0: i32, %arg1: i32) -> (i32, i32) {
    %c0_i32 = arith.constant 0 : i32
    %c0_i32_0 = arith.constant 0 : i32
    %c0_i32_1 = arith.constant 0 : i32
    return %c0_i32, %c0_i32_0 : i32, i32
  }
  func.func @transform_10(%arg0: i32, %arg1: i32) -> (i32, i32) {
    %c0_i32 = arith.constant 0 : i32
    %c0_i32_0 = arith.constant 0 : i32
    %c0_i32_1 = arith.constant 0 : i32
    return %c0_i32, %c0_i32_0 : i32, i32
  }
  func.func @transform_11(%arg0: i32, %arg1: i32) -> (i32, i32, i32) {
    %c0_i32 = arith.constant 0 : i32
    %c0_i32_0 = arith.constant 0 : i32
    return %arg0, %c0_i32, %arg1 : i32, i32, i32
  }
}

</mosaic_0001>

<bundles_post_ra>
// kernel: tpu_custom_call.1
= control target key start
LH: loop header
LB: loop body
LE: loop exit
PB: predicated region body
PF: predicated region fallthrough
CT: control target
= control target key end

     0   :  { %s5313_s0 = inlined_call_operand.vmem [shape: f32[2,2,512], index: 0, kind: input, shape index: {}]   ;;  %s5314_s1 = inlined_call_operand.vmem [shape: f32[2,256,16], index: 1, kind: input, shape index: {}]   ;;  %s5315_s2 = inlined_call_operand.vmem [shape: f32[2,32,512], index: 2, kind: input, shape index: {}]   ;;  %s5316_s3 = inlined_call_operand.vmem [shape: f32[16,1], index: 3, kind: input, shape index: {}]   ;;  %s5317_s4 = inlined_call_operand.vmem [shape: f32[16,16], index: 4, kind: input, shape index: {}]   ;;  %s5318_s5 = inlined_call_operand.vmem [shape: f32[16,1], index: 5, kind: input, shape index: {}]   ;;  %s5319_s6 = inlined_call_operand.vmem [shape: f32[16,16], index: 6, kind: input, shape index: {}]   ;;  %s5320_s7 = inlined_call_operand.vmem [shape: f32[16,1], index: 7, kind: input, shape index: {}]   ;;  %s5321_s8 = inlined_call_operand.vmem [shape: f32[32,16], index: 8, kind: input, shape index: {}]   ;;  %s5322_s9 = inlined_call_operand.vmem [shape: f32[32,32], index: 9, kind: input, shape index: {}]   ;;  %s5323_s10 = inlined_call_operand.vmem [shape: f32[32,1], index: 10, kind: input, shape index: {}]   ;;  %s5324_s11 = inlined_call_operand.hbm [shape: f32[2,32,512], index: 11, kind: output, shape index: {}]  }
   0x1   :  { %5363 = sst [smem:[#allocation53_spill]] %s5313_s0 }
   0x2   :  { %5364 = sst [smem:[#allocation54_spill]] %s5314_s1 }
   0x3   :  { %16 = vsyncpa [#allocation3], 0 }
   0x4   :  { %18 = vsyncpa [#allocation3 + $0x1], 0  ;;  %s3821_s17 = smov 0   ;;  %s3823_s18 = smov 0  }
   0x5   :  { %s3825_s19 = smov 0   ;;  %s3827_s20 = smov 0  }
   0x6   :  { %s3829_s21 = smov 0   ;;  %s3831_s22 = smov 0  }
   0x7 LB: > { %s3506_s23 = sadd.s32 4294967295, %s3754_s22   ;;  %s3507_s24 = sadd.s32 4294967294, %s3754_s22   ;;  %s3754_s22 = sphi %s3831_s22, %s24_s22   ;;  %s3750_s21 = sphi %s3829_s21, %s5492_s21   ;;  %s3746_s20 = sphi %s3827_s20, %s5491_s20   ;;  %s3742_s19 = sphi %s3825_s19, %s5490_s19   ;;  %s3738_s18 = sphi %s3823_s18, %s5489_s18   ;;  %s3734_s17 = sphi %s3821_s17, %s5488_s17  }
   0x8   : > { %s36_s25 = sadd.s32 1, %s3750_s21  ;;  %s295_s26 = sadd.s32 1, %s3742_s19 }
   0x9   : > { %p38_p0 = scmp.ge.s32.totalorder %s36_s25, 2  ;;  %p305_p1 = scmp.ne.s32.totalorder %s3742_s19, %s3738_s18 }
   0xa   : > { %p306_p2 = scmp.eq.s32.totalorder %s3506_s23, 1  ;;  %p311_p3 = scmp.ne.s32.totalorder %s3738_s18, %s3734_s17 }
   0xb   : > { %s5494_s25 = smov (%p38_p0, %s36_s25), 0  ;;  %p312_p5 = scmp.eq.s32.totalorder %s3507_s24, 1 }
   0xc   : > { %p3861_p4 = por %p306_p2, %p305_p1  ;;  %s290_s28 = ssub.s32 %s3750_s21, %s5494_s25 }
   0xd   : > { %p3510_p6 = scmp.ge.s32.totalorder %s3754_s22, 1  ;;  %p293_p7 = scmp.eq.s32.totalorder %s290_s28, 0 }
   0xe   : > { %p3868_p8 = por %p312_p5, %p311_p3  ;;  %p388_p9 = scmp.lt.s32.totalorder %s3754_s22, 3 }
   0xf   : > { %s3874_s30 = scalar_select %p293_p7, %s3742_s19, %s295_s26  }
  0x10   : > { %p389_p10 = pnand %p3510_p6, %p388_p9 }
  0x12   : > { %392 = sbr.rel (%p389_p10) target bundleno = 1147 (0x47b), region = 64 }
  0x17   : > { %p447_p11 = scmp.lt.s32.totalorder %s3746_s20, 1  ;;  %v1990_v0 = vld [vmem:[%s5316_s3 + $0x8] sm:$0xff]  ;;  %v477_v1 = vlaneseq  ;;  %v5325_v2 = vmov 0.0   ;;  %v3757_v3 = vmov 0   ;;  %v1989_v4 = vld [vmem:[%s5316_s3] sm:$0xff]  ;;  %s5367_s0 = sld [smem:[#allocation53_spill]] }
  0x18   : > { %963 = vmatprep.mubr.f32.mxu0 %v5325_v2  ;;  %1220 = vmatprep.mubr.f32.mxu1 %v5325_v2  ;;  %s5368_s1 = sld [smem:[#allocation54_spill]]  ;;  %s443_s24 = sand.u32 1, %s3738_s18  }
  0x19   : > { %s3883_s14 = scalar_select %p447_p11, %s3746_s20, 1  ;;  %3676 = vset.pattern.permute.xlu0 %v3757_v3  ;;  %3677 = vset.pattern.permute.xlu1 %v3757_v3  ;;  %v3892_v5 = vshrl.u32 %v477_v1, 7 }
  0x1a   : > { %1997 = vperm.xlu0 %3676, %v1990_v0   ;;  %s3511_s26 = sshll.u32 %s443_s24, 7 }
  0x1b   : > { %s3611_s15 = sshll.u32 %s3883_s14, 3  ;;  %v486_v10 = vsub.s32 2, %v3892_v5  ;;  %v494_v11 = vsub.s32 6, %v3892_v5  ;;  %v482_v12 = vsub.s32 0, %v3892_v5  ;;  %v490_v13 = vsub.s32 4, %v3892_v5  ;;  %s3612_s12 = sshll.u32 %s3883_s14, 8 }
  0x1c   : > { %v3908_v18 = vadd.s32 8, %v3892_v5 }
  0x1d   : > { %s454_s28 = scalar_lea.vmem %s5367_s0, %s3611_s15 }
  0x1e   : > { %v472_v6 = vld [vmem:[%s454_s28] sm:$0xff]  ;;  %1993 = vperm.xlu0 %3676, %v1989_v4   ;;  %s3930_s16 = scalar_lea.vmem %s5368_s1, %s3612_s12  ;;  %s3613_s12 = sshll.u32 %s3883_s14, 7 }
  0x1f   : > { %v473_v7 = vfloor.f32 %v472_v6  ;;  %v770_v62 = vld [vmem:[%s3930_s16] sm:$0xff]  ;;  %v771_v3 = vld [vmem:[%s3930_s16 + $0x8] sm:$0xff]  ;;  %v772_v4 = vld [vmem:[%s3930_s16 + $0x10] sm:$0xff]  ;;  %s5232_s28 = scalar_lea.vmem [#allocation2], %s3511_s26  ;;  %s3758_s26 = smov [#allocation2]  }
  0x20   : > { %s3397_s13 = sshll.u32 %s5232_s28, 4  ;;  %s3682_s0 = sshll.u32 %s3758_s26, 4  ;;  %s5263_s13 = int_to_ptr.vmem [resolvable:$true] %s3397_s13  ;;  %s3683_s0 = int_to_ptr.vmem [resolvable:$false] %s3682_s0 }
  0x21   : > { %v3615_v8 = vtrunc.f32 %v473_v7  ;;  %v3894_v9 = vsub.f32 %v472_v6, %v473_v7  ;;  %v773_v6 = vld [vmem:[%s3930_s16 + $0x18] sm:$0xff]  ;;  %v774_v7 = vld [vmem:[%s3930_s16 + $0x20] sm:$0xff]  ;;  %s3678_s23 = scalar_lea.vmem %s5263_s13, 2048  ;;  %p3685_p1 = scmp.lt.s32.totalorder %s5263_s13, %s3683_s0 }
  0x22   : > { %p3679_p12 = scmp.ne.s32.totalorder %s5263_s13, %s3678_s23 }
  0x23   : > { %v3900_v14 = vcvt.f32.s32 %v3615_v8  ;;  %v3903_v15 = vsub.f32 1.0, %v3894_v9  ;;  %v544_v16 = vrot.slane %v3894_v9, %v486_v10  ;;  %v552_v17 = vrot.slane %v3894_v9, %v494_v11  ;;  %v775_v8 = vld [vmem:[%s3930_s16 + $0x28] sm:$0xff] }
  0x24   : > { %v540_v19 = vrot.slane %v3894_v9, %v482_v12  ;;  %v548_v20 = vrot.slane %v3894_v9, %v490_v13  ;;  %p3680_p13 = pnand %p3679_p12, %p3861_p4 }
  0x25   : > { %v487_v21 = vrot.slane %v3900_v14, %v486_v10  ;;  %v564_v22 = vrot.slane %v544_v16, %v482_v12  ;;  %v589_v23 = vrot.slane %v3903_v15, %v486_v10  ;;  %v495_v24 = vrot.slane %v3900_v14, %v494_v11  ;;  %v776_v10 = vld [vmem:[%s3930_s16 + $0x30] sm:$0xff] }
  0x26   : > { %v572_v25 = vrot.slane %v552_v17, %v482_v12  ;;  %v597_v26 = vrot.slane %v3903_v15, %v494_v11  ;;  %v483_v27 = vrot.slane %v3900_v14, %v482_v12  ;;  %v560_v28 = vrot.slane %v540_v19, %v482_v12  ;;  %v777_v11 = vld [vmem:[%s3930_s16 + $0x38] sm:$0xff]  ;;  %v780_v16 = vld [vmem:[%s3930_s16 + $0x50] sm:$0xff]  ;;  %v782_v19 = vld [vmem:[%s3930_s16 + $0x60] sm:$0xff]  ;;  %p3681_p0 = pneg %p3680_p13 }
  0x27   : > { %v503_v29 = vrot.slane %v487_v21, %v482_v12  ;;  %v609_v30 = vrot.slane %v589_v23, %v482_v12  ;;  %v511_v31 = vrot.slane %v495_v24, %v482_v12  ;;  %v585_v32 = vrot.slane %v3903_v15, %v482_v12  ;;  %v781_v17 = vld [vmem:[%s3930_s16 + $0x58] sm:$0xff]  ;;  %v784_v21 = vld [vmem:[%s3930_s16 + $0x70] sm:$0xff]  ;;  %v786_v23 = vld [vmem:[%s3930_s16 + $0x80] sm:$0xff] }
  0x28   : > { %v617_v33 = vrot.slane %v597_v26, %v482_v12  ;;  %v499_v34 = vrot.slane %v483_v27, %v482_v12  ;;  %v491_v35 = vrot.slane %v3900_v14, %v490_v13  ;;  %v568_v36 = vrot.slane %v548_v20, %v482_v12  ;;  %v783_v20 = vld [vmem:[%s3930_s16 + $0x68] sm:$0xff]  ;;  %v788_v26 = vld [vmem:[%s3930_s16 + $0x90] sm:$0xff]  ;;  %v3277_v27 = vld [vmem:[%s5323_s10] sm:$0xff] }
  0x29   : > { %v517_v37 = vsub.s32 %v3908_v18, %v503_v29  ;;  %v519_v38 = vsub.s32 %v3908_v18, %v511_v31  ;;  %v605_v39 = vrot.slane %v585_v32, %v482_v12  ;;  %v593_v40 = vrot.slane %v3903_v15, %v490_v13  ;;  %v779_v13 = vld [vmem:[%s3930_s16 + $0x48] sm:$0xff]  ;;  %v792_v32 = vld [vmem:[%s3930_s16 + $0xb0] sm:$0xff] }
  0x2a   : > { %v516_v41 = vsub.s32 %v3908_v18, %v499_v34  ;;  %v507_v42 = vrot.slane %v491_v35, %v482_v12  ;;  %v513_v43 = vsub.s32 %v3892_v5, %v503_v29  ;;  %v515_v44 = vsub.s32 %v3892_v5, %v511_v31  ;;  %v787_v24 = vld [vmem:[%s3930_s16 + $0x88] sm:$0xff]  ;;  %v3279_v29 = vld [vmem:[%s5323_s10 + $0x10] sm:$0xff] }
  0x2b   : > { %vm525_vm0 = vcmp.eq.s32.totalorder %v517_v37, 0  ;;  %vm533_vm1 = vcmp.eq.s32.totalorder %v517_v37, 1  ;;  %vm527_vm2 = vcmp.eq.s32.totalorder %v519_v38, 0  ;;  %vm535_vm3 = vcmp.eq.s32.totalorder %v519_v38, 1  ;;  %v791_v31 = vld [vmem:[%s3930_s16 + $0xa8] sm:$0xff]  ;;  %v797_v37 = vld [vmem:[%s3930_s16 + $0xd8] sm:$0xff] }
  0x2c   : > { %v578_v45 = vsel %vm533_vm1, %v564_v22, 0.0  ;;  %v580_v46 = vsel %vm535_vm3, %v572_v25, 0.0  ;;  %vm524_vm4 = vcmp.eq.s32.totalorder %v516_v41, 0  ;;  %vm532_vm5 = vcmp.eq.s32.totalorder %v516_v41, 1  ;;  %v795_v35 = vld [vmem:[%s3930_s16 + $0xc8] sm:$0xff]  ;;  %v798_v38 = vld [vmem:[%s3930_s16 + $0xe0] sm:$0xff] }
  0x2d   : > { %v623_v47 = vsel %vm525_vm0, %v609_v30, %v578_v45  ;;  %v625_v48 = vsel %vm527_vm2, %v617_v33, %v580_v46  ;;  %v577_v49 = vsel %vm532_vm5, %v560_v28, 0.0  ;;  %v518_v50 = vsub.s32 %v3908_v18, %v507_v42  ;;  %v801_v41 = vld [vmem:[%s3930_s16 + $0xf8] sm:$0xff] }
  0x2e   : > { %927 = vmatprep.subr.mxu0 %v623_v47  ;;  %1184 = vmatprep.subr.mxu1 %v625_v48  ;;  %v622_v51 = vsel %vm524_vm4, %v605_v39, %v577_v49  ;;  %v613_v52 = vrot.slane %v593_v40, %v482_v12  ;;  %vm521_vm6 = vcmp.eq.s32.totalorder %v513_v43, 0  ;;  %vm529_vm7 = vcmp.eq.s32.totalorder %v513_v43, 1  ;;  %v778_v12 = vld [vmem:[%s3930_s16 + $0x40] sm:$0xff]  ;;  %v800_v40 = vld [vmem:[%s3930_s16 + $0xf0] sm:$0xff] }
  0x2f   : > { %928 = vmatpush1.msra.mxu0 %v622_v51  ;;  %vm526_vm8 = vcmp.eq.s32.totalorder %v518_v50, 0  ;;  %vm534_vm9 = vcmp.eq.s32.totalorder %v518_v50, 1  ;;  %v574_v53 = vsel %vm529_vm7, %v564_v22, 0.0  ;;  %vm523_vm10 = vcmp.eq.s32.totalorder %v515_v44, 0  ;;  %v785_v22 = vld [vmem:[%s3930_s16 + $0x78] sm:$0xff] }
  0x30   : > { %v579_v54 = vsel %vm534_vm9, %v568_v36, 0.0  ;;  %v619_v55 = vsel %vm521_vm6, %v609_v30, %v574_v53  ;;  %vm531_vm11 = vcmp.eq.s32.totalorder %v515_v44, 1  ;;  %v512_v56 = vsub.s32 %v3892_v5, %v499_v34  ;;  %v790_v30 = vld [vmem:[%s3930_s16 + $0xa0] sm:$0xff] }
  0x31   : > { %v624_v57 = vsel %vm526_vm8, %v613_v52, %v579_v54  ;;  %929 = vmatprep.subr.mxu0 %v619_v55  ;;  %v576_v58 = vsel %vm531_vm11, %v572_v25, 0.0  ;;  %v514_v59 = vsub.s32 %v3892_v5, %v507_v42  ;;  %vm802_vm0 = vcmask 130048   ;;  %v2677_v25 = vld [vmem:[%s5320_s7 + $0x8] sm:$0xff]  ;;  %v794_v34 = vld [vmem:[%s3930_s16 + $0xc0] sm:$0xff] }
  0x32   : > { %1185 = vmatpush1.msra.mxu1 %v624_v57  ;;  %v621_v60 = vsel %vm523_vm10, %v617_v33, %v576_v58  ;;  %vm520_vm12 = vcmp.eq.s32.totalorder %v512_v56, 0  ;;  %vm528_vm13 = vcmp.eq.s32.totalorder %v512_v56, 1  ;;  %2685 = vperm.xlu0 %3676, %v2677_v25   ;;  %v793_v33 = vld [vmem:[%s3930_s16 + $0xb8] sm:$0xff]  ;;  %v628_v42 = vsub.s32 1, %v3892_v5 }
  0x33   : > { %1186 = vmatprep.subr.mxu1 %v621_v60  ;;  %v573_v61 = vsel %vm528_vm13, %v560_v28, 0.0  ;;  %vm522_vm14 = vcmp.eq.s32.totalorder %v514_v59, 0  ;;  %vm530_vm15 = vcmp.eq.s32.totalorder %v514_v59, 1  ;;  %v789_v28 = vld [vmem:[%s3930_s16 + $0x98] sm:$0xff]  ;;  %v636_v44 = vsub.s32 5, %v3892_v5 }
  0x34   : > { %v618_v63 = vsel %vm520_vm12, %v605_v39, %v573_v61  ;;  %v575_v0 = vsel %vm530_vm15, %v568_v36, 0.0  ;;  %v796_v36 = vld [vmem:[%s3930_s16 + $0xd0] sm:$0xff]  ;;  %v799_v39 = vld [vmem:[%s3930_s16 + $0xe8] sm:$0xff]  ;;  %v629_v43 = vrot.slane %v3900_v14, %v628_v42  ;;  %v632_v45 = vsub.s32 3, %v3892_v5  ;;  %s5128_s16 = scalar_lea.vmem %s5315_s2, %s3613_s12  ;;  %s3614_s12 = sshll.u32 %s3746_s20, 11 }
  0x35   : > { %930 = vmatpush1.msra.mxu0 %v618_v63  ;;  %v620_v1 = vsel %vm522_vm14, %v613_v52, %v575_v0  ;;  %v637_v47 = vrot.slane %v3900_v14, %v636_v44  ;;  %v640_v48 = vsub.s32 7, %v3892_v5  ;;  %v685_v49 = vrot.slane %v3894_v9, %v628_v42  ;;  %s5261_s14 = scalar_lea.hbm %s5324_s11, %s3614_s12  ;;  %s5268_s20 = scalar_lea.sflag [#allocation3], %s443_s24 }
  0x36   : > { %1187 = vmatpush1.msra.mxu1 %v620_v1  ;;  %3518 = vmatmul.mubr.msk.f32.vlgmr.msra.gmra.mxu0 %vm802_vm0, %v770_v62  ;;  %v645_v46 = vrot.slane %v629_v43, %v628_v42  ;;  %v633_v50 = vrot.slane %v3900_v14, %v632_v45  ;;  %v729_v54 = vrot.slane %v3903_v15, %v628_v42  ;;  %s3684_s12 = scalar_lea.vmem %s3683_s0, 4096 }
  0x37   : > { %3550 = vmatmul.mubr.msk.f32.vlgmr.msra.gmra.mxu1 %vm802_vm0, %v770_v62  ;;  %969 = vmatprep.mubr.f32.mxu0 %v5325_v2  ;;  %v653_v52 = vrot.slane %v637_v47, %v628_v42  ;;  %v641_v53 = vrot.slane %v3900_v14, %v640_v48  ;;  %v705_v55 = vrot.slane %v685_v49, %v628_v42  ;;  %p3686_p2 = scmp.lt.s32.totalorder %s3684_s12, %s3678_s23 }
  0x38   : > { %1226 = vmatprep.mubr.f32.mxu1 %v5325_v2  ;;  %3283 = vperm.xlu0 %3676, %v3277_v27   ;;  %v658_v51 = vsub.s32 %v3892_v5, %v645_v46  ;;  %v649_v56 = vrot.slane %v633_v50, %v628_v42  ;;  %v693_v57 = vrot.slane %v3894_v9, %v636_v44 }
  0x39   : > { %v660_v58 = vsub.s32 %v3892_v5, %v653_v52  ;;  %v657_v59 = vrot.slane %v641_v53, %v628_v42  ;;  %v749_v60 = vrot.slane %v729_v54, %v628_v42  ;;  %v737_v61 = vrot.slane %v3903_v15, %v636_v44  ;;  %p3687_p3 = por %p3686_p2, %p3685_p1 }
  0x3a   : > { %3519 = vmatmul.mubr.msk.f32.gmra.mxu0 %vm802_vm0, %v771_v3  ;;  %vm674_vm1 = vcmp.eq.s32.totalorder %v658_v51, 1  ;;  %v689_v62 = vrot.slane %v3894_v9, %v632_v45  ;;  %v662_v63 = vsub.s32 %v3908_v18, %v645_v46  ;;  %vm666_vm2 = vcmp.eq.s32.totalorder %v658_v51, 0 }
  0x3b   : > { %3551 = vmatmul.mubr.msk.f32.gmra.mxu1 %vm802_vm0, %v771_v3  ;;  %975 = vmatprep.mubr.f32.mxu0 %v5325_v2  ;;  %v718_v0 = vsel %vm674_vm1, %v705_v55, 0.0  ;;  %v659_v14 = vsub.s32 %v3892_v5, %v649_v56  ;;  %v664_v1 = vsub.s32 %v3908_v18, %v653_v52  ;;  %v713_v3 = vrot.slane %v693_v57, %v628_v42  ;;  %p3688_p5 = pnand %p3687_p3, %p3681_p0 }
  0x3c   : > { %1232 = vmatprep.mubr.f32.mxu1 %v5325_v2  ;;  %3293 = vperm.xlu0 %3676, %v3279_v29   ;;  %vm676_vm3 = vcmp.eq.s32.totalorder %v660_v58, 1  ;;  %vm678_vm4 = vcmp.eq.s32.totalorder %v662_v63, 1  ;;  %vm668_vm5 = vcmp.eq.s32.totalorder %v660_v58, 0  ;;  %vm670_vm10 = vcmp.eq.s32.totalorder %v662_v63, 0 }
  0x3d   : > { %vm675_vm6 = vcmp.eq.s32.totalorder %v659_v14, 1  ;;  %vm680_vm7 = vcmp.eq.s32.totalorder %v664_v1, 1  ;;  %vm667_vm12 = vcmp.eq.s32.totalorder %v659_v14, 0  ;;  %vm672_vm13 = vcmp.eq.s32.totalorder %v664_v1, 0 }
  0x3e   : > { %3520 = vmatmul.mubr.msk.f32.gmra.mxu0 %vm802_vm0, %v772_v4 }
  0x3f   : > { %3552 = vmatmul.mubr.msk.f32.gmra.mxu1 %vm802_vm0, %v772_v4  ;;  %981 = vmatprep.mubr.f32.mxu0 %v5325_v2  ;;  %v733_v4 = vrot.slane %v3903_v15, %v632_v45 }
  0x40   : > { %1238 = vmatprep.mubr.f32.mxu1 %v5325_v2 }
  0x42   : > { %3521 = vmatmul.mubr.msk.f32.gmra.mxu0 %vm802_vm0, %v773_v6 }
  0x43   : > { %3553 = vmatmul.mubr.msk.f32.gmra.mxu1 %vm802_vm0, %v773_v6  ;;  %987 = vmatprep.mubr.f32.mxu0 %v5325_v2  ;;  %v697_v6 = vrot.slane %v3894_v9, %v640_v48 }
  0x44   : > { %1244 = vmatprep.mubr.f32.mxu1 %v5325_v2 }
  0x45   : > { %v717_v9 = vrot.slane %v697_v6, %v628_v42 }
  0x46   : > { %3522 = vmatmul.mubr.msk.f32.gmra.mxu0 %vm802_vm0, %v774_v7 }
  0x47   : > { %3554 = vmatmul.mubr.msk.f32.gmra.mxu1 %vm802_vm0, %v774_v7  ;;  %993 = vmatprep.mubr.f32.mxu0 %v5325_v2  ;;  %v663_v7 = vsub.s32 %v3908_v18, %v649_v56 }
  0x48   : > { %1250 = vmatprep.mubr.f32.mxu1 %v5325_v2 }
  0x49   : > { %vm679_vm8 = vcmp.eq.s32.totalorder %v663_v7, 1  ;;  %vm671_vm15 = vcmp.eq.s32.totalorder %v663_v7, 0 }
  0x4a   : > { %3523 = vmatmul.mubr.msk.f32.gmra.mxu0 %vm802_vm0, %v775_v8 }
  0x4b   : > { %3555 = vmatmul.mubr.msk.f32.gmra.mxu1 %vm802_vm0, %v775_v8  ;;  %999 = vmatprep.mubr.f32.mxu0 %v5325_v2  ;;  %v661_v8 = vsub.s32 %v3892_v5, %v657_v59 }
  0x4c   : > { %1256 = vmatprep.mubr.f32.mxu1 %v5325_v2 }
  0x4d   : > { %vm677_vm9 = vcmp.eq.s32.totalorder %v661_v8, 1  ;;  %vm669_vm14 = vcmp.eq.s32.totalorder %v661_v8, 0 }
  0x4e   : > { %3524 = vmatmul.mubr.msk.f32.gmra.mxu0 %vm802_vm0, %v776_v10  ;;  %v721_v25 = vsel %vm677_vm9, %v717_v9, 0.0 }
  0x4f   : > { %3556 = vmatmul.mubr.msk.f32.gmra.mxu1 %vm802_vm0, %v776_v10  ;;  %1005 = vmatprep.mubr.f32.mxu0 %v5325_v2  ;;  %v665_v10 = vsub.s32 %v3908_v18, %v657_v59 }
  0x50   : > { %1262 = vmatprep.mubr.f32.mxu1 %v5325_v2 }
  0x51   : > { %vm681_vm11 = vcmp.eq.s32.totalorder %v665_v10, 1  ;;  %vm673_vm1 = vcmp.eq.s32.totalorder %v665_v10, 0 }
  0x52   : > { %3525 = vmatmul.mubr.msk.f32.gmra.mxu0 %vm802_vm0, %v777_v11  ;;  %v725_v27 = vsel %vm681_vm11, %v717_v9, 0.0 }
  0x53   : > { %3557 = vmatmul.mubr.msk.f32.gmra.mxu1 %vm802_vm0, %v777_v11  ;;  %1011 = vmatprep.mubr.f32.mxu0 %v5325_v2  ;;  %v4126_v11 = vsel %vm666_vm2, %v749_v60, %v718_v0 }
  0x54   : > { %1268 = vmatprep.mubr.f32.mxu1 %v5325_v2 }
  0x56   : > { %3526 = vmatmul.mubr.msk.f32.gmra.mxu0 %vm802_vm0, %v778_v12 }
  0x57   : > { %3558 = vmatmul.mubr.msk.f32.gmra.mxu1 %vm802_vm0, %v778_v12  ;;  %1017 = vmatprep.mubr.f32.mxu0 %v5325_v2  ;;  %v757_v12 = vrot.slane %v737_v61, %v628_v42 }
  0x58   : > { %1274 = vmatprep.mubr.f32.mxu1 %v5325_v2 }
  0x5a   : > { %3527 = vmatmul.mubr.msk.f32.gmra.mxu0 %vm802_vm0, %v779_v13 }
  0x5b   : > { %3559 = vmatmul.mubr.msk.f32.gmra.mxu1 %vm802_vm0, %v779_v13  ;;  %1023 = vmatprep.mubr.f32.mxu0 %v5325_v2  ;;  %v709_v13 = vrot.slane %v689_v62, %v628_v42 }
  0x5c   : > { %1280 = vmatprep.mubr.f32.mxu1 %v5325_v2 }
  0x5d   : > { %v719_v18 = vsel %vm675_vm6, %v709_v13, 0.0 }
  0x5e   : > { %3528 = vmatmul.mubr.msk.f32.gmra.mxu0 %vm802_vm0, %v780_v16 }
  0x5f   : > { %3560 = vmatmul.mubr.msk.f32.gmra.mxu1 %vm802_vm0, %v780_v16  ;;  %1029 = vmatprep.mubr.f32.mxu0 %v5325_v2  ;;  %v741_v16 = vrot.slane %v3903_v15, %v640_v48 }
  0x60   : > { %1286 = vmatprep.mubr.f32.mxu1 %v5325_v2 }
  0x62   : > { %3529 = vmatmul.mubr.msk.f32.gmra.mxu0 %vm802_vm0, %v781_v17 }
  0x63   : > { %3561 = vmatmul.mubr.msk.f32.gmra.mxu1 %vm802_vm0, %v781_v17  ;;  %1035 = vmatprep.mubr.f32.mxu0 %v5325_v2  ;;  %v720_v17 = vsel %vm676_vm3, %v713_v3, 0.0 }
  0x64   : > { %1292 = vmatprep.mubr.f32.mxu1 %v5325_v2 }
  0x66   : > { %3530 = vmatmul.mubr.msk.f32.gmra.mxu0 %vm802_vm0, %v782_v19 }
  0x67   : > { %3562 = vmatmul.mubr.msk.f32.gmra.mxu1 %vm802_vm0, %v782_v19  ;;  %1041 = vmatprep.mubr.f32.mxu0 %v5325_v2  ;;  %v753_v19 = vrot.slane %v733_v4, %v628_v42 }
  0x68   : > { %1298 = vmatprep.mubr.f32.mxu1 %v5325_v2 }
  0x6a   : > { %3531 = vmatmul.mubr.msk.f32.gmra.mxu0 %vm802_vm0, %v783_v20 }
  0x6b   : > { %3563 = vmatmul.mubr.msk.f32.gmra.mxu1 %vm802_vm0, %v783_v20  ;;  %1047 = vmatprep.mubr.f32.mxu0 %v5325_v2  ;;  %v722_v20 = vsel %vm678_vm4, %v705_v55, 0.0 }
  0x6c   : > { %1304 = vmatprep.mubr.f32.mxu1 %v5325_v2 }
  0x6e   : > { %3532 = vmatmul.mubr.msk.f32.gmra.mxu0 %vm802_vm0, %v784_v21 }
  0x6f   : > { %3564 = vmatmul.mubr.msk.f32.gmra.mxu1 %vm802_vm0, %v784_v21  ;;  %1053 = vmatprep.mubr.f32.mxu0 %v5325_v2  ;;  %v724_v21 = vsel %vm680_vm7, %v713_v3, 0.0 }
  0x70   : > { %1310 = vmatprep.mubr.f32.mxu1 %v5325_v2 }
  0x72   : > { %3533 = vmatmul.mubr.msk.f32.gmra.mxu0 %vm802_vm0, %v785_v22 }
  0x73   : > { %3565 = vmatmul.mubr.msk.f32.gmra.mxu1 %vm802_vm0, %v785_v22  ;;  %1059 = vmatprep.mubr.f32.mxu0 %v5325_v2 }
  0x74   : > { %1316 = vmatprep.mubr.f32.mxu1 %v5325_v2 }
  0x76   : > { %3534 = vmatmul.mubr.msk.f32.gmra.mxu0 %vm802_vm0, %v786_v23 }
  0x77   : > { %3566 = vmatmul.mubr.msk.f32.gmra.mxu1 %vm802_vm0, %v786_v23  ;;  %1065 = vmatprep.mubr.f32.mxu0 %v5325_v2  ;;  %v761_v23 = vrot.slane %v741_v16, %v628_v42 }
  0x78   : > { %1322 = vmatprep.mubr.f32.mxu1 %v5325_v2 }
  0x7a   : > { %3535 = vmatmul.mubr.msk.f32.gmra.mxu0 %vm802_vm0, %v787_v24 }
  0x7b   : > { %3567 = vmatmul.mubr.msk.f32.gmra.mxu1 %vm802_vm0, %v787_v24  ;;  %1071 = vmatprep.mubr.f32.mxu0 %v5325_v2  ;;  %v723_v24 = vsel %vm679_vm8, %v709_v13, 0.0 }
  0x7c   : > { %1328 = vmatprep.mubr.f32.mxu1 %v5325_v2 }
  0x7e   : > { %3536 = vmatmul.mubr.msk.f32.gmra.mxu0 %vm802_vm0, %v788_v26 }
  0x7f   : > { %3568 = vmatmul.mubr.msk.f32.gmra.mxu1 %vm802_vm0, %v788_v26  ;;  %1077 = vmatprep.mubr.f32.mxu0 %v5325_v2  ;;  %v4129_v26 = vsel %vm670_vm10, %v749_v60, %v722_v20 }
  0x80   : > { %1334 = vmatprep.mubr.f32.mxu1 %v5325_v2 }
  0x82   : > { %3537 = vmatmul.mubr.msk.f32.gmra.mxu0 %vm802_vm0, %v789_v28 }
  0x83   : > { %3569 = vmatmul.mubr.msk.f32.gmra.mxu1 %vm802_vm0, %v789_v28  ;;  %1083 = vmatprep.mubr.f32.mxu0 %v5325_v2  ;;  %v4132_v28 = vsel %vm668_vm5, %v757_v12, %v720_v17 }
  0x84   : > { %1340 = vmatprep.mubr.f32.mxu1 %v5325_v2 }
  0x86   : > { %3538 = vmatmul.mubr.msk.f32.gmra.mxu0 %vm802_vm0, %v790_v30 }
  0x87   : > { %3570 = vmatmul.mubr.msk.f32.gmra.mxu1 %vm802_vm0, %v790_v30  ;;  %1089 = vmatprep.mubr.f32.mxu0 %v5325_v2  ;;  %v4134_v30 = vsel %vm672_vm13, %v757_v12, %v724_v21 }
  0x88   : > { %1346 = vmatprep.mubr.f32.mxu1 %v5325_v2 }
  0x8a   : > { %3539 = vmatmul.mubr.msk.f32.gmra.mxu0 %vm802_vm0, %v791_v31 }
  0x8b   : > { %3571 = vmatmul.mubr.msk.f32.gmra.mxu1 %vm802_vm0, %v791_v31  ;;  %1095 = vmatprep.mubr.f32.mxu0 %v5325_v2  ;;  %v4137_v31 = vsel %vm667_vm12, %v753_v19, %v719_v18 }
  0x8c   : > { %1352 = vmatprep.mubr.f32.mxu1 %v5325_v2 }
  0x8e   : > { %3540 = vmatmul.mubr.msk.f32.gmra.mxu0 %vm802_vm0, %v792_v32 }
  0x8f   : > { %3572 = vmatmul.mubr.msk.f32.gmra.mxu1 %vm802_vm0, %v792_v32  ;;  %1101 = vmatprep.mubr.f32.mxu0 %v5325_v2 }
  0x90   : > { %1358 = vmatprep.mubr.f32.mxu1 %v5325_v2 }
  0x92   : > { %3541 = vmatmul.mubr.msk.f32.gmra.mxu0 %vm802_vm0, %v793_v33 }
  0x93   : > { %3573 = vmatmul.mubr.msk.f32.gmra.mxu1 %vm802_vm0, %v793_v33  ;;  %1107 = vmatprep.mubr.f32.mxu0 %v5325_v2  ;;  %v4139_v33 = vsel %vm671_vm15, %v753_v19, %v723_v24 }
  0x94   : > { %1364 = vmatprep.mubr.f32.mxu1 %v5325_v2 }
  0x95   : > { %v4154_v50 = vpop.permute.xlu0 %1997 }
  0x96   : > { %3542 = vmatmul.mubr.msk.f32.gmra.mxu0 %vm802_vm0, %v794_v34 }
  0x97   : > { %3574 = vmatmul.mubr.msk.f32.gmra.mxu1 %vm802_vm0, %v794_v34  ;;  %1113 = vmatprep.mubr.f32.mxu0 %v5325_v2 }
  0x98   : > { %1370 = vmatprep.mubr.f32.mxu1 %v5325_v2 }
  0x99   : > { %v4160_v6 = vpop.permute.xlu0 %1993 }
  0x9a   : > { %3543 = vmatmul.mubr.msk.f32.gmra.mxu0 %vm802_vm0, %v795_v35  ;;  %5369 = vst [vmem:[#allocation5_spill] sm:$0xff] %v4160_v6  ;;  %v4165_v13 = vrot.slane %v4160_v6, 2  ;;  %v4170_v20 = vrot.slane %v4160_v6, 3 }
  0x9b   : > { %3575 = vmatmul.mubr.msk.f32.gmra.mxu1 %vm802_vm0, %v795_v35  ;;  %1119 = vmatprep.mubr.f32.mxu0 %v5325_v2  ;;  %v4143_v35 = vsel %vm669_vm14, %v761_v23, %v721_v25 }
  0x9c   : > { %1376 = vmatprep.mubr.f32.mxu1 %v5325_v2 }
  0x9e   : > { %3544 = vmatmul.mubr.msk.f32.gmra.mxu0 %vm802_vm0, %v796_v36 }
  0x9f   : > { %3576 = vmatmul.mubr.msk.f32.gmra.mxu1 %vm802_vm0, %v796_v36  ;;  %1125 = vmatprep.mubr.f32.mxu0 %v5325_v2 }
  0xa0   : > { %1382 = vmatprep.mubr.f32.mxu1 %v5325_v2 }
  0xa2   : > { %3545 = vmatmul.mubr.msk.f32.gmra.mxu0 %vm802_vm0, %v797_v37 }
  0xa3   : > { %3577 = vmatmul.mubr.msk.f32.gmra.mxu1 %vm802_vm0, %v797_v37  ;;  %1131 = vmatprep.mubr.f32.mxu0 %v5325_v2 }
  0xa4   : > { %1388 = vmatprep.mubr.f32.mxu1 %v5325_v2 }
  0xa6   : > { %3546 = vmatmul.mubr.msk.f32.gmra.mxu0 %vm802_vm0, %v798_v38 }
  0xa7   : > { %3578 = vmatmul.mubr.msk.f32.gmra.mxu1 %vm802_vm0, %v798_v38  ;;  %1137 = vmatprep.mubr.f32.mxu0 %v5325_v2  ;;  %v4146_v38 = vsel %vm673_vm1, %v761_v23, %v725_v27 }
  0xa8   : > { %1394 = vmatprep.mubr.f32.mxu1 %v5325_v2 }
  0xaa   : > { %3547 = vmatmul.mubr.msk.f32.gmra.mxu0 %vm802_vm0, %v799_v39 }
  0xab   : > { %3579 = vmatmul.mubr.msk.f32.gmra.mxu1 %vm802_vm0, %v799_v39  ;;  %1143 = vmatprep.mubr.f32.mxu0 %v5325_v2 }
  0xac   : > { %1400 = vmatprep.mubr.f32.mxu1 %v5325_v2 }
  0xae   : > { %3548 = vmatmul.mubr.msk.f32.gmra.mxu0 %vm802_vm0, %v800_v40 }
  0xaf   : > { %3580 = vmatmul.mubr.msk.f32.gmra.mxu1 %vm802_vm0, %v800_v40  ;;  %1149 = vmatprep.mubr.f32.mxu0 %v5325_v2 }
  0xb0   : > { %1406 = vmatprep.mubr.f32.mxu1 %v5325_v2 }
  0xb2   : > { %3549 = vmatmul.mubr.msk.f32.gmra.mxu0 %vm802_vm0, %v801_v41 }
  0xb3   : > { %3581 = vmatmul.mubr.msk.f32.gmra.mxu1 %vm802_vm0, %v801_v41  ;;  %2560 = vmatprep.mubr.f32.mxu0 %v5325_v2 }
  0xb4   : > { %2637 = vmatprep.mubr.f32.mxu1 %v5325_v2 }
  0xf6   : > { %v965_v5 = vpop.f32.mrf.mxu0 }
  0xf7   : > { %v1222_v22 = vpop.f32.mrf.mxu1  ;;  %v1413_v34 = vmul.f32 %v965_v5, %v4126_v11 }
  0xf8   : > { %v967_v15 = vpop.f32.mrf.mxu0  ;;  %v1415_v39 = vmul.f32 %v1222_v22, %v4132_v28 }
  0xf9   : > { %v1224_v29 = vpop.f32.mrf.mxu1  ;;  %v1414_v42 = vmul.f32 %v967_v15, %v4137_v31 }
  0xfa   : > { %v971_v32 = vpop.f32.mrf.mxu0  ;;  %v1416_v46 = vmul.f32 %v1224_v29, %v4143_v35 }
  0xfb   : > { %v1417_v36 = vmul.f32 %v971_v32, %v4129_v26  ;;  %v1228_v37 = vpop.f32.mrf.mxu1 }
  0xfc   : > { %v1419_v40 = vmul.f32 %v1228_v37, %v4134_v30  ;;  %v973_v41 = vpop.f32.mrf.mxu0  ;;  %v4173_v37 = vrot.slane %v4160_v6, 4 }
  0xfd   : > { %v1541_v43 = vadd.f32 %v1417_v36, %v1413_v34  ;;  %v1418_v44 = vmul.f32 %v973_v41, %v4139_v33  ;;  %v1230_v45 = vpop.f32.mrf.mxu1 }
  0xfe   : > { %v1555_v47 = vadd.f32 %v1419_v40, %v1415_v39  ;;  %v1420_v48 = vmul.f32 %v1230_v45, %v4146_v38  ;;  %v977_v49 = vpop.f32.mrf.mxu0  ;;  %v4176_v39 = vrot.slane %v4160_v6, 5 }
  0xff   : > { %v1542_v51 = vrot.slane %v1541_v43, 4  ;;  %v1548_v52 = vadd.f32 %v1418_v44, %v1414_v42  ;;  %v1234_v53 = vpop.f32.mrf.mxu1  ;;  %v1421_v61 = vmul.f32 %v977_v49, %v4126_v11  ;;  %v4182_v44 = vrot.slane %v4160_v6, 7 }
 0x100   : > { %v1556_v54 = vrot.slane %v1555_v47, 4  ;;  %v1562_v55 = vadd.f32 %v1420_v48, %v1416_v46  ;;  %v979_v56 = vpop.f32.mrf.mxu0  ;;  %v1423_v1 = vmul.f32 %v1234_v53, %v4132_v28  ;;  %v4188_v48 = vrot.slane %v4154_v50, 2 }
 0x101   : > { %v1236_v57 = vpop.f32.mrf.mxu1  ;;  %v1543_v59 = vadd.f32 %v1542_v51, %v1541_v43  ;;  %v1549_v60 = vrot.slane %v1548_v52, 4  ;;  %v1422_v7 = vmul.f32 %v979_v56, %v4137_v31  ;;  %v4179_v43 = vrot.slane %v4160_v6, 6  ;;  %5371 = vst [vmem:[#allocation7_spill] sm:$0xff] %v4182_v44 }
 0x102   : > { %v983_v58 = vpop.f32.mrf.mxu0  ;;  %v1557_v0 = vadd.f32 %v1556_v54, %v1555_v47  ;;  %v1563_v14 = vrot.slane %v1562_v55, 4  ;;  %v1424_v16 = vmul.f32 %v1236_v57, %v4143_v35  ;;  %v4185_v47 = vrot.slane %v4154_v50, 1  ;;  %5373 = vst [vmem:[#allocation9_spill] sm:$0xff] %v4188_v48 }
 0x103   : > { %v1425_v62 = vmul.f32 %v983_v58, %v4129_v26  ;;  %v1240_v63 = vpop.f32.mrf.mxu1  ;;  %v1544_v5 = vrot.slane %v1543_v59, 2  ;;  %v1550_v18 = vadd.f32 %v1549_v60, %v1548_v52  ;;  %5370 = vst [vmem:[#allocation6_spill] sm:$0xff] %v4179_v43  ;;  %v4191_v49 = vrot.slane %v4160_v6, 1 }
 0x104   : > { %v1427_v3 = vmul.f32 %v1240_v63, %v4134_v30  ;;  %v985_v4 = vpop.f32.mrf.mxu0  ;;  %v1558_v24 = vrot.slane %v1557_v0, 2  ;;  %v1564_v15 = vadd.f32 %v1563_v14, %v1562_v55  ;;  %5372 = vst [vmem:[#allocation8_spill] sm:$0xff] %v4185_v47 }
 0x105   : > { %v1569_v8 = vadd.f32 %v1425_v62, %v1421_v61  ;;  %v1426_v10 = vmul.f32 %v985_v4, %v4139_v33  ;;  %v1242_v12 = vpop.f32.mrf.mxu1  ;;  %5374 = vst [vmem:[#allocation10_spill] sm:$0xff] %v4191_v49  ;;  %v4193_v51 = vadd.f32 %v1544_v5, %v1543_v59  ;;  %v1551_v53 = vrot.slane %v1550_v18, 2 }
 0x106   : > { %v1583_v17 = vadd.f32 %v1427_v3, %v1423_v1  ;;  %v1428_v19 = vmul.f32 %v1242_v12, %v4146_v38  ;;  %v989_v9 = vpop.f32.mrf.mxu0  ;;  %v4195_v52 = vadd.f32 %v1558_v24, %v1557_v0  ;;  %v1565_v54 = vrot.slane %v1564_v15, 2 }
 0x107   : > { %v1570_v21 = vrot.slane %v1569_v8, 4  ;;  %v1576_v22 = vadd.f32 %v1426_v10, %v1422_v7  ;;  %v1246_v23 = vpop.f32.mrf.mxu1  ;;  %v1429_v60 = vmul.f32 %v989_v9, %v4126_v11  ;;  %v4208_v12 = vadd.f32 %v1551_v53, %v1550_v18 }
 0x108   : > { %v1584_v25 = vrot.slane %v1583_v17, 4  ;;  %v1590_v27 = vadd.f32 %v1428_v19, %v1424_v16  ;;  %v991_v29 = vpop.f32.mrf.mxu0  ;;  %v1431_v63 = vmul.f32 %v1246_v23, %v4132_v28  ;;  %v4211_v5 = vadd.f32 %v1565_v54, %v1564_v15 }
 0x109   : > { %v1571_v32 = vadd.f32 %v1570_v21, %v1569_v8  ;;  %v1577_v34 = vrot.slane %v1576_v22, 4  ;;  %v1248_v36 = vpop.f32.mrf.mxu1  ;;  %v1430_v0 = vmul.f32 %v991_v29, %v4137_v31 }
 0x10a   : > { %v1585_v40 = vadd.f32 %v1584_v25, %v1583_v17  ;;  %v1591_v41 = vrot.slane %v1590_v27, 4  ;;  %v995_v42 = vpop.f32.mrf.mxu0  ;;  %v1432_v3 = vmul.f32 %v1248_v36, %v4143_v35 }
 0x10b   : > { %v1578_v45 = vadd.f32 %v1577_v34, %v1576_v22  ;;  %v1252_v46 = vpop.f32.mrf.mxu1  ;;  %v1572_v56 = vrot.slane %v1571_v32, 2  ;;  %v1433_v14 = vmul.f32 %v995_v42, %v4129_v26 }
 0x10c   : > { %v997_v55 = vpop.f32.mrf.mxu0  ;;  %v1586_v57 = vrot.slane %v1585_v40, 2  ;;  %v4197_v58 = vadd.f32 %v1591_v41, %v1590_v27  ;;  %v1435_v59 = vmul.f32 %v1252_v46, %v4134_v30 }
 0x10d   : > { %v1254_v61 = vpop.f32.mrf.mxu1  ;;  %v1579_v62 = vrot.slane %v1578_v45, 2  ;;  %v1434_v4 = vmul.f32 %v997_v55, %v4139_v33  ;;  %v1597_v16 = vadd.f32 %v1433_v14, %v1429_v60  ;;  %v4213_v24 = vadd.f32 %v1572_v56, %v1571_v32 }
 0x10e   : > { %v1001_v1 = vpop.f32.mrf.mxu0  ;;  %v1436_v7 = vmul.f32 %v1254_v61, %v4146_v38  ;;  %v1611_v17 = vadd.f32 %v1435_v59, %v1431_v63  ;;  %v4215_v25 = vadd.f32 %v1586_v57, %v1585_v40  ;;  %v1593_v18 = vrot.slane %v4197_v58, 2 }
 0x10f   : > { %v1258_v8 = vpop.f32.mrf.mxu1  ;;  %v1604_v21 = vadd.f32 %v1434_v4, %v1430_v0  ;;  %v1598_v27 = vrot.slane %v1597_v16, 4  ;;  %v4217_v36 = vadd.f32 %v1579_v62, %v1578_v45  ;;  %v1437_v54 = vmul.f32 %v1001_v1, %v4126_v11 }
 0x110   : > { %v1003_v19 = vpop.f32.mrf.mxu0  ;;  %v1618_v22 = vadd.f32 %v1436_v7, %v1432_v3  ;;  %v1612_v29 = vrot.slane %v1611_v17, 4  ;;  %v1439_v55 = vmul.f32 %v1258_v8, %v4132_v28  ;;  %v1588_v6 = vrot.slane %v4215_v25, 1 }
 0x111   : > { %v1260_v23 = vpop.f32.mrf.mxu1  ;;  %v1605_v41 = vrot.slane %v1604_v21, 4  ;;  %v1599_v53 = vadd.f32 %v1598_v27, %v1597_v16  ;;  %v1438_v57 = vmul.f32 %v1003_v19, %v4137_v31 }
 0x112   : > { %v1007_v34 = vpop.f32.mrf.mxu0  ;;  %v1619_v42 = vrot.slane %v1618_v22, 4  ;;  %v1613_v15 = vadd.f32 %v1612_v29, %v1611_v17  ;;  %v1440_v60 = vmul.f32 %v1260_v23, %v4143_v35 }
 0x113   : > { %v1264_v46 = vpop.f32.mrf.mxu1  ;;  %v1606_v56 = vadd.f32 %v1605_v41, %v1604_v21  ;;  %v1600_v61 = vrot.slane %v1599_v53, 2  ;;  %v1441_v63 = vmul.f32 %v1007_v34, %v4129_v26 }
 0x114   : > { %v1009_v32 = vpop.f32.mrf.mxu0  ;;  %v1620_v40 = vadd.f32 %v1619_v42, %v1618_v22  ;;  %v1614_v62 = vrot.slane %v1613_v15, 2  ;;  %v1443_v14 = vmul.f32 %v1264_v46, %v4134_v30 }
 0x115   : > { %v1266_v45 = vpop.f32.mrf.mxu1  ;;  %v1607_v0 = vrot.slane %v1606_v56, 2  ;;  %v1442_v3 = vmul.f32 %v1009_v32, %v4139_v33  ;;  %v1601_v8 = vadd.f32 %v1600_v61, %v1599_v53  ;;  %v1625_v17 = vadd.f32 %v1441_v63, %v1437_v54 }
 0x116   : > { %v4226_v59 = vpop.f32.mrf.mxu0  ;;  %v1621_v1 = vrot.slane %v1620_v40, 2  ;;  %v1444_v4 = vmul.f32 %v1266_v45, %v4146_v38  ;;  %v1615_v16 = vadd.f32 %v1614_v62, %v1613_v15  ;;  %v1639_v19 = vadd.f32 %v1443_v14, %v1439_v55 }
 0x117   : > { %v4230_v7 = vpop.f32.mrf.mxu1  ;;  %v1608_v22 = vadd.f32 %v1607_v0, %v1606_v56  ;;  %v1632_v27 = vadd.f32 %v1442_v3, %v1438_v57  ;;  %v1602_v41 = vrot.slane %v1601_v8, 1  ;;  %v1626_v46 = vrot.slane %v1625_v17, 4 }
 0x118   : > { %v4232_v21 = vpop.f32.mrf.mxu0  ;;  %v1622_v23 = vadd.f32 %v1621_v1, %v1620_v40  ;;  %v1646_v29 = vadd.f32 %v1444_v4, %v1440_v60  ;;  %v1616_v42 = vrot.slane %v1615_v16, 1  ;;  %v1640_v32 = vrot.slane %v1639_v19, 4 }
 0x119   : > { %v4234_v34 = vpop.f32.mrf.mxu1  ;;  %v1609_v45 = vrot.slane %v1608_v22, 1  ;;  %v1633_v53 = vrot.slane %v1632_v27, 4  ;;  %v1553_v55 = vrot.slane %v4208_v12, 1  ;;  %v1603_v61 = vadd.f32 %v1602_v41, %v1601_v8 }
 0x11a   : > { %v4236_v2 = vpop.f32.mrf.mxu0  ;;  %v1623_v9 = vrot.slane %v1622_v23, 1  ;;  %v1647_v15 = vrot.slane %v1646_v29, 4  ;;  %v1627_v56 = vadd.f32 %v1626_v46, %v1625_v17  ;;  %v1641_v40 = vadd.f32 %v1640_v32, %v1639_v19 }
 0x11b   : > { %v1276_v54 = vpop.f32.mrf.mxu1  ;;  %v1567_v60 = vrot.slane %v4211_v5, 1  ;;  %v1617_v62 = vadd.f32 %v1616_v42, %v1615_v16  ;;  %v1634_v63 = vadd.f32 %v1633_v53, %v1632_v27  ;;  %v1574_v1 = vrot.slane %v4213_v24, 1 }
 0x11c   : > { %v1021_v57 = vpop.f32.mrf.mxu0  ;;  %v1648_v14 = vadd.f32 %v1647_v15, %v1646_v29  ;;  %v1610_v3 = vadd.f32 %v1609_v45, %v1608_v22  ;;  %v1628_v4 = vrot.slane %v1627_v56, 2  ;;  %v1642_v10 = vrot.slane %v1641_v40, 2 }
 0x11d   : > { %v1278_v0 = vpop.f32.mrf.mxu1  ;;  %v1581_v8 = vrot.slane %v4217_v36, 1  ;;  %v1594_v17 = vadd.f32 %v1593_v18, %v4197_v58  ;;  %v1624_v19 = vadd.f32 %v1623_v9, %v1622_v23  ;;  %v5375_v16 = vrot.slane %v4193_v51, 1 }
 0x11e   : > { %v4241_v49 = vpop.f32.mrf.mxu0  ;;  %v5377_v22 = vrot.slane %v4195_v52, 1  ;;  %v4259_v42 = vadd.f32 %v1553_v55, %v4208_v12  ;;  %v2037_v46 = vadd.f32 %v4165_v13, %v1603_v61  ;;  %v4265_v58 = vadd.f32 %v1567_v60, %v4211_v5 }
 0x11f   : > { %v4246_v41 = vpop.f32.mrf.mxu1  ;;  %v4251_v27 = vadd.f32 %v5375_v16, %v4193_v51  ;;  %v2039_v9 = vadd.f32 %v4165_v13, %v1617_v62  ;;  %v1635_v18 = vrot.slane %v1634_v63, 2  ;;  %v1649_v51 = vrot.slane %v1648_v14, 2 }
 0x120   : > { %v4256_v29 = vadd.f32 %v5377_v22, %v4195_v52  ;;  %5379 = vst [vmem:[#allocation13_spill] sm:$0xff] %v4259_v42  ;;  %v4262_v32 = vpop.f32.mrf.mxu0  ;;  %5380 = vst [vmem:[#allocation14_spill] sm:$0xff] %v4265_v58  ;;  %v4271_v45 = vadd.f32 %v1574_v1, %v4213_v24  ;;  %v2038_v52 = vadd.f32 %v4165_v13, %v1610_v3  ;;  %v1595_v61 = vrot.slane %v1594_v17, 1 }
 0x121   : > { %5376 = vst [vmem:[#allocation11_spill] sm:$0xff] %v4251_v27  ;;  %v4268_v23 = vpop.f32.mrf.mxu1  ;;  %v1629_v12 = vadd.f32 %v1628_v4, %v1627_v56  ;;  %v1643_v53 = vadd.f32 %v1642_v10, %v1641_v40  ;;  %v4277_v55 = vadd.f32 %v1588_v6, %v4215_v25  ;;  %v4280_v5 = vadd.f32 %v1581_v8, %v4217_v36 }
 0x122   : > { %5378 = vst [vmem:[#allocation12_spill] sm:$0xff] %v4256_v29  ;;  %5381 = vst [vmem:[#allocation15_spill] sm:$0xff] %v4271_v45  ;;  %v4274_v15 = vpop.f32.mrf.mxu0  ;;  %v2040_v60 = vadd.f32 %v4165_v13, %v1624_v19  ;;  %vm2101_vm2 = vcmp.gt.f32.partialorder %v2037_v46, 0.0  ;;  %v2165_v24 = vmul.f32 0.1, %v2037_v46  ;;  %vm2103_vm3 = vcmp.gt.f32.partialorder %v2039_v9, 0.0 }
 0x123   : > { %5382 = vst [vmem:[#allocation16_spill] sm:$0xff] %v4277_v55  ;;  %5383 = vst [vmem:[#allocation17_spill] sm:$0xff] %v4280_v5  ;;  %v4283_v62 = vpop.f32.mrf.mxu1  ;;  %v1630_v1 = vrot.slane %v1629_v12, 1  ;;  %v1644_v16 = vrot.slane %v1643_v53, 1  ;;  %v2167_v10 = vmul.f32 0.1, %v2039_v9  ;;  %v1636_v56 = vadd.f32 %v1635_v18, %v1634_v63 }
 0x124   : > { %v4285_v3 = vpop.f32.mrf.mxu0  ;;  %v1650_v40 = vadd.f32 %v1649_v51, %v1648_v14  ;;  %vm2102_vm4 = vcmp.gt.f32.partialorder %v2038_v52, 0.0  ;;  %v2166_v25 = vmul.f32 0.1, %v2038_v52  ;;  %v1445_v13 = vmul.f32 %v4226_v59, %v4126_v11 }
 0x125   : > { %v4287_v6 = vpop.f32.mrf.mxu1  ;;  %v1631_v36 = vadd.f32 %v1630_v1, %v1629_v12  ;;  %v1645_v8 = vadd.f32 %v1644_v16, %v1643_v53  ;;  %v1447_v19 = vmul.f32 %v4230_v7, %v4132_v28  ;;  %v1449_v22 = vmul.f32 %v4236_v2, %v4129_v26 }
 0x126   : > { %v4291_v4 = vpop.f32.mrf.mxu0  ;;  %v1451_v63 = vmul.f32 %v1276_v54, %v4134_v30  ;;  %v4301_v18 = vsel %vm2101_vm2, %v2037_v46, %v2165_v24  ;;  %v2168_v51 = vmul.f32 0.1, %v2040_v60  ;;  %v1450_v12 = vmul.f32 %v1021_v57, %v4139_v33 }
 0x127   : > { %v4298_v14 = vpop.f32.mrf.mxu1  ;;  %5384 = vst [vmem:[#allocation18_spill] sm:$0xff] %v4301_v18  ;;  %v1452_v59 = vmul.f32 %v1278_v0, %v4146_v38  ;;  %v1637_v53 = vrot.slane %v1636_v56, 1  ;;  %v1651_v16 = vrot.slane %v1650_v40, 1  ;;  %v1653_v7 = vadd.f32 %v1449_v22, %v1445_v13 }
 0x128   : > { %v4305_v1 = vpop.f32.mrf.mxu0  ;;  %v1667_v55 = vadd.f32 %v1451_v63, %v1447_v19  ;;  %vm2104_vm5 = vcmp.gt.f32.partialorder %v2040_v60, 0.0  ;;  %v4310_v2 = vadd.f32 %v4170_v20, %v1631_v36  ;;  %v1446_v54 = vmul.f32 %v4232_v21, %v4137_v31 }
 0x129   : > { %v4307_v29 = vpop.f32.mrf.mxu1  ;;  %v1448_v57 = vmul.f32 %v4234_v34, %v4143_v35  ;;  %v4318_v0 = vadd.f32 %v1595_v61, %v1594_v17  ;;  %v4321_v24 = vadd.f32 %v4170_v20, %v1645_v8  ;;  %v1654_v13 = vrot.slane %v1653_v7, 4 }
 0x12a   : > { %v4316_v46 = vpop.f32.mrf.mxu0  ;;  %v1668_v19 = vrot.slane %v1667_v55, 4  ;;  %v4327_v63 = vsel %vm2103_vm3, %v2039_v9, %v2167_v10  ;;  %v1660_v21 = vadd.f32 %v1450_v12, %v1446_v54  ;;  %v4332_v34 = vsel %vm2102_vm4, %v2038_v52, %v2166_v25 }
 0x12b   : > { %5385 = vst [vmem:[#allocation19_spill] sm:$0xff] %v4318_v0  ;;  %v4323_v22 = vpop.f32.mrf.mxu1  ;;  %5386 = vst [vmem:[#allocation20_spill] sm:$0xff] %v4327_v63  ;;  %v1674_v45 = vadd.f32 %v1452_v59, %v1448_v57  ;;  %v4335_v17 = vsel %vm2104_vm5, %v2040_v60, %v2168_v51  ;;  %v1638_v61 = vadd.f32 %v1637_v53, %v1636_v56  ;;  %vm2105_vm6 = vcmp.gt.f32.partialorder %v4310_v2, 0.0 }
 0x12c   : > { %v4329_v27 = vpop.f32.mrf.mxu0  ;;  %5387 = vst [vmem:[#allocation21_spill] sm:$0xff] %v4332_v34  ;;  %5388 = vst [vmem:[#allocation22_spill] sm:$0xff] %v4335_v17  ;;  %v1652_v8 = vadd.f32 %v1651_v16, %v1650_v40  ;;  %v2169_v36 = vmul.f32 0.1, %v4310_v2  ;;  %v1655_v9 = vadd.f32 %v1654_v13, %v1653_v7  ;;  %v1669_v10 = vadd.f32 %v1668_v19, %v1667_v55 }
 0x12d   : > { %v4337_v0 = vpop.f32.mrf.mxu1  ;;  %vm2107_vm7 = vcmp.gt.f32.partialorder %v4321_v24, 0.0  ;;  %v2171_v52 = vmul.f32 0.1, %v4321_v24  ;;  %v1661_v25 = vrot.slane %v1660_v21, 4  ;;  %v1675_v59 = vrot.slane %v1674_v45, 4 }
 0x12e   : > { %v4341_v12 = vpop.f32.mrf.mxu0  ;;  %v1656_v56 = vrot.slane %v1655_v9, 2  ;;  %v1670_v40 = vrot.slane %v1669_v10, 2  ;;  %v1453_v51 = vmul.f32 %v4241_v49, %v4126_v11  ;;  %v1455_v53 = vmul.f32 %v4246_v41, %v4132_v28 }
 0x12f   : > { %v4345_v60 = vpop.f32.mrf.mxu1  ;;  %v1662_v55 = vadd.f32 %v1661_v25, %v1660_v21  ;;  %v1676_v7 = vadd.f32 %v1675_v59, %v1674_v45  ;;  %v1454_v54 = vmul.f32 %v4262_v32, %v4137_v31  ;;  %v1456_v57 = vmul.f32 %v4268_v23, %v4143_v35 }
 0x130   : > { %v4351_v16 = vpop.f32.mrf.mxu0  ;;  %v1657_v19 = vadd.f32 %v1656_v56, %v1655_v9  ;;  %v1671_v63 = vadd.f32 %v1670_v40, %v1669_v10  ;;  %v1457_v49 = vmul.f32 %v4274_v15, %v4129_v26  ;;  %v1459_v41 = vmul.f32 %v4283_v62, %v4134_v30 }
 0x131   : > { %v4357_v13 = vpop.f32.mrf.mxu1  ;;  %v1663_v21 = vrot.slane %v1662_v55, 2  ;;  %v1677_v45 = vrot.slane %v1676_v7, 2  ;;  %v1458_v32 = vmul.f32 %v4285_v3, %v4139_v33  ;;  %v1460_v23 = vmul.f32 %v4287_v6, %v4146_v38 }
 0x132   : > { %v4363_v18 = vpop.f32.mrf.mxu0  ;;  %v1658_v9 = vrot.slane %v1657_v19, 1  ;;  %v1672_v10 = vrot.slane %v1671_v63, 1  ;;  %v1681_v59 = vadd.f32 %v1457_v49, %v1453_v51  ;;  %v1695_v56 = vadd.f32 %v1459_v41, %v1455_v53 }
 0x133   : > { %v4369_v25 = vpop.f32.mrf.mxu1  ;;  %v1664_v40 = vadd.f32 %v1663_v21, %v1662_v55  ;;  %v1678_v62 = vadd.f32 %v1677_v45, %v1676_v7  ;;  %v1688_v58 = vadd.f32 %v1458_v32, %v1454_v54  ;;  %v1702_v5 = vadd.f32 %v1460_v23, %v1456_v57 }
 0x134   : > { %v4371_v15 = vpop.f32.mrf.mxu0  ;;  %v4376_v48 = vadd.f32 %v4170_v20, %v1638_v61  ;;  %v4379_v3 = vadd.f32 %v4170_v20, %v1652_v8  ;;  %v1682_v6 = vrot.slane %v1681_v59, 4  ;;  %v1696_v47 = vrot.slane %v1695_v56, 4 }
 0x135   : > { %v4373_v42 = vpop.f32.mrf.mxu1  ;;  %v4386_v51 = vsel %vm2105_vm6, %v4310_v2, %v2169_v36  ;;  %v1665_v53 = vrot.slane %v1664_v40, 1  ;;  %v1689_v55 = vrot.slane %v1688_v58, 4  ;;  %v1703_v7 = vrot.slane %v1702_v5, 4 }
 0x136   : > { %v4381_v44 = vpop.f32.mrf.mxu0  ;;  %5389 = vst [vmem:[#allocation23_spill] sm:$0xff] %v4386_v51  ;;  %v1659_v57 = vadd.f32 %v1658_v9, %v1657_v19  ;;  %v1679_v61 = vrot.slane %v1678_v62, 1  ;;  %v1683_v49 = vadd.f32 %v1682_v6, %v1681_v59  ;;  %v1697_v41 = vadd.f32 %v1696_v47, %v1695_v56 }
 0x137   : > { %v4388_v54 = vpop.f32.mrf.mxu1  ;;  %v1673_v8 = vadd.f32 %v1672_v10, %v1671_v63  ;;  %v1666_v21 = vadd.f32 %v1665_v53, %v1664_v40  ;;  %v1690_v45 = vadd.f32 %v1689_v55, %v1688_v58  ;;  %v1704_v32 = vadd.f32 %v1703_v7, %v1702_v5 }
 0x138   : > { %v4390_v20 = vpop.f32.mrf.mxu0  ;;  %v4400_v19 = vsel %vm2107_vm7, %v4321_v24, %v2171_v52  ;;  %vm2106_vm8 = vcmp.gt.f32.partialorder %v4376_v48, 0.0  ;;  %v2170_v58 = vmul.f32 0.1, %v4376_v48  ;;  %v1684_v5 = vrot.slane %v1683_v49, 2 }
 0x139   : > { %v4392_v23 = vpop.f32.mrf.mxu1  ;;  %5390 = vst [vmem:[#allocation24_spill] sm:$0xff] %v4400_v19  ;;  %v1698_v63 = vrot.slane %v1697_v41, 2  ;;  %vm2108_vm9 = vcmp.gt.f32.partialorder %v4379_v3, 0.0  ;;  %v1680_v10 = vadd.f32 %v1679_v61, %v1678_v62  ;;  %v1691_v59 = vrot.slane %v1690_v45, 2 }
 0x13a   : > { %v4402_v47 = vpop.f32.mrf.mxu0  ;;  %v1705_v56 = vrot.slane %v1704_v32, 2  ;;  %v2172_v24 = vmul.f32 0.1, %v4379_v3  ;;  %v4413_v52 = vadd.f32 %v4173_v37, %v1659_v57  ;;  %v4416_v6 = vadd.f32 %v4173_v37, %v1673_v8 }
 0x13b   : > { %v4406_v9 = vpop.f32.mrf.mxu1  ;;  %v4419_v53 = vadd.f32 %v4173_v37, %v1666_v21  ;;  %v1685_v7 = vadd.f32 %v1684_v5, %v1683_v49  ;;  %v1699_v43 = vadd.f32 %v1698_v63, %v1697_v41  ;;  %v1692_v62 = vadd.f32 %v1691_v59, %v1690_v45 }
 0x13c   : > { %v4409_v40 = vpop.f32.mrf.mxu0  ;;  %5391 = vst [vmem:[#allocation25_spill] sm:$0xff] %v4413_v52  ;;  %5392 = vst [vmem:[#allocation26_spill] sm:$0xff] %v4416_v6  ;;  %v1706_v61 = vadd.f32 %v1705_v56, %v1704_v32  ;;  %v1461_v36 = vmul.f32 %v4291_v4, %v4126_v11  ;;  %v1463_v2 = vmul.f32 %v4298_v14, %v4132_v28 }
 0x13d   : > { %v4421_v55 = vpop.f32.mrf.mxu1  ;;  %v1465_v57 = vmul.f32 %v4316_v46, %v4129_v26  ;;  %v1467_v8 = vmul.f32 %v4323_v22, %v4134_v30  ;;  %v4434_v19 = vadd.f32 %v4173_v37, %v1680_v10  ;;  %v1686_v49 = vrot.slane %v1685_v7, 1 }
 0x13e   : > { %v4431_v21 = vpop.f32.mrf.mxu0  ;;  %v1462_v41 = vmul.f32 %v4305_v1, %v4137_v31  ;;  %v1464_v4 = vmul.f32 %v4307_v29, %v4143_v35  ;;  %v1466_v46 = vmul.f32 %v4329_v27, %v4139_v33  ;;  %v1468_v22 = vmul.f32 %v4337_v0, %v4146_v38 }
 0x13f   : > { %5393 = vst [vmem:[#allocation27_spill] sm:$0xff] %v4434_v19  ;;  %v1709_v45 = vadd.f32 %v1465_v57, %v1461_v36  ;;  %v1723_v14 = vadd.f32 %v1467_v8, %v1463_v2  ;;  %v4444_v32 = vpop.f32.mrf.mxu1  ;;  %v1687_v5 = vadd.f32 %v1686_v49, %v1685_v7  ;;  %v1700_v37 = vrot.slane %v1699_v43, 1 }
 0x140   : > { %v1693_v63 = vrot.slane %v1692_v62, 1  ;;  %v1707_v10 = vrot.slane %v1706_v61, 1  ;;  %v1716_v1 = vadd.f32 %v1466_v46, %v1462_v41  ;;  %v1730_v51 = vadd.f32 %v1468_v22, %v1464_v4  ;;  %v4446_v17 = vpop.f32.mrf.mxu0 }
 0x141   : > { %v1710_v59 = vrot.slane %v1709_v45, 4  ;;  %v1724_v56 = vrot.slane %v1723_v14, 4  ;;  %v4451_v29 = vsel %vm2106_vm8, %v4376_v48, %v2170_v58  ;;  %v4456_v27 = vsel %vm2108_vm9, %v4379_v3, %v2172_v24  ;;  %v4464_v49 = vpop.f32.mrf.mxu1 }
 0x142   : > { %5394 = vst [vmem:[#allocation28_spill] sm:$0xff] %v4451_v29  ;;  %5395 = vst [vmem:[#allocation29_spill] sm:$0xff] %v4456_v27  ;;  %v4459_v0 = vmul.f32 0.1, %v4413_v52  ;;  %v4462_v2 = vmul.f32 0.1, %v4416_v6  ;;  %v1701_v3 = vadd.f32 %v1700_v37, %v1699_v43  ;;  %v1694_v24 = vadd.f32 %v1693_v63, %v1692_v62 }
 0x143   : > { %v1711_v36 = vadd.f32 %v1710_v59, %v1709_v45  ;;  %v1725_v7 = vadd.f32 %v1724_v56, %v1723_v14  ;;  %v1717_v57 = vrot.slane %v1716_v1, 4  ;;  %v1731_v8 = vrot.slane %v1730_v51, 4  ;;  %v4477_v14 = vpop.f32.mrf.mxu0 }
 0x144   : > { %5396 = vst [vmem:[#allocation30_spill] sm:$0xff] %v4459_v0  ;;  %5397 = vst [vmem:[#allocation31_spill] sm:$0xff] %v4462_v2  ;;  %v4467_v48 = vmul.f32 0.1, %v4419_v53  ;;  %v4470_v58 = vmul.f32 0.1, %v4434_v19  ;;  %v4473_v41 = vadd.f32 %v4176_v39, %v1687_v5  ;;  %v1708_v4 = vadd.f32 %v1707_v10, %v1706_v61  ;;  %v4487_v5 = vpop.f32.mrf.mxu1 }
 0x145   : > { %v1718_v46 = vadd.f32 %v1717_v57, %v1716_v1  ;;  %v1469_v45 = vmul.f32 %v4341_v12, %v4126_v11  ;;  %v1712_v22 = vrot.slane %v1711_v36, 2  ;;  %v1726_v59 = vrot.slane %v1725_v7, 2  ;;  %v4504_v10 = vpop.f32.mrf.mxu0 }
 0x146   : > { %5398 = vst [vmem:[#allocation32_spill] sm:$0xff] %v4467_v48  ;;  %5399 = vst [vmem:[#allocation33_spill] sm:$0xff] %v4470_v58  ;;  %v1732_v56 = vadd.f32 %v1731_v8, %v1730_v51  ;;  %v1471_v2 = vmul.f32 %v4345_v60, %v4132_v28  ;;  %v1470_v43 = vmul.f32 %v4351_v16, %v4137_v31  ;;  %v4506_v58 = vpop.f32.mrf.mxu1 }
 0x147   : > { %5400 = vst [vmem:[#allocation34_spill] sm:$0xff] %v4473_v41  ;;  %v1719_v0 = vrot.slane %v1718_v46, 2  ;;  %v1472_v62 = vmul.f32 %v4357_v13, %v4143_v35  ;;  %v1473_v61 = vmul.f32 %v4363_v18, %v4129_v26  ;;  %v1475_v37 = vmul.f32 %v4369_v25, %v4134_v30 }
 0x148   : > { %v1733_v12 = vrot.slane %v1732_v56, 2  ;;  %v1474_v51 = vmul.f32 %v4371_v15, %v4139_v33  ;;  %v1476_v60 = vmul.f32 %v4373_v42, %v4146_v38  ;;  %v4496_v16 = vadd.f32 %v4176_v39, %v1701_v3 }
 0x149   : > { %v4499_v13 = vadd.f32 %v4176_v39, %v1694_v24  ;;  %v4502_v18 = vadd.f32 %v4176_v39, %v1708_v4  ;;  %v1737_v63 = vadd.f32 %v1473_v61, %v1469_v45  ;;  %v1713_v1 = vadd.f32 %v1712_v22, %v1711_v36 }
 0x14a   : > { %5401 = vst [vmem:[#allocation35_spill] sm:$0xff] %v4496_v16  ;;  %v1751_v25 = vadd.f32 %v1475_v37, %v1471_v2  ;;  %v1744_v57 = vadd.f32 %v1474_v51, %v1470_v43  ;;  %v1758_v8 = vadd.f32 %v1476_v60, %v1472_v62  ;;  %v1727_v15 = vadd.f32 %v1726_v59, %v1725_v7  ;;  %v4520_v7 = vpop.f32.mrf.mxu0 }
 0x14b   : > { %5402 = vst [vmem:[#allocation36_spill] sm:$0xff] %v4499_v13  ;;  %5403 = vst [vmem:[#allocation37_spill] sm:$0xff] %v4502_v18  ;;  %v1720_v6 = vadd.f32 %v1719_v0, %v1718_v46  ;;  %v1734_v27 = vadd.f32 %v1733_v12, %v1732_v56  ;;  %v1738_v42 = vrot.slane %v1737_v63, 4  ;;  %v4509_v3 = vmul.f32 0.1, %v4473_v41  ;;  %v4522_v12 = vpop.f32.mrf.mxu1 }
 0x14c   : > { %v1752_v24 = vrot.slane %v1751_v25, 4  ;;  %v1745_v34 = vrot.slane %v1744_v57, 4  ;;  %v1759_v39 = vrot.slane %v1758_v8, 4  ;;  %v4512_v4 = vmul.f32 0.1, %v4496_v16 }
 0x14d   : > { %5404 = vst [vmem:[#allocation38_spill] sm:$0xff] %v4509_v3  ;;  %v4515_v36 = vmul.f32 0.1, %v4499_v13  ;;  %v4518_v2 = vmul.f32 0.1, %v4502_v18  ;;  %v1739_v0 = vadd.f32 %v1738_v42, %v1737_v63  ;;  %v1714_v46 = vrot.slane %v1713_v1, 1 }
 0x14e   : > { %5405 = vst [vmem:[#allocation39_spill] sm:$0xff] %v4512_v4  ;;  %v1753_v45 = vadd.f32 %v1752_v24, %v1751_v25  ;;  %v1746_v22 = vadd.f32 %v1745_v34, %v1744_v57  ;;  %v1760_v59 = vadd.f32 %v1759_v39, %v1758_v8  ;;  %v1728_v56 = vrot.slane %v1727_v15, 1  ;;  %v4532_v57 = vpop.f32.mrf.mxu0 }
 0x14f   : > { %5406 = vst [vmem:[#allocation40_spill] sm:$0xff] %v4515_v36  ;;  %5407 = vst [vmem:[#allocation41_spill] sm:$0xff] %v4518_v2  ;;  %v1721_v43 = vrot.slane %v1720_v6, 1  ;;  %v1735_v62 = vrot.slane %v1734_v27, 1  ;;  %v1740_v61 = vrot.slane %v1739_v0, 2  ;;  %v1477_v4 = vmul.f32 %v4381_v44, %v4126_v11 }
 0x150   : > { %v1754_v37 = vrot.slane %v1753_v45, 2  ;;  %v1747_v51 = vrot.slane %v1746_v22, 2  ;;  %v1761_v60 = vrot.slane %v1760_v59, 2  ;;  %v1479_v63 = vmul.f32 %v4388_v54, %v4132_v28 }
 0x151   : > { %v1741_v16 = vadd.f32 %v1740_v61, %v1739_v0  ;;  %v1478_v34 = vmul.f32 %v4390_v20, %v4137_v31  ;;  %v1481_v25 = vmul.f32 %v4402_v47, %v4129_v26  ;;  %v1480_v24 = vmul.f32 %v4392_v23, %v4143_v35  ;;  %v4544_v47 = vpop.f32.mrf.mxu1 }
 0x152   : > { %v1748_v8 = vadd.f32 %v1747_v51, %v1746_v22  ;;  %v1762_v42 = vadd.f32 %v1761_v60, %v1760_v59  ;;  %v1483_v44 = vmul.f32 %v4406_v9, %v4134_v30  ;;  %v4538_v39 = vadd.f32 %v1754_v37, %v1753_v45  ;;  %v4546_v9 = vpop.f32.mrf.mxu0 }
 0x153   : > { %v1765_v0 = vadd.f32 %v1481_v25, %v1477_v4  ;;  %v1482_v54 = vmul.f32 %v4409_v40, %v4139_v33  ;;  %v1484_v20 = vmul.f32 %v4421_v55, %v4146_v38  ;;  %v1742_v61 = vrot.slane %v1741_v16, 1  ;;  %v4551_v52 = vpop.f32.mrf.mxu1 }
 0x154   : > { %v1749_v22 = vrot.slane %v1748_v8, 1  ;;  %v1763_v59 = vrot.slane %v1762_v42, 1  ;;  %v1779_v51 = vadd.f32 %v1483_v44, %v1479_v63  ;;  %v1715_v60 = vadd.f32 %v1714_v46, %v1713_v1 }
 0x155   : > { %v1766_v23 = vrot.slane %v1765_v0, 4  ;;  %v1772_v3 = vadd.f32 %v1482_v54, %v1478_v34  ;;  %v1786_v41 = vadd.f32 %v1484_v20, %v1480_v24  ;;  %v4548_v45 = vadd.f32 %v1728_v56, %v1727_v15 }
 0x156   : > { %v1722_v4 = vadd.f32 %v1721_v43, %v1720_v6  ;;  %v1736_v37 = vadd.f32 %v1735_v62, %v1734_v27  ;;  %v1780_v40 = vrot.slane %v1779_v51, 4  ;;  %v1756_v25 = vrot.slane %v4538_v39, 1  ;;  %v4555_v6 = vpop.f32.mrf.mxu0 }
 0x157   : > { %5408 = vst [vmem:[#allocation42_spill] sm:$0xff] %v4548_v45  ;;  %v1767_v55 = vadd.f32 %v1766_v23, %v1765_v0  ;;  %v1773_v2 = vrot.slane %v1772_v3, 4  ;;  %v1787_v18 = vrot.slane %v1786_v41, 4  ;;  %v1743_v29 = vadd.f32 %v1742_v61, %v1741_v16 }
 0x158   : > { %v1750_v63 = vadd.f32 %v1749_v22, %v1748_v8  ;;  %v1764_v1 = vadd.f32 %v1763_v59, %v1762_v42  ;;  %v1781_v46 = vadd.f32 %v1780_v40, %v1779_v51  ;;  %v1485_v15 = vmul.f32 %v4431_v21, %v4126_v11  ;;  %v4573_v20 = vpop.f32.mrf.mxu0 }
 0x159   : > { %v1768_v34 = vrot.slane %v1767_v55, 2  ;;  %v1774_v24 = vadd.f32 %v1773_v2, %v1772_v3  ;;  %v1788_v44 = vadd.f32 %v1787_v18, %v1786_v41  ;;  %v1487_v56 = vmul.f32 %v4444_v32, %v4132_v28  ;;  %v4565_v18 = vpop.f32.mrf.mxu1 }
 0x15a   : > { %v1782_v27 = vrot.slane %v1781_v46, 2  ;;  %v1486_v43 = vmul.f32 %v4446_v17, %v4137_v31  ;;  %v1488_v16 = vmul.f32 %v4464_v49, %v4143_v35  ;;  %v1489_v41 = vmul.f32 %v4477_v14, %v4129_v26 }
 0x15b   : > { %v1769_v62 = vadd.f32 %v1768_v34, %v1767_v55  ;;  %v1775_v8 = vrot.slane %v1774_v24, 2  ;;  %v1789_v42 = vrot.slane %v1788_v44, 2  ;;  %v1491_v3 = vmul.f32 %v4487_v5, %v4134_v30  ;;  %v4575_v55 = vpop.f32.mrf.mxu1 }
 0x15c   : > { %v1783_v21 = vadd.f32 %v1782_v27, %v1781_v46  ;;  %v1490_v32 = vmul.f32 %v4504_v10, %v4139_v33  ;;  %v1492_v17 = vmul.f32 %v4506_v58, %v4146_v38  ;;  %v1793_v54 = vadd.f32 %v1489_v41, %v1485_v15 }
 0x15d   : > { %v1770_v2 = vrot.slane %v1769_v62, 1  ;;  %v1776_v49 = vadd.f32 %v1775_v8, %v1774_v24  ;;  %v1790_v0 = vadd.f32 %v1789_v42, %v1788_v44  ;;  %v1807_v14 = vadd.f32 %v1491_v3, %v1487_v56  ;;  %v4580_v8 = vpop.f32.mrf.mxu0  ;;  %v5409_v56 = vld [vmem:[#allocation6_spill] sm:$0xff] }
 0x15e   : > { %v1784_v61 = vrot.slane %v1783_v21, 1  ;;  %v1800_v22 = vadd.f32 %v1490_v32, %v1486_v43  ;;  %v1814_v59 = vadd.f32 %v1492_v17, %v1488_v16  ;;  %v1794_v5 = vrot.slane %v1793_v54, 4  ;;  %v4597_v17 = vpop.f32.mrf.mxu1 }
 0x15f   : > { %v1771_v51 = vadd.f32 %v1770_v2, %v1769_v62  ;;  %v1777_v23 = vrot.slane %v1776_v49, 1  ;;  %v1791_v40 = vrot.slane %v1790_v0, 1  ;;  %v1808_v46 = vrot.slane %v1807_v14, 4 }
 0x160   : > { %v1785_v10 = vadd.f32 %v1784_v61, %v1783_v21  ;;  %v1801_v34 = vrot.slane %v1800_v22, 4  ;;  %v1815_v58 = vrot.slane %v1814_v59, 4  ;;  %v1795_v27 = vadd.f32 %v1794_v5, %v1793_v54 }
 0x161   : > { %v4578_v24 = vadd.f32 %v4154_v50, %v1771_v51  ;;  %v1778_v44 = vadd.f32 %v1777_v23, %v1776_v49  ;;  %v1792_v15 = vadd.f32 %v1791_v40, %v1790_v0  ;;  %v4583_v43 = vadd.f32 %v5409_v56, %v1715_v60  ;;  %v5414_v0 = vld [vmem:[#allocation7_spill] sm:$0xff]  ;;  %v4623_v51 = vpop.f32.mrf.mxu1 }
 0x162   : > { %v4586_v16 = vadd.f32 %v5409_v56, %v1722_v4  ;;  %v4589_v62 = vadd.f32 %v4154_v50, %v1785_v10  ;;  %v1809_v42 = vadd.f32 %v1808_v46, %v1807_v14  ;;  %v1802_v3 = vadd.f32 %v1801_v34, %v1800_v22 }
 0x163   : > { %5410 = vst [vmem:[#allocation43_spill] sm:$0xff] %v4583_v43  ;;  %v4592_v41 = vadd.f32 %v4154_v50, %v1778_v44  ;;  %v4595_v21 = vadd.f32 %v4154_v50, %v1792_v15  ;;  %v1816_v32 = vadd.f32 %v1815_v58, %v1814_v59  ;;  %v4600_v60 = vadd.f32 %v5409_v56, %v1736_v37  ;;  %v4615_v59 = vpop.f32.mrf.mxu0 }
 0x164   : > { %5411 = vst [vmem:[#allocation44_spill] sm:$0xff] %v4586_v16  ;;  %v4603_v4 = vadd.f32 %v1756_v25, %v4538_v39  ;;  %v1796_v2 = vrot.slane %v1795_v27, 2  ;;  %v1810_v49 = vrot.slane %v1809_v42, 2  ;;  %v4606_v54 = vadd.f32 %v5414_v0, %v1743_v29 }
 0x165   : > { %5412 = vst [vmem:[#allocation45_spill] sm:$0xff] %v4600_v60  ;;  %v4609_v61 = vadd.f32 %v5414_v0, %v1750_v63  ;;  %v4612_v14 = vadd.f32 %v5414_v0, %v1764_v1  ;;  %v2189_v22 = vmul.f32 0.1, %v4578_v24  ;;  %vm2125_vm10 = vcmp.gt.f32.partialorder %v4578_v24, 0.0  ;;  %v4633_v15 = vpop.f32.mrf.mxu0 }
 0x166   : > { %5413 = vst [vmem:[#allocation46_spill] sm:$0xff] %v4603_v4  ;;  %5415 = vst [vmem:[#allocation47_spill] sm:$0xff] %v4606_v54  ;;  %vm2127_vm11 = vcmp.gt.f32.partialorder %v4589_v62, 0.0  ;;  %v2191_v39 = vmul.f32 0.1, %v4589_v62  ;;  %vm2126_vm12 = vcmp.gt.f32.partialorder %v4592_v41, 0.0  ;;  %v1797_v29 = vadd.f32 %v1796_v2, %v1795_v27 }
 0x167   : > { %5416 = vst [vmem:[#allocation48_spill] sm:$0xff] %v4609_v61  ;;  %5417 = vst [vmem:[#allocation49_spill] sm:$0xff] %v4612_v14  ;;  %v1811_v37 = vadd.f32 %v1810_v49, %v1809_v42  ;;  %v2190_v25 = vmul.f32 0.1, %v4592_v41  ;;  %vm2128_vm13 = vcmp.gt.f32.partialorder %v4595_v21, 0.0  ;;  %v1803_v63 = vrot.slane %v1802_v3, 2  ;;  %v4647_v0 = vpop.f32.mrf.mxu0 }
 0x168   : > { %v1817_v1 = vrot.slane %v1816_v32, 2  ;;  %v1798_v23 = vrot.slane %v1797_v29, 1  ;;  %v1493_v5 = vmul.f32 %v4520_v7, %v4126_v11  ;;  %v1495_v10 = vmul.f32 %v4522_v12, %v4132_v28 }
 0x169   : > { %v1812_v40 = vrot.slane %v1811_v37, 1  ;;  %v1804_v46 = vadd.f32 %v1803_v63, %v1802_v3  ;;  %v1494_v58 = vmul.f32 %v4532_v57, %v4137_v31  ;;  %v1496_v44 = vmul.f32 %v4544_v47, %v4143_v35  ;;  %v5418_v47 = vld [vmem:[#allocation8_spill] sm:$0xff] }
 0x16a   : > { %v1818_v34 = vadd.f32 %v1817_v1, %v1816_v32  ;;  %v1799_v27 = vadd.f32 %v1798_v23, %v1797_v29  ;;  %v1497_v2 = vmul.f32 %v4546_v9, %v4129_v26  ;;  %v1499_v7 = vmul.f32 %v4551_v52, %v4134_v30  ;;  %v4643_v32 = vpop.f32.mrf.mxu1 }
 0x16b   : > { %v1813_v42 = vadd.f32 %v1812_v40, %v1811_v37  ;;  %v1805_v49 = vrot.slane %v1804_v46, 1  ;;  %v1498_v3 = vmul.f32 %v4555_v6, %v4139_v33  ;;  %v1500_v57 = vmul.f32 %v4565_v18, %v4146_v38 }
 0x16c   : > { %v1819_v12 = vrot.slane %v1818_v34, 1  ;;  %v2065_v63 = vadd.f32 %v5418_v47, %v1799_v27  ;;  %v1821_v37 = vadd.f32 %v1497_v2, %v1493_v5  ;;  %v1835_v1 = vadd.f32 %v1499_v7, %v1495_v10  ;;  %v4651_v54 = vpop.f32.mrf.mxu1  ;;  %v4673_v7 = vpop.f32.mrf.mxu0 }
 0x16d   : > { %v2067_v29 = vadd.f32 %v5418_v47, %v1813_v42  ;;  %v1806_v9 = vadd.f32 %v1805_v49, %v1804_v46  ;;  %v1828_v40 = vadd.f32 %v1498_v3, %v1494_v58  ;;  %v1842_v52 = vadd.f32 %v1500_v57, %v1496_v44 }
 0x16e   : > { %v1820_v23 = vadd.f32 %v1819_v12, %v1818_v34  ;;  %v2192_v4 = vmul.f32 0.1, %v4595_v21  ;;  %vm2129_vm14 = vcmp.gt.f32.partialorder %v2065_v63, 0.0  ;;  %v2193_v6 = vmul.f32 0.1, %v2065_v63 }
 0x16f   : > { %vm2131_vm15 = vcmp.gt.f32.partialorder %v2067_v29, 0.0  ;;  %v2195_v18 = vmul.f32 0.1, %v2067_v29  ;;  %v2066_v56 = vadd.f32 %v5418_v47, %v1806_v9  ;;  %v1822_v45 = vrot.slane %v1821_v37, 4 }
 0x170   : > { %v1836_v27 = vrot.slane %v1835_v1, 4  ;;  %v4653_v5 = vsel %vm2129_vm14, %v2065_v63, %v2193_v6  ;;  %v4656_v10 = vadd.f32 %v5418_v47, %v1820_v23  ;;  %v1829_v46 = vrot.slane %v1828_v40, 4 }
 0x171   : > { %v1843_v34 = vrot.slane %v1842_v52, 4  ;;  %v4661_v58 = vsel %vm2125_vm10, %v4578_v24, %v2189_v22  ;;  %v4666_v44 = vsel %vm2127_vm11, %v4589_v62, %v2191_v39  ;;  %v4671_v42 = vsel %vm2126_vm12, %v4592_v41, %v2190_v25  ;;  %v4684_v41 = vpop.f32.mrf.mxu1 }
 0x172   : > { %5419 = vst [vmem:[#allocation8_spill] sm:$0xff] %v4666_v44  ;;  %v2194_v2 = vmul.f32 0.1, %v2066_v56  ;;  %v4678_v49 = vsel %vm2128_vm13, %v4595_v21, %v2192_v4  ;;  %vm2130_vm1 = vcmp.gt.f32.partialorder %v2066_v56, 0.0  ;;  %v1823_v24 = vadd.f32 %v1822_v45, %v1821_v37  ;;  %v2288_v45 = vld [vmem:[%s5318_s5 + $0x8] sm:$0xff]  ;;  %v4695_v37 = vpop.f32.mrf.mxu0 }
 0x173   : > { %v1837_v22 = vadd.f32 %v1836_v27, %v1835_v1  ;;  %v4682_v62 = vsel %vm2131_vm15, %v2067_v29, %v2195_v18  ;;  %v1830_v39 = vadd.f32 %v1829_v46, %v1828_v40  ;;  %v1844_v3 = vadd.f32 %v1843_v34, %v1842_v52  ;;  %2296 = vperm.xlu1 %3677, %v2288_v45   ;;  %v4708_v27 = vpop.f32.mrf.mxu1 }
 0x174   : > { %5420 = vst [vmem:[#allocation50_spill] sm:$0xff] %v4682_v62  ;;  %vm2132_vm2 = vcmp.gt.f32.partialorder %v4656_v10, 0.0  ;;  %v2196_v25 = vmul.f32 0.1, %v4656_v10  ;;  %v1824_v57 = vrot.slane %v1823_v24, 2  ;;  %v4691_v21 = vsel %vm2130_vm1, %v2066_v56, %v2194_v2  ;;  %v2287_v56 = vld [vmem:[%s5318_s5] sm:$0xff] }
 0x175   : > { %v1838_v47 = vrot.slane %v1837_v22, 2  ;;  %v1831_v4 = vrot.slane %v1830_v39, 2  ;;  %v1845_v63 = vrot.slane %v1844_v3, 2  ;;  %v1501_v29 = vmul.f32 %v4573_v20, %v4126_v11  ;;  %v1374_v12 = vpop.f32.mrf.mxu1 }
 0x176   : > { %v1825_v1 = vadd.f32 %v1824_v57, %v1823_v24  ;;  %v1503_v23 = vmul.f32 %v4575_v55, %v4132_v28  ;;  %v1502_v40 = vmul.f32 %v4580_v8, %v4137_v31  ;;  %v1504_v20 = vmul.f32 %v4597_v17, %v4143_v35  ;;  %v4716_v17 = vpop.f32.mrf.mxu0 }
 0x177   : > { %v1839_v9 = vadd.f32 %v1838_v47, %v1837_v22  ;;  %v1832_v52 = vadd.f32 %v1831_v4, %v1830_v39  ;;  %v1846_v6 = vadd.f32 %v1845_v63, %v1844_v3  ;;  %v1505_v18 = vmul.f32 %v4615_v59, %v4129_v26  ;;  %2291 = vperm.xlu1 %3677, %v2287_v56  }
 0x178   : > { %v1826_v46 = vrot.slane %v1825_v1, 1  ;;  %v1507_v55 = vmul.f32 %v4623_v51, %v4134_v30  ;;  %v1506_v8 = vmul.f32 %v4633_v15, %v4139_v33  ;;  %v1508_v39 = vmul.f32 %v4643_v32, %v4146_v38  ;;  %v2676_v51 = vld [vmem:[%s5320_s7] sm:$0xff] }
 0x179   : > { %v1840_v34 = vrot.slane %v1839_v9, 1  ;;  %v1833_v2 = vrot.slane %v1832_v52, 1  ;;  %v1847_v24 = vrot.slane %v1846_v6, 1  ;;  %v1849_v22 = vadd.f32 %v1505_v18, %v1501_v29  ;;  %v5421_v18 = vld [vmem:[#allocation9_spill] sm:$0xff] }
 0x17a   : > { %v1827_v59 = vadd.f32 %v1826_v46, %v1825_v1  ;;  %v1863_v57 = vadd.f32 %v1507_v55, %v1503_v23  ;;  %v1856_v47 = vadd.f32 %v1506_v8, %v1502_v40  ;;  %v1870_v63 = vadd.f32 %v1508_v39, %v1504_v20 }
 0x17b   : > { %v1841_v3 = vadd.f32 %v1840_v34, %v1839_v9  ;;  %v1834_v45 = vadd.f32 %v1833_v2, %v1832_v52  ;;  %v1848_v4 = vadd.f32 %v1847_v24, %v1846_v6  ;;  %v1850_v15 = vrot.slane %v1849_v22, 4  ;;  %v4729_v52 = vpop.f32.mrf.mxu0  ;;  %2680 = vperm.xlu1 %3677, %v2676_v51   ;;  %v3278_v34 = vld [vmem:[%s5323_s10 + $0x8] sm:$0xff]  ;;  %v4739_v24 = vpop.f32.mrf.mxu1 }
 0x17c   : > { %v2069_v32 = vadd.f32 %v5421_v18, %v1827_v59  ;;  %v1864_v56 = vrot.slane %v1863_v57, 4  ;;  %v4734_v6 = vsel %vm2132_vm2, %v4656_v10, %v2196_v25  ;;  %v1857_v8 = vrot.slane %v1856_v47, 4 }
 0x17d   : > { %v2071_v43 = vadd.f32 %v5421_v18, %v1841_v3  ;;  %v2070_v9 = vadd.f32 %v5421_v18, %v1834_v45  ;;  %v4727_v23 = vadd.f32 %v5421_v18, %v1848_v4  ;;  %v1851_v40 = vadd.f32 %v1850_v15, %v1849_v22  ;;  %v4747_v51 = vpop.f32.mrf.mxu0  ;;  %v4760_v10 = vpop.f32.mrf.mxu1 }
 0x17e   : > { %vm2133_vm3 = vcmp.gt.f32.partialorder %v2069_v32, 0.0  ;;  %v2197_v20 = vmul.f32 0.1, %v2069_v32  ;;  %v1871_v2 = vrot.slane %v1870_v63, 4  ;;  %v1865_v59 = vadd.f32 %v1864_v56, %v1863_v57  ;;  %v3280_v57 = vld [vmem:[%s5323_s10 + $0x18] sm:$0xff] }
 0x17f   : > { %v2199_v46 = vmul.f32 0.1, %v2071_v43  ;;  %vm2135_vm4 = vcmp.gt.f32.partialorder %v2071_v43, 0.0  ;;  %v2198_v55 = vmul.f32 0.1, %v2070_v9  ;;  %vm2134_vm5 = vcmp.gt.f32.partialorder %v2070_v9, 0.0  ;;  %3288 = vperm.xlu1 %3677, %v3278_v34  }
 0x180   : > { %v4741_v22 = vsel %vm2133_vm3, %v2069_v32, %v2197_v20  ;;  %v1852_v39 = vrot.slane %v1851_v40, 2  ;;  %vm2136_vm6 = vcmp.gt.f32.partialorder %v4727_v23, 0.0  ;;  %v2200_v25 = vmul.f32 0.1, %v4727_v23 }
 0x181   : > { %v2008_v3 = vrot.slane %v4154_v50, 3  ;;  %v4751_v4 = vsel %vm2135_vm4, %v2071_v43, %v2199_v46  ;;  %v1866_v18 = vrot.slane %v1865_v59, 2  ;;  %v4756_v32 = vsel %vm2134_vm5, %v2070_v9, %v2198_v55 }
 0x182   : > { %5422 = vst [vmem:[#allocation9_spill] sm:$0xff] %v4751_v4  ;;  %v1853_v15 = vadd.f32 %v1852_v39, %v1851_v40  ;;  %v1858_v56 = vadd.f32 %v1857_v8, %v1856_v47  ;;  %v1872_v20 = vadd.f32 %v1871_v2, %v1870_v63  ;;  %v1509_v29 = vmul.f32 %v4647_v0, %v4126_v11  ;;  %v4770_v63 = vpop.f32.mrf.mxu0 }
 0x183   : > { %v1867_v45 = vadd.f32 %v1866_v18, %v1865_v59  ;;  %v1511_v43 = vmul.f32 %v4651_v54, %v4132_v28  ;;  %v1510_v40 = vmul.f32 %v4673_v7, %v4137_v31  ;;  %v1512_v9 = vmul.f32 %v4684_v41, %v4143_v35  ;;  %3298 = vperm.xlu1 %3677, %v3280_v57   ;;  %v1384_v41 = vpop.f32.mrf.mxu1 }
 0x184   : > { %v1854_v34 = vrot.slane %v1853_v15, 1  ;;  %v1859_v46 = vrot.slane %v1858_v56, 2  ;;  %v1873_v39 = vrot.slane %v1872_v20, 2  ;;  %v1513_v47 = vmul.f32 %v4695_v37, %v4129_v26  ;;  %v1129_v48 = vpop.f32.mrf.mxu0 }
 0x185   : > { %v1868_v55 = vrot.slane %v1867_v45, 1  ;;  %v1515_v8 = vmul.f32 %v4708_v27, %v4134_v30  ;;  %v1514_v54 = vmul.f32 %v4716_v17, %v4139_v33  ;;  %v1516_v18 = vmul.f32 %v1374_v12, %v4146_v38 }
 0x186   : > { %v1855_v0 = vadd.f32 %v1854_v34, %v1853_v15  ;;  %v1860_v7 = vadd.f32 %v1859_v46, %v1858_v56  ;;  %v1874_v2 = vadd.f32 %v1873_v39, %v1872_v20  ;;  %v1877_v59 = vadd.f32 %v1513_v47, %v1509_v29  ;;  %v1386_v46 = vpop.f32.mrf.mxu1 }
 0x187   : > { %v1869_v14 = vadd.f32 %v1868_v55, %v1867_v45  ;;  %v1891_v37 = vadd.f32 %v1515_v8, %v1511_v43  ;;  %v1884_v60 = vadd.f32 %v1514_v54, %v1510_v40  ;;  %v1898_v34 = vadd.f32 %v1516_v18, %v1512_v9 }
 0x188   : > { %v2073_v1 = vadd.f32 %v2008_v3, %v1855_v0  ;;  %v1861_v36 = vrot.slane %v1860_v7, 1  ;;  %v1875_v57 = vrot.slane %v1874_v2, 1  ;;  %v1878_v15 = vrot.slane %v1877_v59, 4 }
 0x189   : > { %v2075_v61 = vadd.f32 %v2008_v3, %v1869_v14  ;;  %v1892_v16 = vrot.slane %v1891_v37, 4  ;;  %v1885_v29 = vrot.slane %v1884_v60, 4  ;;  %v4780_v12 = vsel %vm2136_vm6, %v4727_v23, %v2200_v25  ;;  %v1133_v14 = vpop.f32.mrf.mxu0  ;;  %v1390_v25 = vpop.f32.mrf.mxu1 }
 0x18a   : > { %vm2137_vm7 = vcmp.gt.f32.partialorder %v2073_v1, 0.0  ;;  %v2201_v27 = vmul.f32 0.1, %v2073_v1  ;;  %v1862_v17 = vadd.f32 %v1861_v36, %v1860_v7  ;;  %v1876_v56 = vadd.f32 %v1875_v57, %v1874_v2 }
 0x18b   : > { %v1879_v20 = vadd.f32 %v1878_v15, %v1877_v59  ;;  %v2203_v43 = vmul.f32 0.1, %v2075_v61  ;;  %v1893_v40 = vadd.f32 %v1892_v16, %v1891_v37  ;;  %vm2139_vm8 = vcmp.gt.f32.partialorder %v2075_v61, 0.0 }
 0x18c   : > { %v4782_v45 = vsel %vm2137_vm7, %v2073_v1, %v2201_v27  ;;  %v2074_v39 = vadd.f32 %v2008_v3, %v1862_v17  ;;  %v2076_v9 = vadd.f32 %v2008_v3, %v1876_v56  ;;  %v1886_v55 = vadd.f32 %v1885_v29, %v1884_v60  ;;  %v1135_v60 = vpop.f32.mrf.mxu0 }
 0x18d   : > { %v1880_v47 = vrot.slane %v1879_v20, 2  ;;  %v1894_v0 = vrot.slane %v1893_v40, 2  ;;  %v1899_v8 = vrot.slane %v1898_v34, 4  ;;  %v2009_v1 = vrot.slane %v4154_v50, 4 }
 0x18e   : > { %v4789_v16 = vsel %vm2139_vm8, %v2075_v61, %v2203_v43  ;;  %v1887_v59 = vrot.slane %v1886_v55, 2  ;;  %vm2138_vm9 = vcmp.gt.f32.partialorder %v2074_v39, 0.0  ;;  %v2202_v18 = vmul.f32 0.1, %v2074_v39  ;;  %v1392_v43 = vpop.f32.mrf.mxu1 }
 0x18f   : > { %5423 = vst [vmem:[#allocation51_spill] sm:$0xff] %v4789_v16  ;;  %v1881_v2 = vadd.f32 %v1880_v47, %v1879_v20  ;;  %v1895_v3 = vadd.f32 %v1894_v0, %v1893_v40  ;;  %vm2140_vm10 = vcmp.gt.f32.partialorder %v2076_v9, 0.0  ;;  %v1900_v37 = vadd.f32 %v1899_v8, %v1898_v34 }
 0x190   : > { %v2204_v57 = vmul.f32 0.1, %v2076_v9  ;;  %v1888_v17 = vadd.f32 %v1887_v59, %v1886_v55  ;;  %v1517_v29 = vmul.f32 %v4729_v52, %v4126_v11  ;;  %v1519_v61 = vmul.f32 %v4739_v24, %v4132_v28  ;;  %v1139_v52 = vpop.f32.mrf.mxu0  ;;  %v1396_v54 = vpop.f32.mrf.mxu1 }
 0x191   : > { %v1882_v15 = vrot.slane %v1881_v2, 1  ;;  %v1896_v27 = vrot.slane %v1895_v3, 1  ;;  %v1901_v56 = vrot.slane %v1900_v37, 2  ;;  %v1521_v20 = vmul.f32 %v4770_v63, %v4129_v26 }
 0x192   : > { %v1889_v0 = vrot.slane %v1888_v17, 1  ;;  %v1518_v34 = vmul.f32 %v4747_v51, %v4137_v31  ;;  %v1523_v55 = vmul.f32 %v1384_v41, %v4134_v30  ;;  %v1522_v59 = vmul.f32 %v1129_v48, %v4139_v33 }
 0x193   : > { %v1883_v40 = vadd.f32 %v1882_v15, %v1881_v2  ;;  %v1897_v47 = vadd.f32 %v1896_v27, %v1895_v3  ;;  %v1902_v8 = vadd.f32 %v1901_v56, %v1900_v37  ;;  %v1905_v36 = vadd.f32 %v1521_v20, %v1517_v29  ;;  %v1141_v20 = vpop.f32.mrf.mxu0 }
 0x194   : > { %v1890_v7 = vadd.f32 %v1889_v0, %v1888_v17  ;;  %v1524_v63 = vmul.f32 %v1386_v46, %v4146_v38  ;;  %v1919_v15 = vadd.f32 %v1523_v55, %v1519_v61  ;;  %v1912_v27 = vadd.f32 %v1522_v59, %v1518_v34 }
 0x195   : > { %v4801_v23 = vadd.f32 %v2009_v1, %v1883_v40  ;;  %v4803_v24 = vadd.f32 %v2009_v1, %v1897_v47  ;;  %v1903_v2 = vrot.slane %v1902_v8, 1  ;;  %v1906_v3 = vrot.slane %v1905_v36, 4  ;;  %v1398_v47 = vpop.f32.mrf.mxu1 }
 0x196   : > { %v4808_v37 = vsel %vm2138_vm9, %v2074_v39, %v2202_v18  ;;  %v4811_v48 = vsel %vm2140_vm10, %v2076_v9, %v2204_v57  ;;  %v1520_v41 = vmul.f32 %v4760_v10, %v4143_v35  ;;  %v4815_v56 = vadd.f32 %v2009_v1, %v1890_v7 }
 0x197   : > { %v1904_v17 = vadd.f32 %v1903_v2, %v1902_v8  ;;  %v1907_v46 = vadd.f32 %v1906_v3, %v1905_v36  ;;  %v1920_v29 = vrot.slane %v1919_v15, 4  ;;  %v4818_v61 = vmul.f32 0.1, %v4801_v23 }
 0x198   : > { %v4821_v40 = vrot.slane %v4154_v50, 5  ;;  %v1913_v39 = vrot.slane %v1912_v27, 4  ;;  %v1926_v18 = vadd.f32 %v1524_v63, %v1520_v41  ;;  %v4824_v9 = vmul.f32 0.1, %v4803_v24 }
 0x199   : > { %v4826_v57 = vadd.f32 %v2009_v1, %v1904_v17  ;;  %v1908_v10 = vrot.slane %v1907_v46, 2  ;;  %v1525_v7 = vmul.f32 %v1133_v14, %v4126_v11  ;;  %v1921_v36 = vadd.f32 %v1920_v29, %v1919_v15  ;;  %v1145_v1 = vpop.f32.mrf.mxu0 }
 0x19a   : > { %5424 = vst [vmem:[#allocation52_spill] sm:$0xff] %v4824_v9  ;;  %v1914_v0 = vadd.f32 %v1913_v39, %v1912_v27  ;;  %v1927_v34 = vrot.slane %v1926_v18, 4  ;;  %v1527_v8 = vmul.f32 %v1390_v25, %v4132_v28  ;;  %v4831_v55 = vmul.f32 0.1, %v4815_v56  ;;  %v1402_v39 = vpop.f32.mrf.mxu1 }
 0x19b   : > { %v4834_v59 = vmul.f32 0.1, %v4826_v57  ;;  %v1909_v63 = vadd.f32 %v1908_v10, %v1907_v46  ;;  %v1526_v2 = vmul.f32 %v1135_v60, %v4137_v31  ;;  %v1922_v3 = vrot.slane %v1921_v36, 2 }
 0x19c   : > { %v1915_v41 = vrot.slane %v1914_v0, 2  ;;  %v1928_v17 = vadd.f32 %v1927_v34, %v1926_v18  ;;  %v1529_v14 = vmul.f32 %v1139_v52, %v4129_v26  ;;  %v1528_v27 = vmul.f32 %v1392_v43, %v4143_v35  ;;  %v1147_v18 = vpop.f32.mrf.mxu0 }
 0x19d   : > { %v1910_v15 = vrot.slane %v1909_v63, 1  ;;  %v1531_v25 = vmul.f32 %v1396_v54, %v4134_v30  ;;  %v1530_v29 = vmul.f32 %v1141_v20, %v4139_v33  ;;  %v1923_v51 = vadd.f32 %v1922_v3, %v1921_v36  ;;  %v1404_v36 = vpop.f32.mrf.mxu1 }
 0x19e   : > { %v1916_v13 = vadd.f32 %v1915_v41, %v1914_v0  ;;  %v1929_v16 = vrot.slane %v1928_v17, 2  ;;  %v1933_v46 = vadd.f32 %v1529_v14, %v1525_v7  ;;  %v1532_v4 = vmul.f32 %v1398_v47, %v4146_v38  ;;  %v1151_v14 = vpop.f32.mrf.mxu0 }
 0x19f   : > { %v1911_v10 = vadd.f32 %v1910_v15, %v1909_v63  ;;  %v1947_v60 = vadd.f32 %v1531_v25, %v1527_v8  ;;  %v1940_v19 = vadd.f32 %v1530_v29, %v1526_v2  ;;  %v1924_v34 = vrot.slane %v1923_v51, 1  ;;  %v1408_v25 = vpop.f32.mrf.mxu1 }
 0x1a0   : > { %v1917_v52 = vrot.slane %v1916_v13, 1  ;;  %v1930_v62 = vadd.f32 %v1929_v16, %v1928_v17  ;;  %v1934_v44 = vrot.slane %v1933_v46, 4  ;;  %v1954_v9 = vadd.f32 %v1532_v4, %v1528_v27 }
 0x1a1   : > { %v4843_v43 = vadd.f32 %v4821_v40, %v1911_v10  ;;  %v1948_v54 = vrot.slane %v1947_v60, 4  ;;  %v1941_v20 = vrot.slane %v1940_v19, 4  ;;  %v1925_v0 = vadd.f32 %v1924_v34, %v1923_v51 }
 0x1a2   : > { %v1918_v3 = vadd.f32 %v1917_v52, %v1916_v13  ;;  %v1931_v7 = vrot.slane %v1930_v62, 1  ;;  %v1935_v63 = vadd.f32 %v1934_v44, %v1933_v46  ;;  %v4846_v8 = vrot.slane %v4154_v50, 6 }
 0x1a3   : > { %v1949_v47 = vadd.f32 %v1948_v54, %v1947_v60  ;;  %v1942_v2 = vadd.f32 %v1941_v20, %v1940_v19  ;;  %v1955_v41 = vrot.slane %v1954_v9, 4  ;;  %v4849_v16 = vadd.f32 %v4821_v40, %v1925_v0  ;;  %v1153_v54 = vpop.f32.mrf.mxu0 }
 0x1a4   : > { %v4852_v17 = vadd.f32 %v4821_v40, %v1918_v3  ;;  %v1932_v15 = vadd.f32 %v1931_v7, %v1930_v62  ;;  %v1936_v4 = vrot.slane %v1935_v63, 2  ;;  %vm2142_vm11 = vcmp.gt.f32.partialorder %v4815_v56, 0.0 }
 0x1a5   : > { %v4856_v13 = vmul.f32 0.1, %v4843_v43  ;;  %v1950_v44 = vrot.slane %v1949_v47, 2  ;;  %v1943_v51 = vrot.slane %v1942_v2, 2  ;;  %v1956_v27 = vadd.f32 %v1955_v41, %v1954_v9 }
 0x1a6   : > { %v4859_v19 = vmul.f32 0.1, %v4849_v16  ;;  %v4862_v29 = vadd.f32 %v4821_v40, %v1932_v15  ;;  %v1937_v46 = vadd.f32 %v1936_v4, %v1935_v63  ;;  %v1533_v10 = vmul.f32 %v1145_v1, %v4126_v11  ;;  %v1410_v11 = vpop.f32.mrf.mxu1 }
 0x1a7   : > { %v2210_v62 = vmul.f32 0.1, %v4852_v17  ;;  %v1951_v60 = vadd.f32 %v1950_v44, %v1949_v47  ;;  %v1944_v34 = vadd.f32 %v1943_v51, %v1942_v2  ;;  %v1957_v52 = vrot.slane %v1956_v27, 2 }
 0x1a8   : > { %v4867_v20 = vmul.f32 0.1, %v4862_v29  ;;  %v1938_v9 = vrot.slane %v1937_v46, 1  ;;  %v1535_v0 = vmul.f32 %v1402_v39, %v4132_v28  ;;  %v1534_v3 = vmul.f32 %v1147_v18, %v4137_v31 }
 0x1a9   : > { %v1952_v7 = vrot.slane %v1951_v60, 1  ;;  %v1945_v40 = vrot.slane %v1944_v34, 1  ;;  %v1958_v41 = vadd.f32 %v1957_v52, %v1956_v27  ;;  %v1537_v63 = vmul.f32 %v1151_v14, %v4129_v26 }
 0x1aa   : > { %vm2364_vm12 = vcmask 1041409   ;;  %v1939_v1 = vadd.f32 %v1938_v9, %v1937_v46  ;;  %v1536_v47 = vmul.f32 %v1404_v36, %v4143_v35  ;;  %v1539_v2 = vmul.f32 %v1408_v25, %v4134_v30 }
 0x1ab   : > { %v1538_v15 = vmul.f32 %v1153_v54, %v4139_v33  ;;  %vm2367_vm13 = vcmask 1042434   ;;  %v1953_v4 = vadd.f32 %v1952_v7, %v1951_v60  ;;  %v1946_v44 = vadd.f32 %v1945_v40, %v1944_v34 }
 0x1ac   : > { %v1959_v28 = vrot.slane %v1958_v41, 1  ;;  %v1961_v39 = vadd.f32 %v1537_v63, %v1533_v10  ;;  %v4876_v31 = vrot.slane %v4154_v50, 7  ;;  %v1975_v18 = vadd.f32 %v1539_v2, %v1535_v0 }
 0x1ad   : > { %v1968_v51 = vadd.f32 %v1538_v15, %v1534_v3  ;;  %v1540_v26 = vmul.f32 %v1410_v11, %v4146_v38  ;;  %vm2370_vm14 = vcmask 1043459   ;;  %v4880_v14 = vadd.f32 %v4846_v8, %v1939_v1 }
 0x1ae   : > { %v2086_v30 = vadd.f32 %v4846_v8, %v1946_v44  ;;  %v1960_v35 = vadd.f32 %v1959_v28, %v1958_v41  ;;  %v1962_v33 = vrot.slane %v1961_v39, 4  ;;  %vm2373_vm15 = vcmask 1044484  }
 0x1af   : > { %vm2144_vm1 = vcmp.gt.f32.partialorder %v4826_v57, 0.0  ;;  %v1976_v36 = vrot.slane %v1975_v18, 4  ;;  %v1969_v27 = vrot.slane %v1968_v51, 4  ;;  %v1982_v25 = vadd.f32 %v1540_v26, %v1536_v47 }
 0x1b0   : > { %vm2146_vm2 = vcmp.gt.f32.partialorder %v4852_v17, 0.0  ;;  %vm2376_vm3 = vcmask 1045509   ;;  %v4886_v50 = vadd.f32 %v4846_v8, %v1953_v4  ;;  %v1963_v38 = vadd.f32 %v1962_v33, %v1961_v39 }
 0x1b1   : > { %vm2150_vm4 = vcmp.gt.f32.partialorder %v2086_v30, 0.0  ;;  %v2214_v46 = vmul.f32 0.1, %v2086_v30  ;;  %vm2379_vm5 = vcmask 1046534   ;;  %v1977_v10 = vadd.f32 %v1976_v36, %v1975_v18 }
 0x1b2   : > { %v1970_v60 = vadd.f32 %v1969_v27, %v1968_v51  ;;  %v1983_v34 = vrot.slane %v1982_v25, 4  ;;  %v2270_v52 = vsel %vm2142_vm11, %v4815_v56, %v4831_v55  ;;  %v2088_v54 = vadd.f32 %v4846_v8, %v1960_v35 }
 0x1b3   : > { %v1964_v9 = vrot.slane %v1963_v38, 2  ;;  %v2274_v0 = vsel %vm2146_vm2, %v4852_v17, %v2210_v62  ;;  %v2278_v3 = vsel %vm2150_vm4, %v2086_v30, %v2214_v46  ;;  %v1978_v7 = vrot.slane %v1977_v10, 2 }
 0x1b4   : > { %v1971_v40 = vrot.slane %v1970_v60, 2  ;;  %v1984_v41 = vadd.f32 %v1983_v34, %v1982_v25  ;;  %v5425_v63 = vrot.slane %v4691_v21, 7  ;;  %v5426_v47 = vrot.slane %v4756_v32, 6 }
 0x1b5   : > { %v1965_v1 = vadd.f32 %v1964_v9, %v1963_v38  ;;  %v2444_v56 = vrot.slane %v4808_v37, 5  ;;  %v2446_v55 = vrot.slane %v2270_v52, 4  ;;  %v1979_v8 = vadd.f32 %v1978_v7, %v1977_v10 }
 0x1b6   : > { %v2441_v11 = vsel %vm2364_vm12, %v5425_v63, %v4671_v42  ;;  %v1972_v15 = vadd.f32 %v1971_v40, %v1970_v60  ;;  %v1985_v17 = vrot.slane %v1984_v41, 2  ;;  %v2448_v62 = vrot.slane %v2274_v0, 3 }
 0x1b7   : > { %v2443_v2 = vsel %vm2367_vm13, %v5426_v47, %v2441_v11  ;;  %vm2141_vm6 = vcmp.gt.f32.partialorder %v4801_v23, 0.0  ;;  %v1966_v4 = vrot.slane %v1965_v1, 1  ;;  %v2450_v21 = vrot.slane %v2278_v3, 2 }
 0x1b8   : > { %v2445_v44 = vsel %vm2370_vm14, %v2444_v56, %v2443_v2  ;;  %vm2148_vm7 = vcmp.gt.f32.partialorder %v4862_v29, 0.0  ;;  %v1980_v42 = vrot.slane %v1979_v8, 1  ;;  %v1973_v28 = vrot.slane %v1972_v15, 1 }
 0x1b9   : > { %v1986_v32 = vadd.f32 %v1985_v17, %v1984_v41  ;;  %v2447_v39 = vsel %vm2373_vm15, %v2446_v55, %v2445_v44  ;;  %v1967_v18 = vadd.f32 %v1966_v4, %v1965_v1  ;;  %vm2152_vm8 = vcmp.gt.f32.partialorder %v2088_v54, 0.0 }
 0x1ba   : > { %v2449_v37 = vsel %vm2376_vm3, %v2448_v62, %v2447_v39  ;;  %v2216_v51 = vmul.f32 0.1, %v2088_v54  ;;  %v1981_v26 = vadd.f32 %v1980_v42, %v1979_v8  ;;  %v1974_v30 = vadd.f32 %v1973_v28, %v1972_v15  ;;  %v5432_v28 = vld [vmem:[#allocation52_spill] sm:$0xff] }
 0x1bb   : > { %v1987_v35 = vrot.slane %v1986_v32, 1  ;;  %vm2382_vm9 = vcmask 1047559   ;;  %v2451_v33 = vsel %vm2379_vm5, %v2450_v21, %v2449_v37  ;;  %v2089_v36 = vadd.f32 %v4876_v31, %v1967_v18  ;;  %v5433_v18 = vld [vmem:[#allocation8_spill] sm:$0xff]  ;;  %v5434_v37 = vld [vmem:[#allocation50_spill] sm:$0xff] }
 0x1bc   : > { %v2272_v27 = vsel %vm2144_vm1, %v4826_v57, %v4834_v59  ;;  %v2276_v25 = vsel %vm2148_vm7, %v4862_v29, %v4867_v20  ;;  %v2280_v38 = vsel %vm2152_vm8, %v2088_v54, %v2216_v51  ;;  %vm2143_vm10 = vcmp.gt.f32.partialorder %v4803_v24, 0.0 }
 0x1bd   : > { %v2091_v46 = vadd.f32 %v4876_v31, %v1981_v26  ;;  %v2090_v10 = vadd.f32 %v4876_v31, %v1974_v30  ;;  %v1988_v60 = vadd.f32 %v1987_v35, %v1986_v32  ;;  %v5427_v34 = vrot.slane %v4734_v6, 7 }
 0x1be   : > { %v5428_v57 = vrot.slane %v4780_v12, 6  ;;  %v2472_v9 = vrot.slane %v4811_v48, 5  ;;  %v2474_v29 = vrot.slane %v2272_v27, 4  ;;  %v2476_v20 = vrot.slane %v2276_v25, 3 }
 0x1bf   : > { %v2469_v52 = vsel %vm2364_vm12, %v5427_v34, %v4678_v49  ;;  %v2092_v54 = vadd.f32 %v4876_v31, %v1988_v60  ;;  %vm2154_vm11 = vcmp.gt.f32.partialorder %v2090_v10, 0.0  ;;  %v2218_v0 = vmul.f32 0.1, %v2090_v10 }
 0x1c0   : > { %v2471_v59 = vsel %vm2367_vm13, %v5428_v57, %v2469_v52  ;;  %v2478_v3 = vrot.slane %v2280_v38, 2  ;;  %vm2145_vm1 = vcmp.gt.f32.partialorder %v4843_v43, 0.0  ;;  %vm2149_vm2 = vcmp.gt.f32.partialorder %v4880_v14, 0.0  ;;  %v5438_v38 = vld [vmem:[#allocation27_spill] sm:$0xff]  ;;  %v5441_v57 = vld [vmem:[#allocation13_spill] sm:$0xff] }
 0x1c1   : > { %v2473_v7 = vsel %vm2370_vm14, %v2472_v9, %v2471_v59  ;;  %vm2153_vm4 = vcmp.gt.f32.partialorder %v2089_v36, 0.0  ;;  %v2282_v49 = vsel %vm2154_vm11, %v2090_v10, %v2218_v0  ;;  %vm2156_vm7 = vcmp.gt.f32.partialorder %v2092_v54, 0.0  ;;  %v5443_v9 = vld [vmem:[#allocation17_spill] sm:$0xff] }
 0x1c2   : > { %v2220_v6 = vmul.f32 0.1, %v2092_v54  ;;  %v2475_v12 = vsel %vm2373_vm15, %v2474_v29, %v2473_v7  ;;  %v2452_v48 = vrot.slane %v2282_v49, 1  ;;  %v2213_v31 = vmul.f32 0.1, %v4880_v14  ;;  %v5444_v29 = vld [vmem:[#allocation10_spill] sm:$0xff] }
 0x1c3   : > { %v2477_v40 = vsel %vm2376_vm3, %v2476_v20, %v2475_v12  ;;  %v2217_v41 = vmul.f32 0.1, %v2089_v36  ;;  %v2269_v1 = vsel %vm2141_vm6, %v4801_v23, %v4818_v61  ;;  %v2273_v47 = vsel %vm2145_vm1, %v4843_v43, %v4856_v13  ;;  %v5447_v7 = vld [vmem:[#allocation48_spill] sm:$0xff] }
 0x1c4   : > { %v2284_v63 = vsel %vm2156_vm7, %v2092_v54, %v2220_v6  ;;  %v2479_v11 = vsel %vm2379_vm5, %v2478_v3, %v2477_v40  ;;  %vm2110_vm8 = vcmp.gt.f32.partialorder %v4419_v53, 0.0  ;;  %v2453_v2 = vsel %vm2382_vm9, %v2452_v48, %v2451_v33  ;;  %v5445_v54 = vld [vmem:[#allocation36_spill] sm:$0xff] }
 0x1c5   : > { %v2480_v56 = vrot.slane %v2284_v63, 1  ;;  %v2277_v55 = vsel %vm2149_vm2, %v4880_v14, %v2213_v31  ;;  %v2281_v8 = vsel %vm2153_vm4, %v2089_v36, %v2217_v41  ;;  %2524 = vmatprep.subr.mxu0 %v2453_v2  ;;  %v5429_v15 = vrot.slane %v4653_v5, 7  ;;  %v5436_v36 = vld [vmem:[#allocation9_spill] sm:$0xff]  ;;  %v5446_v3 = vld [vmem:[#allocation44_spill] sm:$0xff] }
 0x1c6   : > { %v2432_v61 = vrot.slane %v2269_v1, 4  ;;  %v2434_v17 = vrot.slane %v2273_v47, 3  ;;  %v2436_v43 = vrot.slane %v2277_v55, 2  ;;  %v5430_v62 = vrot.slane %v4741_v22, 6  ;;  %v5448_v41 = vld [vmem:[#allocation32_spill] sm:$0xff] }
 0x1c7   : > { %v2427_v23 = vsel %vm2364_vm12, %v5429_v15, %v4661_v58  ;;  %v2481_v13 = vsel %vm2382_vm9, %v2480_v56, %v2479_v11  ;;  %v2438_v44 = vrot.slane %v2281_v8, 1  ;;  %vm2147_vm6 = vcmp.gt.f32.partialorder %v4849_v16, 0.0  ;;  %v5449_v1 = vld [vmem:[#allocation40_spill] sm:$0xff] }
 0x1c8   : > { %v2429_v4 = vsel %vm2367_vm13, %v5430_v62, %v2427_v23  ;;  %2601 = vmatprep.subr.mxu1 %v2481_v13  ;;  %v5431_v14 = vrot.slane %v4782_v45, 5  ;;  %vm2151_vm11 = vcmp.gt.f32.partialorder %v4886_v50, 0.0  ;;  %vm2155_vm1 = vcmp.gt.f32.partialorder %v2091_v46, 0.0  ;;  %v5450_v56 = vld [vmem:[#allocation28_spill] sm:$0xff] }
 0x1c9   : > { %v2215_v5 = vmul.f32 0.1, %v4886_v50  ;;  %v2219_v42 = vmul.f32 0.1, %v2091_v46  ;;  %v2271_v22 = vsel %vm2143_vm10, %v4803_v24, %v5432_v28  ;;  %v2275_v32 = vsel %vm2147_vm6, %v4849_v16, %v4859_v19  ;;  %v5439_v19 = vld [vmem:[#allocation51_spill] sm:$0xff] }
 0x1ca   : > { %v2431_v21 = vsel %vm2370_vm14, %v5431_v14, %v2429_v4  ;;  %v5435_v51 = vrot.slane %v5434_v37, 7  ;;  %v2460_v30 = vrot.slane %v2271_v22, 4  ;;  %v5437_v27 = vrot.slane %v5436_v36, 6  ;;  %v5452_v4 = vld [vmem:[#allocation25_spill] sm:$0xff] }
 0x1cb   : > { %v2433_v58 = vsel %vm2373_vm15, %v2432_v61, %v2431_v21  ;;  %v2279_v39 = vsel %vm2151_vm11, %v4886_v50, %v2215_v5  ;;  %v2283_v33 = vsel %vm2155_vm1, %v2091_v46, %v2219_v42  ;;  %v2462_v25 = vrot.slane %v2275_v32, 3  ;;  %v5442_v46 = vld [vmem:[#allocation5_spill] sm:$0xff] }
 0x1cc   : > { %v2435_v45 = vsel %vm2376_vm3, %v2434_v17, %v2433_v58  ;;  %v2455_v26 = vsel %vm2364_vm12, %v5435_v51, %v5433_v18  ;;  %vm2112_vm10 = vcmp.gt.f32.partialorder %v5438_v38, 0.0  ;;  %v5440_v50 = vrot.slane %v5439_v19, 5  ;;  %v5454_v21 = vld [vmem:[#allocation37_spill] sm:$0xff] }
 0x1cd   : > { %v2437_v35 = vsel %vm2379_vm5, %v2436_v43, %v2435_v45  ;;  %v2457_v24 = vsel %vm2367_vm13, %v5437_v27, %v2455_v26  ;;  %v2464_v60 = vrot.slane %v2279_v39, 2  ;;  %v2466_v34 = vrot.slane %v2283_v33, 1  ;;  %v5455_v5 = vld [vmem:[#allocation45_spill] sm:$0xff] }
 0x1ce   : > { %v2439_v16 = vsel %vm2382_vm9, %v2438_v44, %v2437_v35  ;;  %v2459_v10 = vsel %vm2370_vm14, %v5440_v50, %v2457_v24  ;;  %v2030_v59 = vadd.f32 %v5442_v46, %v5441_v57  ;;  %v2034_v20 = vadd.f32 %v5444_v29, %v5443_v9  ;;  %v5453_v44 = vld [vmem:[#allocation19_spill] sm:$0xff]  ;;  %v5456_v58 = vld [vmem:[#allocation49_spill] sm:$0xff]  ;;  %v5462_v9 = vld [vmem:[#allocation26_spill] sm:$0xff] }
 0x1cf   : > { %2525 = vmatpush1.msra.mxu0 %v2439_v16  ;;  %v2461_v52 = vsel %vm2373_vm15, %v2460_v30, %v2459_v10  ;;  %vm2114_vm2 = vcmp.gt.f32.partialorder %v5445_v54, 0.0  ;;  %vm2118_vm4 = vcmp.gt.f32.partialorder %v5446_v3, 0.0  ;;  %vm2122_vm7 = vcmp.gt.f32.partialorder %v5447_v7, 0.0  ;;  %v5457_v32 = vld [vmem:[#allocation21_spill] sm:$0xff] }
 0x1d0   : > { %v2463_v0 = vsel %vm2376_vm3, %v2462_v25, %v2461_v52  ;;  %v2182_v49 = vmul.f32 0.1, %v5446_v3  ;;  %vm2094_vm6 = vcmp.gt.f32.partialorder %v2030_v59, 0.0  ;;  %vm2098_vm11 = vcmp.gt.f32.partialorder %v2034_v20, 0.0  ;;  %v5459_v30 = vld [vmem:[#allocation33_spill] sm:$0xff] }
 0x1d1   : > { %v2465_v6 = vsel %vm2379_vm5, %v2464_v60, %v2463_v0  ;;  %v2158_v12 = vmul.f32 0.1, %v2030_v59  ;;  %v2162_v40 = vmul.f32 0.1, %v2034_v20  ;;  %v2186_v31 = vmul.f32 0.1, %v5447_v7 }
 0x1d2   : > { %v2467_v48 = vsel %vm2382_vm9, %v2466_v34, %v2465_v6  ;;  %v2238_v63 = vsel %vm2110_vm8, %v4419_v53, %v5448_v41  ;;  %v2242_v47 = vsel %vm2114_vm2, %v5445_v54, %v5449_v1  ;;  %v2246_v2 = vsel %vm2118_vm4, %v5446_v3, %v2182_v49  ;;  %v5451_v53 = vld [vmem:[#allocation14_spill] sm:$0xff]  ;;  %v5460_v33 = vld [vmem:[#allocation41_spill] sm:$0xff]  ;;  %v5463_v0 = vld [vmem:[#allocation11_spill] sm:$0xff] }
 0x1d3   : > { %2602 = vmatpush1.msra.mxu1 %v2467_v48  ;;  %v2222_v11 = vsel %vm2094_vm6, %v2030_v59, %v2158_v12  ;;  %v2388_v55 = vrot.slane %v5450_v56, 5  ;;  %v2226_v8 = vsel %vm2098_vm11, %v2034_v20, %v2162_v40  ;;  %v2250_v15 = vsel %vm2122_vm7, %v5447_v7, %v2186_v31  ;;  %v5461_v10 = vld [vmem:[#allocation29_spill] sm:$0xff]  ;;  %v5464_v7 = vld [vmem:[#allocation15_spill] sm:$0xff]  ;;  %v5465_v6 = vld [vmem:[#allocation22_spill] sm:$0xff] }
 0x1d4   : > { %v2390_v23 = vrot.slane %v2238_v63, 4  ;;  %v2392_v61 = vrot.slane %v2242_v47, 3  ;;  %v2384_v17 = vrot.slane %v2226_v8, 7  ;;  %v2394_v43 = vrot.slane %v2246_v2, 2  ;;  %v5467_v40 = vld [vmem:[#allocation34_spill] sm:$0xff]  ;;  %v5468_v31 = vld [vmem:[#allocation43_spill] sm:$0xff] }
 0x1d5   : > { %v2396_v13 = vrot.slane %v2250_v15, 1  ;;  %v2032_v62 = vadd.f32 %v5442_v46, %v5451_v53  ;;  %vm2109_vm8 = vcmp.gt.f32.partialorder %v5452_v4, 0.0  ;;  %v2036_v14 = vadd.f32 %v5444_v29, %v5453_v44  ;;  %v5469_v41 = vld [vmem:[#allocation47_spill] sm:$0xff]  ;;  %v5471_v8 = vld [vmem:[#allocation6_spill] sm:$0xff] }
 0x1d6   : > { %vm2116_vm1 = vcmp.gt.f32.partialorder %v5454_v21, 0.0  ;;  %vm2120_vm2 = vcmp.gt.f32.partialorder %v5455_v5, 0.0  ;;  %vm2124_vm4 = vcmp.gt.f32.partialorder %v5456_v58, 0.0  ;;  %v2385_v42 = vsel %vm2364_vm12, %v2384_v17, %v2222_v11 }
 0x1d7   : > { %vm2096_vm7 = vcmp.gt.f32.partialorder %v2032_v62, 0.0  ;;  %v2160_v28 = vmul.f32 0.1, %v2032_v62  ;;  %v2184_v22 = vmul.f32 0.1, %v5455_v5  ;;  %v5458_v45 = vrot.slane %v5457_v32, 6 }
 0x1d8   : > { %vm2100_vm6 = vcmp.gt.f32.partialorder %v2036_v14, 0.0  ;;  %v2164_v18 = vmul.f32 0.1, %v2036_v14  ;;  %v2188_v37 = vmul.f32 0.1, %v5456_v58  ;;  %v2240_v35 = vsel %vm2112_vm10, %v5438_v38, %v5459_v30 }
 0x1d9   : > { %v2387_v39 = vsel %vm2367_vm13, %v5458_v45, %v2385_v42  ;;  %v2224_v26 = vsel %vm2096_vm7, %v2032_v62, %v2160_v28  ;;  %v2244_v36 = vsel %vm2116_vm1, %v5454_v21, %v5460_v33  ;;  %v2248_v25 = vsel %vm2120_vm2, %v5455_v5, %v2184_v22  ;;  %v5474_v21 = vld [vmem:[#allocation46_spill] sm:$0xff]  ;;  %v5475_v5 = vld [vmem:[#allocation7_spill] sm:$0xff]  ;;  %v5476_v45 = vld [vmem:[#allocation12_spill] sm:$0xff] }
 0x1da   : > { %v2389_v51 = vsel %vm2370_vm14, %v2388_v55, %v2387_v39  ;;  %v2228_v24 = vsel %vm2100_vm6, %v2036_v14, %v2164_v18  ;;  %v2252_v16 = vsel %vm2124_vm4, %v5456_v58, %v2188_v37  ;;  %v2416_v60 = vrot.slane %v5461_v10, 5  ;;  %v5470_v55 = vld [vmem:[#allocation42_spill] sm:$0xff]  ;;  %v5477_v18 = vld [vmem:[#allocation16_spill] sm:$0xff] }
 0x1db   : > { %v2391_v27 = vsel %vm2373_vm15, %v2390_v23, %v2389_v51  ;;  %v2412_v50 = vrot.slane %v2228_v24, 7  ;;  %v2418_v38 = vrot.slane %v2240_v35, 4  ;;  %v2420_v52 = vrot.slane %v2244_v36, 3  ;;  %v5478_v35 = vld [vmem:[#allocation35_spill] sm:$0xff]  ;;  %v5479_v33 = vld [vmem:[#allocation18_spill] sm:$0xff] }
 0x1dc   : > { %v2393_v19 = vsel %vm2376_vm3, %v2392_v61, %v2391_v27  ;;  %v2422_v57 = vrot.slane %v2248_v25, 2  ;;  %v2424_v59 = vrot.slane %v2252_v16, 1  ;;  %vm2111_vm10 = vcmp.gt.f32.partialorder %v5462_v9, 0.0  ;;  %v5472_v61 = vld [vmem:[#allocation30_spill] sm:$0xff]  ;;  %v5481_v25 = vld [vmem:[#allocation23_spill] sm:$0xff] }
 0x1dd   : > { %v2395_v34 = vsel %vm2379_vm5, %v2394_v43, %v2393_v19  ;;  %v2413_v54 = vsel %vm2364_vm12, %v2412_v50, %v2224_v26  ;;  %v2029_v3 = vadd.f32 %v5442_v46, %v5463_v0  ;;  %v2033_v49 = vadd.f32 %v5444_v29, %v5464_v7  ;;  %v5473_v43 = vld [vmem:[#allocation38_spill] sm:$0xff]  ;;  %v5486_v0 = vld [vmem:[#allocation24_spill] sm:$0xff] }
 0x1de   : > { %v2397_v20 = vsel %vm2382_vm9, %v2396_v13, %v2395_v34  ;;  %v5466_v12 = vrot.slane %v5465_v6, 6  ;;  %vm2113_vm11 = vcmp.gt.f32.partialorder %v5467_v40, 0.0  ;;  %vm2117_vm1 = vcmp.gt.f32.partialorder %v5468_v31, 0.0  ;;  %v5484_v34 = vld [vmem:[#allocation20_spill] sm:$0xff] }
 0x1df   : > { %2526 = vmatprep.subr.mxu0 %v2397_v20  ;;  %vm2121_vm2 = vcmp.gt.f32.partialorder %v5469_v41, 0.0  ;;  %vm2093_vm4 = vcmp.gt.f32.partialorder %v2029_v3, 0.0  ;;  %vm2097_vm7 = vcmp.gt.f32.partialorder %v2033_v49, 0.0  ;;  %v2157_v11 = vmul.f32 0.1, %v2029_v3  ;;  %v5485_v20 = vld [vmem:[#allocation39_spill] sm:$0xff] }
 0x1e0   : > { %v2415_v48 = vsel %vm2367_vm13, %v5466_v12, %v2413_v54  ;;  %v2161_v47 = vmul.f32 0.1, %v2033_v49  ;;  %v2181_v2 = vmul.f32 0.1, %v5468_v31  ;;  %v2185_v56 = vmul.f32 0.1, %v5469_v41 }
 0x1e1   : > { %v2417_v63 = vsel %vm2370_vm14, %v2416_v60, %v2415_v48  ;;  %v2055_v15 = vadd.f32 %v5471_v8, %v5470_v55  ;;  %v2237_v17 = vsel %vm2109_vm8, %v5452_v4, %v5472_v61  ;;  %v2241_v13 = vsel %vm2113_vm11, %v5467_v40, %v5473_v43  ;;  %v5483_v60 = vld [vmem:[#allocation31_spill] sm:$0xff]  ;;  %v2286_v55 = vld [vmem:[%s5317_s4 + $0x8] sm:$0xff] }
 0x1e2   : > { %v2419_v1 = vsel %vm2373_vm15, %v2418_v38, %v2417_v63  ;;  %v2225_v62 = vsel %vm2097_vm7, %v2033_v49, %v2161_v47  ;;  %v2245_v44 = vsel %vm2117_vm1, %v5468_v31, %v2181_v2  ;;  %v2249_v14 = vsel %vm2121_vm2, %v5469_v41, %v2185_v56 }
 0x1e3   : > { %v2421_v23 = vsel %vm2376_vm3, %v2420_v52, %v2419_v1  ;;  %v2059_v58 = vadd.f32 %v5475_v5, %v5474_v21  ;;  %v2221_v4 = vsel %vm2093_vm4, %v2029_v3, %v2157_v11  ;;  %v2363_v28 = vrot.slane %v2225_v62, 7 }
 0x1e4   : > { %v2423_v53 = vsel %vm2379_vm5, %v2422_v57, %v2421_v23  ;;  %v2372_v22 = vrot.slane %v2237_v17, 4  ;;  %v2375_v32 = vrot.slane %v2241_v13, 3  ;;  %v2031_v39 = vadd.f32 %v5442_v46, %v5476_v45 }
 0x1e5   : > { %v2425_v42 = vsel %vm2382_vm9, %v2424_v59, %v2423_v53  ;;  %v2035_v37 = vadd.f32 %v5444_v29, %v5477_v18  ;;  %v2365_v51 = vsel %vm2364_vm12, %v2363_v28, %v2221_v4  ;;  %v2378_v26 = vrot.slane %v2245_v44, 2 }
 0x1e6   : > { %2603 = vmatprep.subr.mxu1 %v2425_v42  ;;  %v2381_v30 = vrot.slane %v2249_v14, 1  ;;  %vm2115_vm8 = vcmp.gt.f32.partialorder %v5478_v35, 0.0  ;;  %v5480_v36 = vrot.slane %v5479_v33, 6  ;;  %vm2119_vm11 = vcmp.gt.f32.partialorder %v2055_v15, 0.0 }
 0x1e7   : > { %vm2099_vm6 = vcmp.gt.f32.partialorder %v2035_v37, 0.0  ;;  %v2159_v24 = vmul.f32 0.1, %v2031_v39  ;;  %v5482_v16 = vrot.slane %v5481_v25, 5  ;;  %v2163_v19 = vmul.f32 0.1, %v2035_v37 }
 0x1e8   : > { %v2368_v27 = vsel %vm2367_vm13, %v5480_v36, %v2365_v51  ;;  %v2183_v50 = vmul.f32 0.1, %v2055_v15  ;;  %v2187_v29 = vmul.f32 0.1, %v2059_v58  ;;  %vm2095_vm1 = vcmp.gt.f32.partialorder %v2031_v39, 0.0  ;;  %v2674_v36 = vld [vmem:[%s5319_s6] sm:$0xff] }
 0x1e9   : > { %v2371_v46 = vsel %vm2370_vm14, %v5482_v16, %v2368_v27  ;;  %vm2123_vm2 = vcmp.gt.f32.partialorder %v2059_v58, 0.0  ;;  %v2239_v38 = vsel %vm2111_vm10, %v5462_v9, %v5483_v60  ;;  %v2400_v52 = vrot.slane %v5484_v34, 6  ;;  %v2285_v9 = vld [vmem:[%s5317_s4] sm:$0xff]  ;;  %v2893_v27 = vld [vmem:[%s5128_s16 + $0x68] sm:$0xff] }
 0x1ea   : > { %v2374_v10 = vsel %vm2373_vm15, %v2372_v22, %v2371_v46  ;;  %v2227_v59 = vsel %vm2099_vm6, %v2035_v37, %v2163_v19  ;;  %v2243_v54 = vsel %vm2115_vm8, %v5478_v35, %v5485_v20  ;;  %v2402_v3 = vrot.slane %v5486_v0, 5  ;;  %v2892_v16 = vld [vmem:[%s5128_s16 + $0x60] sm:$0xff]  ;;  %v2889_v19 = vld [vmem:[%s5128_s16 + $0x48] sm:$0xff] }
 0x1eb   : > { %v2377_v57 = vsel %vm2376_vm3, %v2375_v32, %v2374_v10  ;;  %v2247_v49 = vsel %vm2119_vm11, %v2055_v15, %v2183_v50  ;;  %v2398_v6 = vrot.slane %v2227_v59, 7  ;;  %v2223_v48 = vsel %vm2095_vm1, %v2031_v39, %v2159_v24  ;;  %v2888_v50 = vld [vmem:[%s5128_s16 + $0x40] sm:$0xff] }
 0x1ec   : > { %v2380_v7 = vsel %vm2379_vm5, %v2378_v26, %v2377_v57  ;;  %v2251_v40 = vsel %vm2123_vm2, %v2059_v58, %v2187_v29  ;;  %v2404_v31 = vrot.slane %v2239_v38, 4  ;;  %v2406_v63 = vrot.slane %v2243_v54, 3  ;;  %v2675_v38 = vld [vmem:[%s5319_s6 + $0x8] sm:$0xff]  ;;  %v2884_v59 = vld [vmem:[%s5128_s16 + $0x20] sm:$0xff]  ;;  %v2895_v54 = vld [vmem:[%s5128_s16 + $0x78] sm:$0xff] }
 0x1ed   : > { %v2383_v12 = vsel %vm2382_vm9, %v2381_v30, %v2380_v7  ;;  %v2399_v41 = vsel %vm2364_vm12, %v2398_v6, %v2223_v48  ;;  %v2408_v1 = vrot.slane %v2247_v49, 2  ;;  %v2410_v2 = vrot.slane %v2251_v40, 1  ;;  %v2891_v7 = vld [vmem:[%s5128_s16 + $0x58] sm:$0xff]  ;;  %v2881_v49 = vld [vmem:[%s5128_s16 + $0x8] sm:$0xff]  ;;  %v2890_v6 = vld [vmem:[%s5128_s16 + $0x50] sm:$0xff] }
 0x1ee   : > { %2527 = vmatpush1.msra.mxu0 %v2383_v12  ;;  %v2401_v11 = vsel %vm2367_vm13, %v2400_v52, %v2399_v41  ;;  %v5487_v56 = vmov 0.0   ;;  %v2297_v17 = vpop.permute.xlu1 %2296  ;;  %v2885_v52 = vld [vmem:[%s5128_s16 + $0x28] sm:$0xff]  ;;  %v2887_v12 = vld [vmem:[%s5128_s16 + $0x38] sm:$0xff]  ;;  %v2886_v48 = vld [vmem:[%s5128_s16 + $0x30] sm:$0xff]  ;;  %vm2896_vm4 = vcmask 261120  }
 0x1ef   : > { %3582 = vmatmul.mubr.msk.f32.vlgmr.msra.gmra.mxu0 %vm802_vm0, %v2285_v9  ;;  %v2403_v47 = vsel %vm2370_vm14, %v2402_v3, %v2401_v11  ;;  %v2894_v3 = vld [vmem:[%s5128_s16 + $0x70] sm:$0xff]  ;;  %v2883_v40 = vld [vmem:[%s5128_s16 + $0x18] sm:$0xff]  ;;  %v2876_v41 = vld [vmem:[%s5322_s9] sm:$0xff] }
 0x1f0   : > { %2566 = vmatprep.mubr.f32.mxu0 %v5487_v56  ;;  %v2405_v8 = vsel %vm2373_vm15, %v2404_v31, %v2403_v47  ;;  %v2882_v31 = vld [vmem:[%s5128_s16 + $0x10] sm:$0xff] }
 0x1f1   : > { %v2407_v15 = vsel %vm2376_vm3, %v2406_v63, %v2405_v8  ;;  %v2877_v63 = vld [vmem:[%s5322_s9 + $0x8] sm:$0xff]  ;;  %v2878_v11 = vld [vmem:[%s5322_s9 + $0x10] sm:$0xff] }
 0x1f2   : > { %v2409_v23 = vsel %vm2379_vm5, %v2408_v1, %v2407_v15  ;;  %v2292_v62 = vpop.permute.xlu1 %2291  ;;  %v2879_v1 = vld [vmem:[%s5322_s9 + $0x18] sm:$0xff] }
 0x1f3   : > { %3583 = vmatmul.mubr.msk.f32.gmra.mxu0 %vm802_vm0, %v2286_v55  ;;  %v2411_v61 = vsel %vm2382_vm9, %v2410_v2, %v2409_v23 }
 0x1f4   : > { %2758 = vmatprep.mubr.f32.mxu0 %v5487_v56  ;;  %2604 = vmatpush1.msra.mxu1 %v2411_v61 }
 0x1f5   : > { %3584 = vmatmul.mubr.msk.f32.vlgmr.msra.gmra.mxu1 %vm802_vm0, %v2285_v9  ;;  %v2880_v9 = vld [vmem:[%s5128_s16] sm:$0xff] }
 0x1f6   : > { %2643 = vmatprep.mubr.f32.mxu1 %v5487_v56  ;;  %v2681_v8 = vpop.permute.xlu1 %2680 }
 0x1f9   : > { %3585 = vmatmul.mubr.msk.f32.gmra.mxu1 %vm802_vm0, %v2286_v55  ;;  %v2686_v55 = vpop.permute.xlu0 %2685 }
 0x1fa   : > { %2835 = vmatprep.mubr.f32.mxu1 %v5487_v56 }
 0x2af   : > { %v2562_v43 = vpop.f32.mrf.mxu0 }
 0x2b0   : > { %v2563_v5 = vadd.f32 %v2562_v43, %v2292_v62 }
 0x2b1   : > { %v2564_v13 = vpop.f32.mrf.mxu0 }
 0x2b2   : > { %v2565_v14 = vadd.f32 %v2564_v13, %v2292_v62  ;;  %v2658_v45 = vmul.f32 0.1, %v2563_v5  ;;  %vm2650_vm15 = vcmp.gt.f32.partialorder %v2563_v5, 0.0 }
 0x2b3   : > { %v2568_v53 = vpop.f32.mrf.mxu0 }
 0x2b4   : > { %v2569_v44 = vadd.f32 %v2568_v53, %v2297_v17  ;;  %v2659_v32 = vmul.f32 0.1, %v2565_v14  ;;  %vm2651_vm14 = vcmp.gt.f32.partialorder %v2565_v14, 0.0  ;;  %v2666_v25 = vsel %vm2650_vm15, %v2563_v5, %v2658_v45 }
 0x2b5   : > { %v2570_v21 = vpop.f32.mrf.mxu0  ;;  %v2639_v58 = vpop.f32.mrf.mxu1 }
 0x2b6   : > { %v2571_v42 = vadd.f32 %v2570_v21, %v2297_v17  ;;  %v2662_v4 = vmul.f32 0.1, %v2569_v44  ;;  %vm2654_vm12 = vcmp.gt.f32.partialorder %v2569_v44, 0.0  ;;  %v2640_v35 = vadd.f32 %v2639_v58, %v2292_v62 }
 0x2b7   : > { %v2641_v28 = vpop.f32.mrf.mxu1  ;;  %v2667_v33 = vsel %vm2651_vm14, %v2565_v14, %v2659_v32 }
 0x2b8   : > { %v2663_v22 = vmul.f32 0.1, %v2571_v42  ;;  %vm2655_vm13 = vcmp.gt.f32.partialorder %v2571_v42, 0.0  ;;  %v2642_v51 = vadd.f32 %v2641_v28, %v2292_v62  ;;  %v2670_v26 = vsel %vm2654_vm12, %v2569_v44, %v2662_v4 }
 0x2b9   : > { %v2645_v39 = vpop.f32.mrf.mxu1  ;;  %v2660_v60 = vmul.f32 0.1, %v2640_v35  ;;  %vm2652_vm10 = vcmp.gt.f32.partialorder %v2640_v35, 0.0 }
 0x2ba   : > { %v2671_v18 = vsel %vm2655_vm13, %v2571_v42, %v2663_v22  ;;  %v2646_v37 = vadd.f32 %v2645_v39, %v2297_v17  ;;  %v2661_v10 = vmul.f32 0.1, %v2642_v51  ;;  %vm2653_vm9 = vcmp.gt.f32.partialorder %v2642_v51, 0.0 }
 0x2bb   : > { %2722 = vmatprep.subr.mxu0 %v2671_v18  ;;  %v2647_v30 = vpop.f32.mrf.mxu1  ;;  %v2668_v0 = vsel %vm2652_vm10, %v2640_v35, %v2660_v60  ;;  %v2872_v18 = vld [vmem:[%s5321_s8] sm:$0xff] }
 0x2bc   : > { %2723 = vmatpush1.msra.mxu0 %v2670_v26  ;;  %v2648_v24 = vadd.f32 %v2647_v30, %v2297_v17  ;;  %v2664_v46 = vmul.f32 0.1, %v2646_v37  ;;  %vm2656_vm3 = vcmp.gt.f32.partialorder %v2646_v37, 0.0  ;;  %v2669_v20 = vsel %vm2653_vm9, %v2642_v51, %v2661_v10 }
 0x2bd   : > { %2724 = vmatprep.subr.mxu0 %v2667_v33 }
 0x2be   : > { %2725 = vmatpush1.msra.mxu0 %v2666_v25  ;;  %v2665_v29 = vmul.f32 0.1, %v2648_v24  ;;  %vm2657_vm5 = vcmp.gt.f32.partialorder %v2648_v24, 0.0  ;;  %v2672_v57 = vsel %vm2656_vm3, %v2646_v37, %v2664_v46  ;;  %v2874_v46 = vld [vmem:[%s5321_s8 + $0x10] sm:$0xff] }
 0x2bf   : > { %3586 = vmatmul.mubr.msk.f32.vlgmr.msra.gmra.mxu0 %vm802_vm0, %v2674_v36  ;;  %2933 = vmatprep.subr.mxu0 %v2893_v27 }
 0x2c0   : > { %2764 = vmatprep.mubr.f32.mxu0 %v5487_v56  ;;  %2934 = vmatpush1.msra.mxu0 %v2892_v16  ;;  %v2673_v34 = vsel %vm2657_vm5, %v2648_v24, %v2665_v29 }
 0x2c1   : > { %2935 = vmatprep.subr.mxu0 %v2889_v19  ;;  %2799 = vmatprep.subr.mxu1 %v2673_v34  ;;  %v2875_v19 = vld [vmem:[%s5321_s8 + $0x18] sm:$0xff] }
 0x2c2   : > { %2936 = vmatpush1.msra.mxu0 %v2888_v50  ;;  %2800 = vmatpush1.msra.mxu1 %v2672_v57 }
 0x2c3   : > { %3587 = vmatmul.mubr.msk.f32.gmra.mxu0 %vm802_vm0, %v2675_v38  ;;  %2801 = vmatprep.subr.mxu1 %v2669_v20 }
 0x2c4   : > { %2937 = vmatprep.subr.mxu0 %v2885_v52  ;;  %2802 = vmatpush1.msra.mxu1 %v2668_v0 }
 0x2c5   : > { %2938 = vmatpush1.msra.mxu0 %v2884_v59  ;;  %3588 = vmatmul.mubr.msk.f32.vlgmr.msra.gmra.mxu1 %vm802_vm0, %v2674_v36  ;;  %v2873_v36 = vld [vmem:[%s5321_s8 + $0x8] sm:$0xff] }
 0x2c6   : > { %3022 = vmatprep.subr.mxu1 %v2895_v54  ;;  %2841 = vmatprep.mubr.f32.mxu1 %v5487_v56 }
 0x2c7   : > { %3023 = vmatpush1.msra.mxu1 %v2894_v3  ;;  %2939 = vmatprep.subr.mxu0 %v2881_v49 }
 0x2c8   : > { %3024 = vmatprep.subr.mxu1 %v2891_v7  ;;  %2940 = vmatpush1.msra.mxu0 %v2880_v9  ;;  %v3284_v9 = vpop.permute.xlu0 %3283 }
 0x2c9   : > { %3025 = vmatpush1.msra.mxu1 %v2890_v6  ;;  %2973 = vmatprep.mubr.f32.mxu0 %v5487_v56 }
 0x2ca   : > { %3589 = vmatmul.mubr.msk.f32.gmra.mxu1 %vm802_vm0, %v2675_v38  ;;  %3026 = vmatprep.subr.mxu1 %v2887_v12 }
 0x2cb   : > { %3027 = vmatpush1.msra.mxu1 %v2886_v48  ;;  %3062 = vmatprep.mubr.f32.mxu1 %v5487_v56 }
 0x2cc   : > { %3028 = vmatprep.subr.mxu1 %v2883_v40  ;;  %3590 = vmatmul.mubr.msk.f32.vlgmr.msra.gmra.mxu0 %vm2896_vm4, %v2876_v41 }
 0x2cd   : > { %3029 = vmatpush1.msra.mxu1 %v2882_v31  ;;  %2979 = vmatprep.mubr.f32.mxu0 %v5487_v56 }
 0x2ce   : > { %3594 = vmatmul.mubr.msk.f32.vlgmr.msra.gmra.mxu1 %vm2896_vm4, %v2876_v41 }
 0x2cf   : > { %3068 = vmatprep.mubr.f32.mxu1 %v5487_v56 }
 0x2d0   : > { %3591 = vmatmul.mubr.msk.f32.gmra.mxu0 %vm2896_vm4, %v2877_v63 }
 0x2d1   : > { %2985 = vmatprep.mubr.f32.mxu0 %v5487_v56 }
 0x2d2   : > { %3595 = vmatmul.mubr.msk.f32.gmra.mxu1 %vm2896_vm4, %v2877_v63 }
 0x2d3   : > { %3074 = vmatprep.mubr.f32.mxu1 %v5487_v56 }
 0x2d4   : > { %3592 = vmatmul.mubr.msk.f32.gmra.mxu0 %vm2896_vm4, %v2878_v11 }
 0x2d5   : > { %2991 = vmatprep.mubr.f32.mxu0 %v5487_v56 }
 0x2d6   : > { %3596 = vmatmul.mubr.msk.f32.gmra.mxu1 %vm2896_vm4, %v2878_v11 }
 0x2d7   : > { %3080 = vmatprep.mubr.f32.mxu1 %v5487_v56 }
 0x2d8   : > { %3593 = vmatmul.mubr.msk.f32.gmra.mxu0 %vm2896_vm4, %v2879_v1 }
 0x2d9   : > { %3163 = vmatprep.mubr.f32.mxu0 %v5487_v56 }
 0x2da   : > { %3597 = vmatmul.mubr.msk.f32.gmra.mxu1 %vm2896_vm4, %v2879_v1 }
 0x2db   : > { %3252 = vmatprep.mubr.f32.mxu1 %v5487_v56 }
 0x37f   : > { %v2760_v47 = vpop.f32.mrf.mxu0 }
 0x380   : > { %v2761_v17 = vadd.f32 %v2760_v47, %v2681_v8  ;;  %v3289_v47 = vpop.permute.xlu1 %3288 }
 0x381   : > { %v2762_v2 = vpop.f32.mrf.mxu0 }
 0x382   : > { %v2763_v23 = vadd.f32 %v2762_v2, %v2681_v8  ;;  %v2856_v5 = vmul.f32 0.1, %v2761_v17  ;;  %vm2848_vm11 = vcmp.gt.f32.partialorder %v2761_v17, 0.0 }
 0x383   : > { %v2766_v15 = vpop.f32.mrf.mxu0 }
 0x384   : > { %v2767_v61 = vadd.f32 %v2766_v15, %v2686_v55  ;;  %v2857_v44 = vmul.f32 0.1, %v2763_v23  ;;  %vm2849_vm6 = vcmp.gt.f32.partialorder %v2763_v23, 0.0  ;;  %v2864_v51 = vsel %vm2848_vm11, %v2761_v17, %v2856_v5 }
 0x385   : > { %v2768_v43 = vpop.f32.mrf.mxu0  ;;  %v2837_v13 = vpop.f32.mrf.mxu1 }
 0x386   : > { %v2769_v53 = vadd.f32 %v2768_v43, %v2686_v55  ;;  %v2860_v62 = vmul.f32 0.1, %v2767_v61  ;;  %vm2852_vm7 = vcmp.gt.f32.partialorder %v2767_v61, 0.0  ;;  %v2838_v32 = vadd.f32 %v2837_v13, %v2681_v8 }
 0x387   : > { %v2839_v14 = vpop.f32.mrf.mxu1  ;;  %v2865_v39 = vsel %vm2849_vm6, %v2763_v23, %v2857_v44 }
 0x388   : > { %v2861_v21 = vmul.f32 0.1, %v2769_v53  ;;  %vm2853_vm8 = vcmp.gt.f32.partialorder %v2769_v53, 0.0  ;;  %v2840_v4 = vadd.f32 %v2839_v14, %v2681_v8  ;;  %v2868_v22 = vsel %vm2852_vm7, %v2767_v61, %v2860_v62  ;;  %v3294_v14 = vpop.permute.xlu0 %3293 }
 0x389   : > { %v2858_v33 = vmul.f32 0.1, %v2838_v32  ;;  %vm2850_vm13 = vcmp.gt.f32.partialorder %v2838_v32, 0.0 }
 0x38a   : > { %v2843_v58 = vpop.f32.mrf.mxu1  ;;  %v2869_v42 = vsel %vm2853_vm8, %v2769_v53, %v2861_v21  ;;  %v2859_v30 = vmul.f32 0.1, %v2840_v4  ;;  %vm2851_vm12 = vcmp.gt.f32.partialorder %v2840_v4, 0.0 }
 0x38b   : > { %v2844_v28 = vadd.f32 %v2843_v58, %v2686_v55  ;;  %3127 = vmatprep.subr.mxu0 %v2869_v42  ;;  %v2866_v16 = vsel %vm2850_vm13, %v2838_v32, %v2858_v33 }
 0x38c   : > { %v2845_v45 = vpop.f32.mrf.mxu1  ;;  %3128 = vmatpush1.msra.mxu0 %v2868_v22  ;;  %v2867_v25 = vsel %vm2851_vm12, %v2840_v4, %v2859_v30  ;;  %v2975_v50 = vpop.f32.mrf.mxu0 }
 0x38d   : > { %v2846_v37 = vadd.f32 %v2845_v45, %v2686_v55  ;;  %3129 = vmatprep.subr.mxu0 %v2865_v39  ;;  %v2862_v26 = vmul.f32 0.1, %v2844_v28  ;;  %vm2854_vm1 = vcmp.gt.f32.partialorder %v2844_v28, 0.0 }
 0x38e   : > { %3130 = vmatpush1.msra.mxu0 %v2864_v51  ;;  %v2977_v29 = vpop.f32.mrf.mxu0  ;;  %v3064_v10 = vpop.f32.mrf.mxu1 }
 0x38f   : > { %v2863_v35 = vmul.f32 0.1, %v2846_v37  ;;  %vm2855_vm2 = vcmp.gt.f32.partialorder %v2846_v37, 0.0  ;;  %3598 = vmatmul.mubr.msk.f32.vlgmr.msra.gmra.mxu0 %vm802_vm0, %v2872_v18  ;;  %v2870_v24 = vsel %vm2854_vm1, %v2844_v28, %v2862_v26 }
 0x390   : > { %3169 = vmatprep.mubr.f32.mxu0 %v5487_v56  ;;  %v2981_v60 = vpop.f32.mrf.mxu0  ;;  %v3066_v38 = vpop.f32.mrf.mxu1 }
 0x391   : > { %v2871_v27 = vsel %vm2855_vm2, %v2846_v37, %v2863_v35 }
 0x392   : > { %3216 = vmatprep.subr.mxu1 %v2871_v27  ;;  %v2983_v34 = vpop.f32.mrf.mxu0  ;;  %v3070_v52 = vpop.f32.mrf.mxu1 }
 0x393   : > { %3217 = vmatpush1.msra.mxu1 %v2870_v24  ;;  %3599 = vmatmul.mubr.msk.f32.gmra.mxu0 %vm802_vm0, %v2873_v36 }
 0x394   : > { %3218 = vmatprep.subr.mxu1 %v2867_v25  ;;  %3175 = vmatprep.mubr.f32.mxu0 %v5487_v56  ;;  %v2987_v57 = vpop.f32.mrf.mxu0  ;;  %v5215_v59 = vpop.f32.mrf.mxu1 }
 0x395   : > { %3219 = vmatpush1.msra.mxu1 %v2866_v16 }
 0x396   : > { %3602 = vmatmul.mubr.msk.f32.vlgmr.msra.gmra.mxu1 %vm802_vm0, %v2872_v18  ;;  %v2989_v20 = vpop.f32.mrf.mxu0  ;;  %v5217_v54 = vpop.f32.mrf.mxu1 }
 0x397   : > { %3258 = vmatprep.mubr.f32.mxu1 %v5487_v56  ;;  %3600 = vmatmul.mubr.msk.f32.gmra.mxu0 %vm802_vm0, %v2874_v46 }
 0x398   : > { %3181 = vmatprep.mubr.f32.mxu0 %v5487_v56  ;;  %v5219_v0 = vpop.f32.mrf.mxu0 }
 0x39a   : > { %3603 = vmatmul.mubr.msk.f32.gmra.mxu1 %vm802_vm0, %v2873_v36  ;;  %v5223_v3 = vpop.f32.mrf.mxu0 }
 0x39b   : > { %3264 = vmatprep.mubr.f32.mxu1 %v5487_v56  ;;  %3601 = vmatmul.mubr.msk.f32.gmra.mxu0 %vm802_vm0, %v2875_v19 }
 0x39e   : > { %3604 = vmatmul.mubr.msk.f32.gmra.mxu1 %vm802_vm0, %v2874_v46 }
 0x39f   : > { %3270 = vmatprep.mubr.f32.mxu1 %v5487_v56  ;;  %v5221_v56 = vpop.f32.mrf.mxu1 }
 0x3a1   : > { %v5226_v49 = vpop.f32.mrf.mxu1 }
 0x3a2   : > { %3605 = vmatmul.mubr.msk.f32.gmra.mxu1 %vm802_vm0, %v2875_v19 }
 0x3a3   : > { %v5230_v41 = vpop.f32.mrf.mxu1 }
 0x44f   : > { %v3165_v7 = vpop.f32.mrf.mxu0 }
 0x450   : > { %v3166_v6 = vadd.f32 %v3165_v7, %v2975_v50 }
 0x451   : > { %v3167_v12 = vpop.f32.mrf.mxu0 }
 0x452   : > { %v3301_v48 = vadd.f32 %v3284_v9, %v3166_v6  ;;  %v3168_v40 = vadd.f32 %v3167_v12, %v2977_v29 }
 0x453   : > { %v3171_v31 = vpop.f32.mrf.mxu0 }
 0x454   : > { %vm3317_vm0 = vcmp.gt.f32.partialorder %v3301_v48, 0.0  ;;  %v3333_v63 = vmul.f32 0.1, %v3301_v48  ;;  %v3302_v11 = vadd.f32 %v3284_v9, %v3168_v40  ;;  %v3172_v1 = vadd.f32 %v3171_v31, %v2981_v60 }
 0x455   : > { %v3173_v2 = vpop.f32.mrf.mxu0 }
 0x456   : > { %v3349_v55 = vsel %vm3317_vm0, %v3301_v48, %v3333_v63  ;;  %v3254_v8 = vpop.f32.mrf.mxu1  ;;  %vm3318_vm14 = vcmp.gt.f32.partialorder %v3302_v11, 0.0  ;;  %v3334_v15 = vmul.f32 0.1, %v3302_v11  ;;  %v3305_v23 = vadd.f32 %v3289_v47, %v3172_v1 }
 0x457   : > { %3365 = vst [vmem:[%s5232_s28] sm:$0xff] %v3349_v55  ;;  %v3255_v61 = vadd.f32 %v3254_v8, %v3064_v10  ;;  %v3174_v17 = vadd.f32 %v3173_v2, %v2983_v34  ;;  %v3177_v43 = vpop.f32.mrf.mxu0 }
 0x458   : > { %v3350_v13 = vsel %vm3318_vm14, %v3302_v11, %v3334_v15  ;;  %v3256_v53 = vpop.f32.mrf.mxu1  ;;  %vm3321_vm15 = vcmp.gt.f32.partialorder %v3305_v23, 0.0  ;;  %v3337_v62 = vmul.f32 0.1, %v3305_v23  ;;  %v3178_v44 = vadd.f32 %v3177_v43, %v2987_v57  ;;  %v3299_v57 = vpop.permute.xlu1 %3298 }
 0x459   : > { %v3303_v21 = vadd.f32 %v3284_v9, %v3255_v61  ;;  %3366 = vst [vmem:[%s5232_s28 + $0x8] sm:$0xff] %v3350_v13  ;;  %v3257_v5 = vadd.f32 %v3256_v53, %v3066_v38  ;;  %v3306_v58 = vadd.f32 %v3289_v47, %v3174_v17  ;;  %v3179_v42 = vpop.f32.mrf.mxu0 }
 0x45a   : > { %v3353_v4 = vsel %vm3321_vm15, %v3305_v23, %v3337_v62  ;;  %v3260_v28 = vpop.f32.mrf.mxu1  ;;  %v3309_v22 = vadd.f32 %v3294_v14, %v3178_v44  ;;  %v3180_v32 = vadd.f32 %v3179_v42, %v2989_v20 }
 0x45b   : > { %vm3319_vm3 = vcmp.gt.f32.partialorder %v3303_v21, 0.0  ;;  %v3335_v45 = vmul.f32 0.1, %v3303_v21  ;;  %v3304_v39 = vadd.f32 %v3284_v9, %v3257_v5  ;;  %3369 = vst [vmem:[%s5232_s28 + $0x20] sm:$0xff] %v3353_v4  ;;  %v3261_v18 = vadd.f32 %v3260_v28, %v3070_v52  ;;  %v3183_v37 = vpop.f32.mrf.mxu0 }
 0x45c   : > { %vm3322_vm5 = vcmp.gt.f32.partialorder %v3306_v58, 0.0  ;;  %v3338_v51 = vmul.f32 0.1, %v3306_v58  ;;  %v3262_v26 = vpop.f32.mrf.mxu1  ;;  %vm3325_vm9 = vcmp.gt.f32.partialorder %v3309_v22, 0.0  ;;  %v3341_v30 = vmul.f32 0.1, %v3309_v22 }
 0x45d   : > { %v3351_v35 = vsel %vm3319_vm3, %v3303_v21, %v3335_v45  ;;  %vm3320_vm10 = vcmp.gt.f32.partialorder %v3304_v39, 0.0  ;;  %v3336_v33 = vmul.f32 0.1, %v3304_v39  ;;  %v3307_v36 = vadd.f32 %v3289_v47, %v3261_v18  ;;  %v3185_v19 = vpop.f32.mrf.mxu0 }
 0x45e   : > { %3367 = vst [vmem:[%s5232_s28 + $0x10] sm:$0xff] %v3351_v35  ;;  %v3354_v27 = vsel %vm3322_vm5, %v3306_v58, %v3338_v51  ;;  %v3263_v24 = vadd.f32 %v3262_v26, %v5215_v59  ;;  %v3357_v25 = vsel %vm3325_vm9, %v3309_v22, %v3341_v30  ;;  %v3266_v16 = vpop.f32.mrf.mxu1  ;;  %v3310_v46 = vadd.f32 %v3294_v14, %v3180_v32 }
 0x45f   : > { %v3352_v50 = vsel %vm3320_vm10, %v3304_v39, %v3336_v33  ;;  %vm3323_vm4 = vcmp.gt.f32.partialorder %v3307_v36, 0.0  ;;  %v3339_v29 = vmul.f32 0.1, %v3307_v36  ;;  %3370 = vst [vmem:[%s5232_s28 + $0x28] sm:$0xff] %v3354_v27  ;;  %3373 = vst [vmem:[%s5232_s28 + $0x40] sm:$0xff] %v3357_v25  ;;  %v3267_v10 = vadd.f32 %v3266_v16, %v5217_v54 }
 0x460   : > { %3368 = vst [vmem:[%s5232_s28 + $0x18] sm:$0xff] %v3352_v50  ;;  %v3308_v60 = vadd.f32 %v3289_v47, %v3263_v24  ;;  %vm3326_vm7 = vcmp.gt.f32.partialorder %v3310_v46, 0.0  ;;  %v3342_v38 = vmul.f32 0.1, %v3310_v46  ;;  %v3268_v34 = vpop.f32.mrf.mxu1  ;;  %v3184_v52 = vadd.f32 %v3183_v37, %v5219_v0 }
 0x461   : > { %v3355_v59 = vsel %vm3323_vm4, %v3307_v36, %v3339_v29  ;;  %v3311_v20 = vadd.f32 %v3294_v14, %v3267_v10  ;;  %v3269_v7 = vadd.f32 %v3268_v34, %v5221_v56  ;;  %v3186_v6 = vadd.f32 %v3185_v19, %v5223_v3 }
 0x462   : > { %3371 = vst [vmem:[%s5232_s28 + $0x30] sm:$0xff] %v3355_v59  ;;  %vm3324_vm8 = vcmp.gt.f32.partialorder %v3308_v60, 0.0  ;;  %v3340_v9 = vmul.f32 0.1, %v3308_v60  ;;  %v3358_v54 = vsel %vm3326_vm7, %v3310_v46, %v3342_v38  ;;  %v3313_v12 = vadd.f32 %v3299_v57, %v3184_v52  ;;  %v3272_v48 = vpop.f32.mrf.mxu1 }
 0x463   : > { %vm3327_vm6 = vcmp.gt.f32.partialorder %v3311_v20, 0.0  ;;  %v3343_v40 = vmul.f32 0.1, %v3311_v20  ;;  %3374 = vst [vmem:[%s5232_s28 + $0x48] sm:$0xff] %v3358_v54  ;;  %v3312_v31 = vadd.f32 %v3294_v14, %v3269_v7  ;;  %v3273_v0 = vadd.f32 %v3272_v48, %v5226_v49 }
 0x464   : > { %v3356_v63 = vsel %vm3324_vm8, %v3308_v60, %v3340_v9  ;;  %vm3329_vm11 = vcmp.gt.f32.partialorder %v3313_v12, 0.0  ;;  %v3345_v56 = vmul.f32 0.1, %v3313_v12  ;;  %v3314_v11 = vadd.f32 %v3299_v57, %v3186_v6  ;;  %v3274_v3 = vpop.f32.mrf.mxu1 }
 0x465   : > { %3372 = vst [vmem:[%s5232_s28 + $0x38] sm:$0xff] %v3356_v63  ;;  %v3359_v1 = vsel %vm3327_vm6, %v3311_v20, %v3343_v40  ;;  %vm3328_vm1 = vcmp.gt.f32.partialorder %v3312_v31, 0.0  ;;  %v3344_v47 = vmul.f32 0.1, %v3312_v31  ;;  %v3315_v2 = vadd.f32 %v3299_v57, %v3273_v0 }
 0x466   : > { %3375 = vst [vmem:[%s5232_s28 + $0x50] sm:$0xff] %v3359_v1  ;;  %v3361_v55 = vsel %vm3329_vm11, %v3313_v12, %v3345_v56  ;;  %vm3330_vm2 = vcmp.gt.f32.partialorder %v3314_v11, 0.0  ;;  %v3346_v49 = vmul.f32 0.1, %v3314_v11  ;;  %v3275_v8 = vadd.f32 %v3274_v3, %v5230_v41 }
 0x467   : > { %v3360_v15 = vsel %vm3328_vm1, %v3312_v31, %v3344_v47  ;;  %3377 = vst [vmem:[%s5232_s28 + $0x60] sm:$0xff] %v3361_v55  ;;  %vm3331_vm12 = vcmp.gt.f32.partialorder %v3315_v2, 0.0  ;;  %v3347_v23 = vmul.f32 0.1, %v3315_v2 }
 0x468   : > { %3376 = vst [vmem:[%s5232_s28 + $0x58] sm:$0xff] %v3360_v15  ;;  %v3362_v61 = vsel %vm3330_vm2, %v3314_v11, %v3346_v49  ;;  %v3316_v17 = vadd.f32 %v3299_v57, %v3275_v8 }
 0x469   : > { %v3363_v43 = vsel %vm3331_vm12, %v3315_v2, %v3347_v23  ;;  %3378 = vst [vmem:[%s5232_s28 + $0x68] sm:$0xff] %v3362_v61 }
 0x46a   : > { %3379 = vst [vmem:[%s5232_s28 + $0x70] sm:$0xff] %v3363_v43  ;;  %vm3332_vm13 = vcmp.gt.f32.partialorder %v3316_v17, 0.0  ;;  %v3348_v13 = vmul.f32 0.1, %v3316_v17 }
 0x46c   : > { %v3364_v41 = vsel %vm3332_vm13, %v3316_v17, %v3348_v13 }
 0x46d   : > { %3380 = vst [vmem:[%s5232_s28 + $0x78] sm:$0xff] %v3364_v41 }
 0x46e   : > { %3691 = shalt.err (!%p3688_p5)
}
 0x46f   : > { %s3692_s24 = scalar_lea.hbm %s5261_s14, 2048  ;;  %s3696_s16 = scalar_lea.hbm %s5324_s11, 4096 }
 0x470   : > { %p3693_p6 = scmp.ne.s32.totalorder %s5261_s14, %s3692_s24  ;;  %p3697_p10 = scmp.lt.s32.totalorder %s5261_s14, %s5324_s11 }
 0x471   : > { %p3698_p11 = scmp.lt.s32.totalorder %s3696_s16, %s3692_s24 }
 0x472   : > { %p3694_p7 = pnand %p3693_p6, %p3861_p4 }
 0x473   : > { %p3699_p12 = por %p3698_p11, %p3697_p10 }
 0x474   : > { %p3695_p9 = pneg %p3694_p7 }
 0x476   : > { %p3700_p13 = pnand %p3699_p12, %p3695_p9 }
 0x478   : > { %3703 = shalt.err (!%p3700_p13)
}
 0x479   : > { %s3759_s0 = smov 512   ;;  %s3760_s23 = smov 32  }
 0x47a   : > { %3617 = dma.vmem_to_hbm [thread:$0]  (%p3861_p4), %s5263_s13, 2048, %s5261_s14, %s5268_s20, %s3759_s0, %s3759_s0, %s3760_s23  }
 0x47b PF: > { %p3623_p0 = scmp.ge.s32.totalorder %s3754_s22, 2  ;;  %s3412_s12 = sand.u32 1, %s3734_s17  }
 0x47c   : > { %s3413_s1 = scalar_lea.sflag [#allocation3], %s3412_s12 }
 0x47d   : > { %p3620_p1 = pnand %p3623_p0, %p3868_p8 }
 0x47f   : > { %p3621_p2 = pneg %p3620_p1 }
 0x481   : > { %3729 = dma.done.wait (%p3621_p2), %s3413_s1, 2048  }
 0x482   : > { %3731 = vsyncadd (%p3621_p2), %s3413_s1, 4294965248  ;;  %s24_s22 = sadd.s32 1, %s3754_s22   ;;  %s5488_s17 = smov %s3738_s18 }
 0x483   : > { %p21_p3 = scmp.ge.s32.totalorder %s24_s22, 4   ;;  %s5489_s18 = smov %s3742_s19 }
 0x484   : > { %s5490_s19 = smov %s3874_s30  ;;  %s5491_s20 = smov %s3750_s21 }
 0x485   : > { %s5492_s21 = smov %s5494_s25  ;;  %23 = sbr.rel (!%p21_p3) target bundleno = 7 (0x7), region = 105 }
 0x48a   :  { %3418 = vsyncpa [#allocation3], 1 }
 0x48b   :  { %3420 = vsyncpa [#allocation3 + $0x1], 1 }

</bundles_post_ra>
